<compile_context>
chip_gen: v7x
topology: tpu7x:2x2x1
jax: 0.10.0
libtpu: 0.0.40
codegen_flags: <defaults>
</compile_context>

<pallas_src>
import math
import functools

import jax
import jax.numpy as jnp
from jax.experimental import pallas as pl
from jax.experimental.pallas import tpu as pltpu

LANE = 128   # lane width: every last block dim is padded to a multiple of this
SUB = 8      # sublane width
VMEM_LIMIT = 48 * 1024 * 1024   # <= v7x physical 64 MiB, well under v5e/v6e 128 MiB


def conv_output_size(image_size, kernel_size, stride, padding):
    return int((image_size - kernel_size + 2 * padding) / stride + 1)


def _round_up(x, m):
    return (x + m - 1) // m * m


def _pad_vec(v, n):
    out = jnp.zeros((1, n), jnp.float32)
    return out.at[0, : v.shape[0]].set(v.astype(jnp.float32))


def _pad_mat(m, rows, cols):
    out = jnp.zeros((rows, cols), jnp.float32)
    return out.at[: m.shape[0], : m.shape[1]].set(m.astype(jnp.float32))


# ---------------------------------------------------------------------------
# In-kernel helpers
# ---------------------------------------------------------------------------

def _masked_layernorm(x, g, b, d_valid):
    """LayerNorm over the first d_valid feature columns of a (rows, Dp) slab.

    Padded columns (>= d_valid) are assumed zero on input and produce zero on
    output (gamma/beta are zero-padded)."""
    dp = x.shape[-1]
    if d_valid == dp:
        mean = jnp.mean(x, axis=-1, keepdims=True)
        c = x - mean
        var = jnp.mean(c * c, axis=-1, keepdims=True)
    else:
        mask = jax.lax.broadcasted_iota(jnp.int32, x.shape, x.ndim - 1) < d_valid
        xm = jnp.where(mask, x, 0.0)
        mean = jnp.sum(xm, axis=-1, keepdims=True) * (1.0 / d_valid)
        c = jnp.where(mask, x - mean, 0.0)
        var = jnp.sum(c * c, axis=-1, keepdims=True) * (1.0 / d_valid)
    return c * jax.lax.rsqrt(var + 1e-5) * g + b


def _erf(x):
    # Abramowitz & Stegun 7.1.26 (|abs err| < 1.5e-7); only exp/div/select,
    # which all have guaranteed Mosaic lowerings.
    ax = jnp.abs(x)
    t = 1.0 / (1.0 + 0.3275911 * ax)
    poly = ((((1.061405429 * t - 1.453152027) * t + 1.421413741) * t
             - 0.284496736) * t + 0.254829592) * t
    y = 1.0 - poly * jnp.exp(-ax * ax)
    return jnp.where(x >= 0, y, -y)


def _gelu(x):
    # PyTorch nn.GELU() exact (erf) form, computed in f32 on the VPU.
    return 0.5 * x * (1.0 + _erf(x * 0.7071067811865475))


def _bf16(x):
    return x.astype(jnp.bfloat16)


# ---------------------------------------------------------------------------
# Fused transformer stack kernel: grid = (batch, depth)
#   x = x + out_proj(MHA(LN(x))); x = x + FF2(GELU(FF1(LN(x))))
# Activation slab kept resident in a VMEM f32 scratch across the depth axis.
# ---------------------------------------------------------------------------

def _layer_kernel(x_ref, ln1g_ref, ln1b_ref, qkvw_ref, *args,
                  heads, dim_head, hdp, d_valid, has_proj):
    if has_proj:
        (outw_ref, outb_ref, ln2g_ref, ln2b_ref,
         w1_ref, b1_ref, w2_ref, b2_ref, o_ref, act_ref) = args
    else:
        (ln2g_ref, ln2b_ref, w1_ref, b1_ref, w2_ref, b2_ref,
         o_ref, act_ref) = args
        outw_ref = outb_ref = None

    d_idx = pl.program_id(1)

    @pl.when(d_idx == 0)
    def _():
        act_ref[...] = x_ref[0].astype(jnp.float32)

    x = act_ref[...]                                       # (N, Dp) f32

    # ---- attention sub-layer (pre-norm) -----------------------------------
    h = _masked_layernorm(x, ln1g_ref[0], ln1b_ref[0], d_valid)
    # qkv_w packed [Q group | K group | V group], each hdp wide, Q pre-scaled.
    qkv = jnp.dot(_bf16(h), qkvw_ref[0],
                  preferred_element_type=jnp.float32)      # (N, 3*hdp)

    if has_proj:
        o_heads = []
        for hd in range(heads):
            q = qkv[:, hd * dim_head:(hd + 1) * dim_head]
            k = qkv[:, hdp + hd * dim_head:hdp + (hd + 1) * dim_head]
            v = qkv[:, 2 * hdp + hd * dim_head:2 * hdp + (hd + 1) * dim_head]
            s = jax.lax.dot_general(_bf16(q), _bf16(k),
                                    (((1,), (1,)), ((), ())),
                                    preferred_element_type=jnp.float32)
            s = s - jnp.max(s, axis=-1, keepdims=True)
            p = jnp.exp(s)
            p = p * pl.reciprocal(jnp.sum(p, axis=-1, keepdims=True),
                                  approx=True)
            o_heads.append(jnp.dot(_bf16(p), _bf16(v),
                                   preferred_element_type=jnp.float32))
        o_cat = o_heads[0] if heads == 1 else jnp.concatenate(o_heads, axis=-1)
        w_out = outw_ref[0]                                # (inner, Dp) bf16
        if w_out.shape[0] != o_cat.shape[-1]:              # static, normally no-op
            o_cat = jnp.pad(o_cat, ((0, 0),
                                    (0, w_out.shape[0] - o_cat.shape[-1])))
        # one K = heads*dim_head contraction instead of per-head dots + adds
        attn = jnp.dot(_bf16(o_cat), w_out,
                       preferred_element_type=jnp.float32) + outb_ref[0]
    else:
        # heads == 1, dim_head == dim (T2T stages): hdp == Dp, use full slabs.
        q = qkv[:, 0:hdp]
        k = qkv[:, hdp:2 * hdp]
        v = qkv[:, 2 * hdp:3 * hdp]
        s = jax.lax.dot_general(_bf16(q), _bf16(k), (((1,), (1,)), ((), ())),
                                preferred_element_type=jnp.float32)
        s = s - jnp.max(s, axis=-1, keepdims=True)
        p = jnp.exp(s)
        p = p * pl.reciprocal(jnp.sum(p, axis=-1, keepdims=True), approx=True)
        attn = jnp.dot(_bf16(p), _bf16(v), preferred_element_type=jnp.float32)
    x = x + attn

    # ---- feed-forward sub-layer (pre-norm) ---------------------------------
    h2 = _masked_layernorm(x, ln2g_ref[0], ln2b_ref[0], d_valid)
    f = jnp.dot(_bf16(h2), w1_ref[0],
                preferred_element_type=jnp.float32) + b1_ref[0]
    f = _gelu(f)
    f = jnp.dot(_bf16(f), w2_ref[0],
                preferred_element_type=jnp.float32) + b2_ref[0]
    act_ref[...] = x + f

    @pl.when(d_idx == pl.num_programs(1) - 1)
    def _():
        o_ref[0] = act_ref[...].astype(o_ref.dtype)


def run_layers(x_p, sp, *, heads, dim_head, d_valid):
    """Run a whole stack of identical pre-norm transformer layers in one call.

    x_p: (B, N, Dp) f32 tokens, last (Dp - d_valid) feature columns zero.
    sp:  dict of per-layer weights stacked along a leading depth axis (bf16
         matmul weights, f32 gammas/betas/biases)."""
    B, N, Dp = x_p.shape
    depth = sp["qkv_w"].shape[0]
    hdp = sp["qkv_w"].shape[-1] // 3
    has_proj = sp["out_w"] is not None

    def wspec(arr):
        n_trail = arr.ndim - 1
        # TODO(synk): pipeline_mode=pl.Buffered(1) to stop double-buffering
        # these depth-indexed weight blocks once weight VMEM is the limiter.
        return pl.BlockSpec((1,) + arr.shape[1:],
                            lambda b, d, _n=n_trail: (d,) + (0,) * _n)

    args = [x_p, sp["ln1_g"], sp["ln1_b"], sp["qkv_w"]]
    in_specs = [pl.BlockSpec((1, N, Dp), lambda b, d: (b, 0, 0)),
                wspec(sp["ln1_g"]), wspec(sp["ln1_b"]), wspec(sp["qkv_w"])]
    if has_proj:
        args += [sp["out_w"], sp["out_b"]]
        in_specs += [wspec(sp["out_w"]), wspec(sp["out_b"])]
    args += [sp["ln2_g"], sp["ln2_b"], sp["w1"], sp["b1"], sp["w2"], sp["b2"]]
    in_specs += [wspec(sp["ln2_g"]), wspec(sp["ln2_b"]), wspec(sp["w1"]),
                 wspec(sp["b1"]), wspec(sp["w2"]), wspec(sp["b2"])]

    kernel = functools.partial(
        _layer_kernel, heads=heads, dim_head=dim_head, hdp=hdp,
        d_valid=d_valid, has_proj=has_proj)

    return pl.pallas_call(
        kernel,
        out_shape=jax.ShapeDtypeStruct((B, N, Dp), x_p.dtype),
        grid=(B, depth),
        in_specs=in_specs,
        out_specs=pl.BlockSpec((1, N, Dp), lambda b, d: (b, 0, 0)),
        scratch_shapes=[pltpu.VMEM((N, Dp), jnp.float32)],
        compiler_params=pltpu.CompilerParams(
            dimension_semantics=("parallel", "arbitrary"),
            vmem_limit_bytes=VMEM_LIMIT),
    )(*args)


# ---------------------------------------------------------------------------
# K-tiled linear (T2T projection) and fused classification head
# ---------------------------------------------------------------------------

def _linear_kernel(x_ref, w_ref, b_ref, o_ref, acc_ref):
    k = pl.program_id(1)

    @pl.when(k == 0)
    def _():
        acc_ref[...] = jnp.zeros_like(acc_ref)

    acc_ref[...] += jnp.dot(x_ref[...].astype(jnp.bfloat16), w_ref[...],
                            preferred_element_type=jnp.float32)

    @pl.when(k == pl.num_programs(1) - 1)
    def _():
        o_ref[...] = (acc_ref[...] + b_ref[...]).astype(o_ref.dtype)


def pallas_linear(x_p, w_p, b_p, *, row_tile=512, k_tile=512):
    """x_p: (M, Kp) f32, w_p: (Kp, Np) bf16, b_p: (1, Np) f32; lane dims padded.

    Row-tiled ("parallel") and K-tiled ("arbitrary", last) with an f32 VMEM
    accumulator so neither the full weight nor the full x block must fit."""
    M, Kp = x_p.shape
    Np = w_p.shape[1]
    tm = min(row_tile, _round_up(M, SUB))
    Mp = _round_up(M, tm)
    tk = min(k_tile, Kp)
    Kpp = _round_up(Kp, tk)
    if Mp != M or Kpp != Kp:
        x_p = jnp.pad(x_p, ((0, Mp - M), (0, Kpp - Kp)))
    if Kpp != Kp:
        w_p = jnp.pad(w_p, ((0, Kpp - Kp), (0, 0)))
    out = pl.pallas_call(
        _linear_kernel,
        out_shape=jax.ShapeDtypeStruct((Mp, Np), jnp.float32),
        grid=(Mp // tm, Kpp // tk),
        in_specs=[pl.BlockSpec((tm, tk), lambda i, k: (i, k)),
                  pl.BlockSpec((tk, Np), lambda i, k: (k, 0)),
                  pl.BlockSpec((1, Np), lambda i, k: (0, 0))],
        out_specs=pl.BlockSpec((tm, Np), lambda i, k: (i, 0)),
        scratch_shapes=[pltpu.VMEM((tm, Np), jnp.float32)],
        compiler_params=pltpu.CompilerParams(
            dimension_semantics=("parallel", "arbitrary"),
            vmem_limit_bytes=VMEM_LIMIT),
    )(x_p, w_p, b_p)
    return out[:M]


def _head_kernel(x_ref, g_ref, b_ref, w_ref, hb_ref, o_ref, *, d_valid):
    x = x_ref[...].astype(jnp.float32)
    h = _masked_layernorm(x, g_ref[...], b_ref[...], d_valid)
    acc = jnp.dot(h.astype(jnp.bfloat16), w_ref[...],
                  preferred_element_type=jnp.float32)
    o_ref[...] = (acc + hb_ref[...]).astype(o_ref.dtype)


def pallas_head(x_p, params):
    """Fused mlp_head: LayerNorm(dim) + Linear(dim, num_classes), one launch."""
    B, Dp = x_p.shape
    w = params["head_w"]
    Cp = w.shape[1]
    kernel = functools.partial(_head_kernel, d_valid=params["dim"])
    return pl.pallas_call(
        kernel,
        out_shape=jax.ShapeDtypeStruct((B, Cp), jnp.float32),
        grid=(1,),
        in_specs=[pl.BlockSpec((B, Dp), lambda i: (0, 0)),
                  pl.BlockSpec((1, Dp), lambda i: (0, 0)),
                  pl.BlockSpec((1, Dp), lambda i: (0, 0)),
                  pl.BlockSpec((Dp, Cp), lambda i: (0, 0)),
                  pl.BlockSpec((1, Cp), lambda i: (0, 0))],
        out_specs=pl.BlockSpec((B, Cp), lambda i: (0, 0)),
        compiler_params=pltpu.CompilerParams(
            dimension_semantics=("arbitrary",),
            vmem_limit_bytes=VMEM_LIMIT),
    )(x_p, params["head_ln_g"], params["head_ln_b"], w, params["head_b"])


# ---------------------------------------------------------------------------
# T2T module glue: nn.Unfold + rearranges (layout only, no heavy compute)
# ---------------------------------------------------------------------------

def unfold(x, k, s, p):
    """nn.Unfold on NCHW: (B, C, H, W) -> (B, C*k*k, L) with PyTorch ordering."""
    B, C, H, W = x.shape
    xp = jnp.pad(x, ((0, 0), (0, 0), (p, p), (p, p)))
    oh = (H - k + 2 * p) // s + 1
    ow = (W - k + 2 * p) // s + 1
    patches = []
    for i in range(k):
        for j in range(k):
            patches.append(xp[:, :, i:i + s * oh:s, j:j + s * ow:s])
    pt = jnp.stack(patches, axis=2)            # (B, C, k*k, oh, ow)
    return pt.reshape(B, C * k * k, oh * ow)


def t2t_module_forward(img, t2t_params, t2t_layers):
    B = img.shape[0]
    prev_d = img.shape[1]
    x = None
    for idx, ((ks, st), stage) in enumerate(zip(t2t_layers,
                                                t2t_params["stages"])):
        if idx == 0:
            xi = img
        else:
            n = x.shape[1]
            h = int(math.sqrt(n))
            # RearrangeImage: 'b (h w) c -> b c h w' on the un-padded features.
            xi = x[:, :, :prev_d].transpose(0, 2, 1).reshape(B, prev_d, h, h)
        # TODO(synk): at production image sizes, fuse this im2col into the first
        # matmul of the stage (scalar-prefetched patch offsets) instead of
        # materialising the k*k-duplicated tensor in HBM.
        u = unfold(xi, ks, st, st // 2)        # (B, d, L), d = prev_d*ks*ks
        tokens = u.transpose(0, 2, 1)          # 'b c n -> b n c'
        d = tokens.shape[-1]
        dp = _round_up(d, LANE)
        tokens = jnp.pad(tokens, ((0, 0), (0, 0), (0, dp - d)))
        # Transformer(dim=d, heads=1, depth=1, dim_head=d, mlp_dim=d)
        x = run_layers(tokens, stage, heads=1, dim_head=d, d_valid=d)
        prev_d = d
    B, n, dp = x.shape
    y = pallas_linear(x.reshape(B * n, dp),
                      t2t_params["proj_w"], t2t_params["proj_b"])
    return y.reshape(B, n, -1)                 # (B, n, dim_p), feature-padded


def t2t_vit_forward(img, params, *, heads, dim_head, t2t_layers, pool="cls"):
    x = t2t_module_forward(img, params["t2t"], t2t_layers)   # (B, n, dim_p)
    B = x.shape[0]
    Dp = x.shape[-1]
    cls = jnp.broadcast_to(params["cls_token"], (B, 1, Dp))
    x = jnp.concatenate([cls, x], axis=1)
    x = x + params["pos_embedding"]
    # emb_dropout / dropout -> identity in inference mode
    x = run_layers(x, params["transformer"], heads=heads, dim_head=dim_head,
                   d_valid=params["dim"])
    x = jnp.mean(x, axis=1) if pool == "mean" else x[:, 0]   # (B, dim_p)
    logits = pallas_head(x, params)                           # (B, classes_p)
    return logits[:, :params["num_classes"]]


# ---------------------------------------------------------------------------
# Deterministic parameter construction (pre-padded / packed / bf16 weights)
# ---------------------------------------------------------------------------

def _normal(key, shape, scale=0.02):
    return scale * jax.random.normal(key, shape, dtype=jnp.float32)


def _pack_qkv(qkv_w, heads, dim_head, dp, hdp, scale):
    """(dim, 3*heads*dim_head) torch order -> (dp, 3*hdp) dense-group packed
    bf16, with the 1/sqrt(dim_head) scale folded into the Q columns."""
    dim = qkv_w.shape[0]
    inner = heads * dim_head
    packed = jnp.zeros((dp, 3 * hdp), jnp.float32)
    packed = packed.at[:dim, 0:inner].set(qkv_w[:, 0:inner] * scale)
    packed = packed.at[:dim, hdp:hdp + inner].set(qkv_w[:, inner:2 * inner])
    packed = packed.at[:dim, 2 * hdp:2 * hdp + inner].set(qkv_w[:, 2 * inner:])
    return packed.astype(jnp.bfloat16)


def _pack_out(out_w, dp):
    """(inner, dim) -> (inner, dp) bf16 (rows stay dense, lanes padded)."""
    inner, dim = out_w.shape
    packed = jnp.zeros((inner, dp), jnp.float32)
    packed = packed.at[:, :dim].set(out_w)
    return packed.astype(jnp.bfloat16)


def make_layer_params(key, dim, heads, dim_head, mlp_dim):
    project_out = not (heads == 1 and dim_head == dim)
    inner = heads * dim_head
    dp = _round_up(dim, LANE)
    hdp = _round_up(inner, LANE)
    mp = _round_up(mlp_dim, LANE)
    scale = dim_head ** -0.5
    k1, k2, k3, k4, k5, k6 = jax.random.split(key, 6)
    lp = {
        "ln1_g": _pad_vec(jnp.ones((dim,), jnp.float32), dp),
        "ln1_b": _pad_vec(jnp.zeros((dim,), jnp.float32), dp),
        # to_qkv has bias=False in the reference.
        "qkv_w": _pack_qkv(_normal(k1, (dim, 3 * inner)), heads, dim_head,
                           dp, hdp, scale),
        "out_w": None,
        "out_b": None,
        "ln2_g": _pad_vec(jnp.ones((dim,), jnp.float32), dp),
        "ln2_b": _pad_vec(jnp.zeros((dim,), jnp.float32), dp),
        "w1": _pad_mat(_normal(k4, (dim, mlp_dim)), dp, mp).astype(jnp.bfloat16),
        "b1": _pad_vec(_normal(k5, (mlp_dim,)), mp),
        "w2": _pad_mat(_normal(k6, (mlp_dim, dim)), mp, dp).astype(jnp.bfloat16),
        "b2": _pad_vec(jnp.zeros((dim,), jnp.float32), dp),
    }
    if project_out:
        lp["out_w"] = _pack_out(_normal(k2, (inner, dim)), dp)
        lp["out_b"] = _pad_vec(_normal(k3, (dim,)), dp)
    return lp


def stack_layers(layer_list):
    """Stack identically-shaped per-layer params along a leading depth axis."""
    out = {}
    for key in layer_list[0]:
        vals = [lp[key] for lp in layer_list]
        out[key] = None if vals[0] is None else jnp.stack(vals, axis=0)
    return out


def make_t2t_vit_params(key, *, image_size, num_classes, dim, depth, heads,
                        dim_head, mlp_dim, channels, t2t_layers):
    layer_dim = channels
    out_size = image_size
    stages = []
    for (ks, st) in t2t_layers:
        layer_dim *= ks * ks
        out_size = conv_output_size(out_size, ks, st, st // 2)
        key, sub = jax.random.split(key)
        # Transformer(dim=layer_dim, heads=1, depth=1, dim_head=layer_dim, mlp_dim=layer_dim)
        stages.append(stack_layers(
            [make_layer_params(sub, layer_dim, 1, layer_dim, layer_dim)]))
    dim_p = _round_up(dim, LANE)
    last_dp = _round_up(layer_dim, LANE)
    nc_p = _round_up(num_classes, LANE)
    key, kp, kb, kpos, kcls, kh, khb = jax.random.split(key, 7)
    n_tokens = out_size ** 2 + 1
    pos = jnp.zeros((1, n_tokens, dim_p), jnp.float32)
    pos = pos.at[..., :dim].set(jax.random.normal(kpos, (1, n_tokens, dim),
                                                  jnp.float32))
    cls = jnp.zeros((1, 1, dim_p), jnp.float32)
    cls = cls.at[..., :dim].set(jax.random.normal(kcls, (1, 1, dim), jnp.float32))
    layers = []
    for _ in range(depth):
        key, sub = jax.random.split(key)
        layers.append(make_layer_params(sub, dim, heads, dim_head, mlp_dim))
    return {
        "t2t": {
            "stages": stages,
            "proj_w": _pad_mat(_normal(kp, (layer_dim, dim)),
                               last_dp, dim_p).astype(jnp.bfloat16),
            "proj_b": _pad_vec(_normal(kb, (dim,)), dim_p),
        },
        "pos_embedding": pos,
        "cls_token": cls,
        "transformer": stack_layers(layers),
        "head_ln_g": _pad_vec(jnp.ones((dim,), jnp.float32), dim_p),
        "head_ln_b": _pad_vec(jnp.zeros((dim,), jnp.float32), dim_p),
        "head_w": _pad_mat(_normal(kh, (dim, num_classes)),
                           dim_p, nc_p).astype(jnp.bfloat16),
        "head_b": _pad_vec(_normal(khb, (num_classes,)), nc_p),
        "dim": dim,
        "num_classes": num_classes,
        "out_size": out_size,
    }


# ---------------------------------------------------------------------------

if __name__ == "__main__":
    batch, channels, image_size = 2, 3, 16
    num_classes, dim, depth, heads, dim_head, mlp_dim = 10, 32, 2, 2, 16, 64
    t2t_layers = ((3, 2), (3, 2))   # layer_dims: 3*9=27 -> 27*9=243; 16->8->4

    key = jax.random.PRNGKey(0)
    key, kimg, kparam = jax.random.split(key, 3)
    img = jax.random.normal(kimg, (batch, channels, image_size, image_size),
                            jnp.float32)
    params = make_t2t_vit_params(
        kparam, image_size=image_size, num_classes=num_classes, dim=dim,
        depth=depth, heads=heads, dim_head=dim_head, mlp_dim=mlp_dim,
        channels=channels, t2t_layers=t2t_layers)

    @jax.jit
    def fwd(image):
        # params is closed over so padded-dim / head-count metadata stays static.
        return t2t_vit_forward(image, params, heads=heads, dim_head=dim_head,
                               t2t_layers=t2t_layers, pool="cls")

    out = jax.block_until_ready(fwd(img))
    assert out.shape == (batch, num_classes), out.shape
    assert bool(jnp.all(jnp.isfinite(out)))
    print("KERNEL_OK")
</pallas_src>

<mosaic_0001>
module attributes {stable_mosaic.version = 11 : i64} {
  func.func @_layer_kernel(%arg0: i32, %arg1: i32, %arg2: memref<1x64x128xf32, #tpu.memory_space<vmem>>, %arg3: memref<1x1x128xf32, #tpu.memory_space<vmem>>, %arg4: memref<1x1x128xf32, #tpu.memory_space<vmem>>, %arg5: memref<1x128x384xbf16, #tpu.memory_space<vmem>>, %arg6: memref<1x1x128xf32, #tpu.memory_space<vmem>>, %arg7: memref<1x1x128xf32, #tpu.memory_space<vmem>>, %arg8: memref<1x128x128xbf16, #tpu.memory_space<vmem>>, %arg9: memref<1x1x128xf32, #tpu.memory_space<vmem>>, %arg10: memref<1x128x128xbf16, #tpu.memory_space<vmem>>, %arg11: memref<1x1x128xf32, #tpu.memory_space<vmem>>, %arg12: memref<1x64x128xf32, #tpu.memory_space<vmem>>, %arg13: memref<64x128xf32, #tpu.memory_space<vmem>>) attributes {dimension_semantics = [#tpu.dimension_semantics<parallel>, #tpu.dimension_semantics<arbitrary>], iteration_bounds = array<i64: 2, 1>, scalar_prefetch = 0 : i64, scratch_operands = 1 : i64, tpu.core_type = #tpu.core_type<tc>, window_params = [{transform_indices = @transform_0, window_bounds = array<i64: 1, 64, 128>}, {transform_indices = @transform_1, window_bounds = array<i64: 1, 1, 128>}, {transform_indices = @transform_2, window_bounds = array<i64: 1, 1, 128>}, {transform_indices = @transform_3, window_bounds = array<i64: 1, 128, 384>}, {transform_indices = @transform_4, window_bounds = array<i64: 1, 1, 128>}, {transform_indices = @transform_5, window_bounds = array<i64: 1, 1, 128>}, {transform_indices = @transform_6, window_bounds = array<i64: 1, 128, 128>}, {transform_indices = @transform_7, window_bounds = array<i64: 1, 1, 128>}, {transform_indices = @transform_8, window_bounds = array<i64: 1, 128, 128>}, {transform_indices = @transform_9, window_bounds = array<i64: 1, 1, 128>}, {transform_indices = @transform_10, window_bounds = array<i64: 1, 64, 128>}]} {
    %c0_i32 = arith.constant 0 : i32
    %0 = arith.cmpi eq, %arg1, %c0_i32 : i32
    %1 = arith.extui %0 : i1 to i32
    %c0_i32_0 = arith.constant 0 : i32
    %2 = arith.cmpi ne, %1, %c0_i32_0 : i32
    scf.if %2 {
      %c0_69 = arith.constant 0 : index
      %c0_70 = arith.constant 0 : index
      %c0_71 = arith.constant 0 : index
      %151 = vector.load %arg2[%c0_69, %c0_70, %c0_71] : memref<1x64x128xf32, #tpu.memory_space<vmem>>, vector<1x64x128xf32>
      %152 = vector.shape_cast %151 : vector<1x64x128xf32> to vector<64x128xf32>
      %c0_72 = arith.constant 0 : index
      %c0_73 = arith.constant 0 : index
      %153 = vector.load %arg13[%c0_72, %c0_73] : memref<64x128xf32, #tpu.memory_space<vmem>>, vector<64x128xf32>
      tpu.vector_store %arg13[%c0_72, %c0_73], %152 {strides = array<i32>} : memref<64x128xf32, #tpu.memory_space<vmem>>, vector<64x128xf32>,
    } else {
    }
    %c0 = arith.constant 0 : index
    %c0_1 = arith.constant 0 : index
    %3 = vector.load %arg13[%c0, %c0_1] : memref<64x128xf32, #tpu.memory_space<vmem>>, vector<64x128xf32>
    %c0_2 = arith.constant 0 : index
    %c0_3 = arith.constant 0 : index
    %c0_4 = arith.constant 0 : index
    %4 = vector.load %arg3[%c0_2, %c0_3, %c0_4] : memref<1x1x128xf32, #tpu.memory_space<vmem>>, vector<1x1x128xf32>
    %5 = vector.shape_cast %4 : vector<1x1x128xf32> to vector<1x128xf32>
    %c0_5 = arith.constant 0 : index
    %c0_6 = arith.constant 0 : index
    %c0_7 = arith.constant 0 : index
    %6 = vector.load %arg4[%c0_5, %c0_6, %c0_7] : memref<1x1x128xf32, #tpu.memory_space<vmem>>, vector<1x1x128xf32>
    %7 = vector.shape_cast %6 : vector<1x1x128xf32> to vector<1x128xf32>
    %8 = tpu.iota {dimensions = array<i32: 1>} : vector<64x128xi32>
    %c27_i32 = arith.constant 27 : i32
    %9 = vector.broadcast %c27_i32 : i32 to vector<64x128xi32>
    %10 = arith.cmpi slt, %8, %9 : vector<64x128xi32>
    %cst = arith.constant 0.000000e+00 : f32
    %11 = vector.broadcast %cst : f32 to vector<64x128xf32>
    %12 = arith.select %10, %3, %11 : vector<64x128xi1>, vector<64x128xf32>
    %cst_8 = arith.constant dense<0.000000e+00> : vector<64xf32>
    %13 = vector.multi_reduction <add>, %12, %cst_8 [1] : vector<64x128xf32> to vector<64xf32>
    %14 = vector.shape_cast %13 : vector<64xf32> to vector<64x1xf32>
    %cst_9 = arith.constant 0.0370370373 : f32
    %15 = vector.broadcast %cst_9 : f32 to vector<64x1xf32>
    %16 = arith.mulf %14, %15 : vector<64x1xf32>
    %17 = vector.broadcast %16 : vector<64x1xf32> to vector<64x128xf32>
    %18 = arith.subf %3, %17 : vector<64x128xf32>
    %cst_10 = arith.constant 0.000000e+00 : f32
    %19 = vector.broadcast %cst_10 : f32 to vector<64x128xf32>
    %20 = arith.select %10, %18, %19 : vector<64x128xi1>, vector<64x128xf32>
    %21 = arith.mulf %20, %20 : vector<64x128xf32>
    %cst_11 = arith.constant dense<0.000000e+00> : vector<64xf32>
    %22 = vector.multi_reduction <add>, %21, %cst_11 [1] : vector<64x128xf32> to vector<64xf32>
    %23 = vector.shape_cast %22 : vector<64xf32> to vector<64x1xf32>
    %cst_12 = arith.constant 0.0370370373 : f32
    %24 = vector.broadcast %cst_12 : f32 to vector<64x1xf32>
    %25 = arith.mulf %23, %24 : vector<64x1xf32>
    %cst_13 = arith.constant 9.99999974E-6 : f32
    %26 = vector.broadcast %cst_13 : f32 to vector<64x1xf32>
    %27 = arith.addf %25, %26 : vector<64x1xf32>
    %28 = math.rsqrt %27 : vector<64x1xf32>
    %29 = vector.broadcast %28 : vector<64x1xf32> to vector<64x128xf32>
    %30 = arith.mulf %20, %29 : vector<64x128xf32>
    %31 = vector.broadcast %5 : vector<1x128xf32> to vector<64x128xf32>
    %32 = arith.mulf %30, %31 : vector<64x128xf32>
    %33 = vector.broadcast %7 : vector<1x128xf32> to vector<64x128xf32>
    %34 = arith.addf %32, %33 : vector<64x128xf32>
    %35 = arith.truncf %34 : vector<64x128xf32> to vector<64x128xbf16>
    %c0_14 = arith.constant 0 : index
    %c0_15 = arith.constant 0 : index
    %c0_16 = arith.constant 0 : index
    %36 = vector.load %arg5[%c0_14, %c0_15, %c0_16] : memref<1x128x384xbf16, #tpu.memory_space<vmem>>, vector<1x128x384xbf16>
    %37 = vector.shape_cast %36 : vector<1x128x384xbf16> to vector<128x384xbf16>
    %cst_17 = arith.constant dense<0.000000e+00> : vector<64x384xf32>
    %38 = tpu.matmul %35, %37, %cst_17 {dimension_numbers = #tpu.dot_dimension_numbers<[1], [0], [0], [1], [0, 0, 1, 1], [], []>} : vector<64x128xbf16>, vector<128x384xbf16>, vector<64x384xf32> -> vector<64x384xf32>
    %39 = vector.extract_strided_slice %38 {offsets = [0, 0], sizes = [64, 128], strides = [1, 1]} : vector<64x384xf32> to vector<64x128xf32>
    %40 = vector.extract_strided_slice %38 {offsets = [0, 128], sizes = [64, 128], strides = [1, 1]} : vector<64x384xf32> to vector<64x128xf32>
    %41 = vector.extract_strided_slice %38 {offsets = [0, 256], sizes = [64, 128], strides = [1, 1]} : vector<64x384xf32> to vector<64x128xf32>
    %42 = arith.truncf %39 : vector<64x128xf32> to vector<64x128xbf16>
    %43 = arith.truncf %40 : vector<64x128xf32> to vector<64x128xbf16>
    %cst_18 = arith.constant dense<0.000000e+00> : vector<64x64xf32>
    %44 = tpu.matmul %42, %43, %cst_18 {dimension_numbers = #tpu.dot_dimension_numbers<[1], [1], [0], [0], [0, 0, 1, 0], [], []>} : vector<64x128xbf16>, vector<64x128xbf16>, vector<64x64xf32> -> vector<64x64xf32>
    %cst_19 = arith.constant dense<0xFF800000> : vector<64xf32>
    %45 = vector.multi_reduction <maximumf>, %44, %cst_19 [1] : vector<64x64xf32> to vector<64xf32>
    %46 = vector.shape_cast %45 : vector<64xf32> to vector<64x1xf32>
    %47 = vector.broadcast %46 : vector<64x1xf32> to vector<64x64xf32>
    %48 = arith.subf %44, %47 : vector<64x64xf32>
    %49 = math.exp %48 : vector<64x64xf32>
    %cst_20 = arith.constant dense<0.000000e+00> : vector<64xf32>
    %50 = vector.multi_reduction <add>, %49, %cst_20 [1] : vector<64x64xf32> to vector<64xf32>
    %51 = vector.shape_cast %50 : vector<64xf32> to vector<64x1xf32>
    %52 = tpu.reciprocal %51 {approx = true} : vector<64x1xf32> -> vector<64x1xf32>
    %53 = vector.broadcast %52 : vector<64x1xf32> to vector<64x64xf32>
    %54 = arith.mulf %49, %53 : vector<64x64xf32>
    %55 = arith.truncf %54 : vector<64x64xf32> to vector<64x64xbf16>
    %56 = arith.truncf %41 : vector<64x128xf32> to vector<64x128xbf16>
    %cst_21 = arith.constant dense<0.000000e+00> : vector<64x128xf32>
    %57 = tpu.matmul %55, %56, %cst_21 {dimension_numbers = #tpu.dot_dimension_numbers<[1], [0], [0], [1], [0, 0, 1, 1], [], []>} : vector<64x64xbf16>, vector<64x128xbf16>, vector<64x128xf32> -> vector<64x128xf32>
    %58 = arith.addf %3, %57 : vector<64x128xf32>
    %c0_22 = arith.constant 0 : index
    %c0_23 = arith.constant 0 : index
    %c0_24 = arith.constant 0 : index
    %59 = vector.load %arg6[%c0_22, %c0_23, %c0_24] : memref<1x1x128xf32, #tpu.memory_space<vmem>>, vector<1x1x128xf32>
    %60 = vector.shape_cast %59 : vector<1x1x128xf32> to vector<1x128xf32>
    %c0_25 = arith.constant 0 : index
    %c0_26 = arith.constant 0 : index
    %c0_27 = arith.constant 0 : index
    %61 = vector.load %arg7[%c0_25, %c0_26, %c0_27] : memref<1x1x128xf32, #tpu.memory_space<vmem>>, vector<1x1x128xf32>
    %62 = vector.shape_cast %61 : vector<1x1x128xf32> to vector<1x128xf32>
    %63 = tpu.iota {dimensions = array<i32: 1>} : vector<64x128xi32>
    %c27_i32_28 = arith.constant 27 : i32
    %64 = vector.broadcast %c27_i32_28 : i32 to vector<64x128xi32>
    %65 = arith.cmpi slt, %63, %64 : vector<64x128xi32>
    %cst_29 = arith.constant 0.000000e+00 : f32
    %66 = vector.broadcast %cst_29 : f32 to vector<64x128xf32>
    %67 = arith.select %65, %58, %66 : vector<64x128xi1>, vector<64x128xf32>
    %cst_30 = arith.constant dense<0.000000e+00> : vector<64xf32>
    %68 = vector.multi_reduction <add>, %67, %cst_30 [1] : vector<64x128xf32> to vector<64xf32>
    %69 = vector.shape_cast %68 : vector<64xf32> to vector<64x1xf32>
    %cst_31 = arith.constant 0.0370370373 : f32
    %70 = vector.broadcast %cst_31 : f32 to vector<64x1xf32>
    %71 = arith.mulf %69, %70 : vector<64x1xf32>
    %72 = vector.broadcast %71 : vector<64x1xf32> to vector<64x128xf32>
    %73 = arith.subf %58, %72 : vector<64x128xf32>
    %cst_32 = arith.constant 0.000000e+00 : f32
    %74 = vector.broadcast %cst_32 : f32 to vector<64x128xf32>
    %75 = arith.select %65, %73, %74 : vector<64x128xi1>, vector<64x128xf32>
    %76 = arith.mulf %75, %75 : vector<64x128xf32>
    %cst_33 = arith.constant dense<0.000000e+00> : vector<64xf32>
    %77 = vector.multi_reduction <add>, %76, %cst_33 [1] : vector<64x128xf32> to vector<64xf32>
    %78 = vector.shape_cast %77 : vector<64xf32> to vector<64x1xf32>
    %cst_34 = arith.constant 0.0370370373 : f32
    %79 = vector.broadcast %cst_34 : f32 to vector<64x1xf32>
    %80 = arith.mulf %78, %79 : vector<64x1xf32>
    %cst_35 = arith.constant 9.99999974E-6 : f32
    %81 = vector.broadcast %cst_35 : f32 to vector<64x1xf32>
    %82 = arith.addf %80, %81 : vector<64x1xf32>
    %83 = math.rsqrt %82 : vector<64x1xf32>
    %84 = vector.broadcast %83 : vector<64x1xf32> to vector<64x128xf32>
    %85 = arith.mulf %75, %84 : vector<64x128xf32>
    %86 = vector.broadcast %60 : vector<1x128xf32> to vector<64x128xf32>
    %87 = arith.mulf %85, %86 : vector<64x128xf32>
    %88 = vector.broadcast %62 : vector<1x128xf32> to vector<64x128xf32>
    %89 = arith.addf %87, %88 : vector<64x128xf32>
    %90 = arith.truncf %89 : vector<64x128xf32> to vector<64x128xbf16>
    %c0_36 = arith.constant 0 : index
    %c0_37 = arith.constant 0 : index
    %c0_38 = arith.constant 0 : index
    %91 = vector.load %arg8[%c0_36, %c0_37, %c0_38] : memref<1x128x128xbf16, #tpu.memory_space<vmem>>, vector<1x128x128xbf16>
    %92 = vector.shape_cast %91 : vector<1x128x128xbf16> to vector<128x128xbf16>
    %cst_39 = arith.constant dense<0.000000e+00> : vector<64x128xf32>
    %93 = tpu.matmul %90, %92, %cst_39 {dimension_numbers = #tpu.dot_dimension_numbers<[1], [0], [0], [1], [0, 0, 1, 1], [], []>} : vector<64x128xbf16>, vector<128x128xbf16>, vector<64x128xf32> -> vector<64x128xf32>
    %c0_40 = arith.constant 0 : index
    %c0_41 = arith.constant 0 : index
    %c0_42 = arith.constant 0 : index
    %94 = vector.load %arg9[%c0_40, %c0_41, %c0_42] : memref<1x1x128xf32, #tpu.memory_space<vmem>>, vector<1x1x128xf32>
    %95 = vector.shape_cast %94 : vector<1x1x128xf32> to vector<1x128xf32>
    %96 = vector.broadcast %95 : vector<1x128xf32> to vector<64x128xf32>
    %97 = arith.addf %93, %96 : vector<64x128xf32>
    %cst_43 = arith.constant 5.000000e-01 : f32
    %98 = vector.broadcast %cst_43 : f32 to vector<64x128xf32>
    %99 = arith.mulf %98, %97 : vector<64x128xf32>
    %cst_44 = arith.constant 0.707106769 : f32
    %100 = vector.broadcast %cst_44 : f32 to vector<64x128xf32>
    %101 = arith.mulf %97, %100 : vector<64x128xf32>
    %102 = math.absf %101 : vector<64x128xf32>
    %cst_45 = arith.constant 0.327591091 : f32
    %103 = vector.broadcast %cst_45 : f32 to vector<64x128xf32>
    %104 = arith.mulf %103, %102 : vector<64x128xf32>
    %cst_46 = arith.constant 1.000000e+00 : f32
    %105 = vector.broadcast %cst_46 : f32 to vector<64x128xf32>
    %106 = arith.addf %105, %104 : vector<64x128xf32>
    %cst_47 = arith.constant 1.000000e+00 : f32
    %107 = vector.broadcast %cst_47 : f32 to vector<64x128xf32>
    %108 = arith.divf %107, %106 : vector<64x128xf32>
    %cst_48 = arith.constant 1.06140542 : f32
    %109 = vector.broadcast %cst_48 : f32 to vector<64x128xf32>
    %110 = arith.mulf %109, %108 : vector<64x128xf32>
    %cst_49 = arith.constant 1.45315206 : f32
    %111 = vector.broadcast %cst_49 : f32 to vector<64x128xf32>
    %112 = arith.subf %110, %111 : vector<64x128xf32>
    %113 = arith.mulf %112, %108 : vector<64x128xf32>
    %cst_50 = arith.constant 1.42141378 : f32
    %114 = vector.broadcast %cst_50 : f32 to vector<64x128xf32>
    %115 = arith.addf %113, %114 : vector<64x128xf32>
    %116 = arith.mulf %115, %108 : vector<64x128xf32>
    %cst_51 = arith.constant 0.284496725 : f32
    %117 = vector.broadcast %cst_51 : f32 to vector<64x128xf32>
    %118 = arith.subf %116, %117 : vector<64x128xf32>
    %119 = arith.mulf %118, %108 : vector<64x128xf32>
    %cst_52 = arith.constant 0.254829586 : f32
    %120 = vector.broadcast %cst_52 : f32 to vector<64x128xf32>
    %121 = arith.addf %119, %120 : vector<64x128xf32>
    %122 = arith.mulf %121, %108 : vector<64x128xf32>
    %cst_53 = arith.constant 0.000000e+00 : f32
    %123 = vector.broadcast %cst_53 : f32 to vector<64x128xf32>
    %124 = arith.subf %123, %102 : vector<64x128xf32>
    %125 = arith.mulf %124, %102 : vector<64x128xf32>
    %126 = math.exp %125 : vector<64x128xf32>
    %127 = arith.mulf %122, %126 : vector<64x128xf32>
    %cst_54 = arith.constant 1.000000e+00 : f32
    %128 = vector.broadcast %cst_54 : f32 to vector<64x128xf32>
    %129 = arith.subf %128, %127 : vector<64x128xf32>
    %cst_55 = arith.constant 0.000000e+00 : f32
    %130 = vector.broadcast %cst_55 : f32 to vector<64x128xf32>
    %131 = arith.cmpf oge, %101, %130 : vector<64x128xf32>
    %cst_56 = arith.constant 0.000000e+00 : f32
    %132 = vector.broadcast %cst_56 : f32 to vector<64x128xf32>
    %133 = arith.subf %132, %129 : vector<64x128xf32>
    %134 = arith.select %131, %129, %133 : vector<64x128xi1>, vector<64x128xf32>
    %cst_57 = arith.constant 1.000000e+00 : f32
    %135 = vector.broadcast %cst_57 : f32 to vector<64x128xf32>
    %136 = arith.addf %135, %134 : vector<64x128xf32>
    %137 = arith.mulf %99, %136 : vector<64x128xf32>
    %138 = arith.truncf %137 : vector<64x128xf32> to vector<64x128xbf16>
    %c0_58 = arith.constant 0 : index
    %c0_59 = arith.constant 0 : index
    %c0_60 = arith.constant 0 : index
    %139 = vector.load %arg10[%c0_58, %c0_59, %c0_60] : memref<1x128x128xbf16, #tpu.memory_space<vmem>>, vector<1x128x128xbf16>
    %140 = vector.shape_cast %139 : vector<1x128x128xbf16> to vector<128x128xbf16>
    %cst_61 = arith.constant dense<0.000000e+00> : vector<64x128xf32>
    %141 = tpu.matmul %138, %140, %cst_61 {dimension_numbers = #tpu.dot_dimension_numbers<[1], [0], [0], [1], [0, 0, 1, 1], [], []>} : vector<64x128xbf16>, vector<128x128xbf16>, vector<64x128xf32> -> vector<64x128xf32>
    %c0_62 = arith.constant 0 : index
    %c0_63 = arith.constant 0 : index
    %c0_64 = arith.constant 0 : index
    %142 = vector.load %arg11[%c0_62, %c0_63, %c0_64] : memref<1x1x128xf32, #tpu.memory_space<vmem>>, vector<1x1x128xf32>
    %143 = vector.shape_cast %142 : vector<1x1x128xf32> to vector<1x128xf32>
    %144 = vector.broadcast %143 : vector<1x128xf32> to vector<64x128xf32>
    %145 = arith.addf %141, %144 : vector<64x128xf32>
    %146 = arith.addf %58, %145 : vector<64x128xf32>
    %c0_65 = arith.constant 0 : index
    %c0_66 = arith.constant 0 : index
    %147 = vector.load %arg13[%c0_65, %c0_66] : memref<64x128xf32, #tpu.memory_space<vmem>>, vector<64x128xf32>
    tpu.vector_store %arg13[%c0_65, %c0_66], %146 {strides = array<i32>} : memref<64x128xf32, #tpu.memory_space<vmem>>, vector<64x128xf32>,
    %c0_i32_67 = arith.constant 0 : i32
    %148 = arith.cmpi eq, %arg1, %c0_i32_67 : i32
    %149 = arith.extui %148 : i1 to i32
    %c0_i32_68 = arith.constant 0 : i32
    %150 = arith.cmpi ne, %149, %c0_i32_68 : i32
    scf.if %150 {
      %c0_69 = arith.constant 0 : index
      %c0_70 = arith.constant 0 : index
      %151 = vector.load %arg13[%c0_69, %c0_70] : memref<64x128xf32, #tpu.memory_space<vmem>>, vector<64x128xf32>
      %c0_71 = arith.constant 0 : index
      %c0_72 = arith.constant 0 : index
      %c0_73 = arith.constant 0 : index
      %152 = vector.load %arg12[%c0_71, %c0_72, %c0_73] : memref<1x64x128xf32, #tpu.memory_space<vmem>>, vector<1x64x128xf32>
      %153 = vector.shape_cast %152 : vector<1x64x128xf32> to vector<64x128xf32>
      %154 = vector.shape_cast %151 : vector<64x128xf32> to vector<1x64x128xf32>
      tpu.vector_store %arg12[%c0_71, %c0_72, %c0_73], %154 {strides = array<i32>} : memref<1x64x128xf32, #tpu.memory_space<vmem>>, vector<1x64x128xf32>,
    } else {
    }
    return
  }
  func.func @transform_0(%arg0: i32, %arg1: i32) -> (i32, i32, i32) {
    %c0_i32 = arith.constant 0 : i32
    %c0_i32_0 = arith.constant 0 : i32
    %c0_i32_1 = arith.constant 0 : i32
    return %arg0, %c0_i32, %c0_i32_0 : i32, i32, i32
  }
  func.func @transform_1(%arg0: i32, %arg1: i32) -> (i32, i32, i32) {
    %c0_i32 = arith.constant 0 : i32
    %c0_i32_0 = arith.constant 0 : i32
    %c0_i32_1 = arith.constant 0 : i32
    return %arg1, %c0_i32, %c0_i32_0 : i32, i32, i32
  }
  func.func @transform_2(%arg0: i32, %arg1: i32) -> (i32, i32, i32) {
    %c0_i32 = arith.constant 0 : i32
    %c0_i32_0 = arith.constant 0 : i32
    %c0_i32_1 = arith.constant 0 : i32
    return %arg1, %c0_i32, %c0_i32_0 : i32, i32, i32
  }
  func.func @transform_3(%arg0: i32, %arg1: i32) -> (i32, i32, i32) {
    %c0_i32 = arith.constant 0 : i32
    %c0_i32_0 = arith.constant 0 : i32
    %c0_i32_1 = arith.constant 0 : i32
    return %arg1, %c0_i32, %c0_i32_0 : i32, i32, i32
  }
  func.func @transform_4(%arg0: i32, %arg1: i32) -> (i32, i32, i32) {
    %c0_i32 = arith.constant 0 : i32
    %c0_i32_0 = arith.constant 0 : i32
    %c0_i32_1 = arith.constant 0 : i32
    return %arg1, %c0_i32, %c0_i32_0 : i32, i32, i32
  }
  func.func @transform_5(%arg0: i32, %arg1: i32) -> (i32, i32, i32) {
    %c0_i32 = arith.constant 0 : i32
    %c0_i32_0 = arith.constant 0 : i32
    %c0_i32_1 = arith.constant 0 : i32
    return %arg1, %c0_i32, %c0_i32_0 : i32, i32, i32
  }
  func.func @transform_6(%arg0: i32, %arg1: i32) -> (i32, i32, i32) {
    %c0_i32 = arith.constant 0 : i32
    %c0_i32_0 = arith.constant 0 : i32
    %c0_i32_1 = arith.constant 0 : i32
    return %arg1, %c0_i32, %c0_i32_0 : i32, i32, i32
  }
  func.func @transform_7(%arg0: i32, %arg1: i32) -> (i32, i32, i32) {
    %c0_i32 = arith.constant 0 : i32
    %c0_i32_0 = arith.constant 0 : i32
    %c0_i32_1 = arith.constant 0 : i32
    return %arg1, %c0_i32, %c0_i32_0 : i32, i32, i32
  }
  func.func @transform_8(%arg0: i32, %arg1: i32) -> (i32, i32, i32) {
    %c0_i32 = arith.constant 0 : i32
    %c0_i32_0 = arith.constant 0 : i32
    %c0_i32_1 = arith.constant 0 : i32
    return %arg1, %c0_i32, %c0_i32_0 : i32, i32, i32
  }
  func.func @transform_9(%arg0: i32, %arg1: i32) -> (i32, i32, i32) {
    %c0_i32 = arith.constant 0 : i32
    %c0_i32_0 = arith.constant 0 : i32
    %c0_i32_1 = arith.constant 0 : i32
    return %arg1, %c0_i32, %c0_i32_0 : i32, i32, i32
  }
  func.func @transform_10(%arg0: i32, %arg1: i32) -> (i32, i32, i32) {
    %c0_i32 = arith.constant 0 : i32
    %c0_i32_0 = arith.constant 0 : i32
    %c0_i32_1 = arith.constant 0 : i32
    return %arg0, %c0_i32, %c0_i32_0 : i32, i32, i32
  }
}

module attributes {stable_mosaic.version = 11 : i64} {
  func.func @_layer_kernel(%arg0: i32, %arg1: i32, %arg2: memref<1x16x256xf32, #tpu.memory_space<vmem>>, %arg3: memref<1x1x256xf32, #tpu.memory_space<vmem>>, %arg4: memref<1x1x256xf32, #tpu.memory_space<vmem>>, %arg5: memref<1x256x768xbf16, #tpu.memory_space<vmem>>, %arg6: memref<1x1x256xf32, #tpu.memory_space<vmem>>, %arg7: memref<1x1x256xf32, #tpu.memory_space<vmem>>, %arg8: memref<1x256x256xbf16, #tpu.memory_space<vmem>>, %arg9: memref<1x1x256xf32, #tpu.memory_space<vmem>>, %arg10: memref<1x256x256xbf16, #tpu.memory_space<vmem>>, %arg11: memref<1x1x256xf32, #tpu.memory_space<vmem>>, %arg12: memref<1x16x256xf32, #tpu.memory_space<vmem>>, %arg13: memref<16x256xf32, #tpu.memory_space<vmem>>) attributes {dimension_semantics = [#tpu.dimension_semantics<parallel>, #tpu.dimension_semantics<arbitrary>], iteration_bounds = array<i64: 2, 1>, scalar_prefetch = 0 : i64, scratch_operands = 1 : i64, tpu.core_type = #tpu.core_type<tc>, window_params = [{transform_indices = @transform_0, window_bounds = array<i64: 1, 16, 256>}, {transform_indices = @transform_1, window_bounds = array<i64: 1, 1, 256>}, {transform_indices = @transform_2, window_bounds = array<i64: 1, 1, 256>}, {transform_indices = @transform_3, window_bounds = array<i64: 1, 256, 768>}, {transform_indices = @transform_4, window_bounds = array<i64: 1, 1, 256>}, {transform_indices = @transform_5, window_bounds = array<i64: 1, 1, 256>}, {transform_indices = @transform_6, window_bounds = array<i64: 1, 256, 256>}, {transform_indices = @transform_7, window_bounds = array<i64: 1, 1, 256>}, {transform_indices = @transform_8, window_bounds = array<i64: 1, 256, 256>}, {transform_indices = @transform_9, window_bounds = array<i64: 1, 1, 256>}, {transform_indices = @transform_10, window_bounds = array<i64: 1, 16, 256>}]} {
    %c0_i32 = arith.constant 0 : i32
    %0 = arith.cmpi eq, %arg1, %c0_i32 : i32
    %1 = arith.extui %0 : i1 to i32
    %c0_i32_0 = arith.constant 0 : i32
    %2 = arith.cmpi ne, %1, %c0_i32_0 : i32
    scf.if %2 {
      %c0_69 = arith.constant 0 : index
      %c0_70 = arith.constant 0 : index
      %c0_71 = arith.constant 0 : index
      %151 = vector.load %arg2[%c0_69, %c0_70, %c0_71] : memref<1x16x256xf32, #tpu.memory_space<vmem>>, vector<1x16x256xf32>
      %152 = vector.shape_cast %151 : vector<1x16x256xf32> to vector<16x256xf32>
      %c0_72 = arith.constant 0 : index
      %c0_73 = arith.constant 0 : index
      %153 = vector.load %arg13[%c0_72, %c0_73] : memref<16x256xf32, #tpu.memory_space<vmem>>, vector<16x256xf32>
      tpu.vector_store %arg13[%c0_72, %c0_73], %152 {strides = array<i32>} : memref<16x256xf32, #tpu.memory_space<vmem>>, vector<16x256xf32>,
    } else {
    }
    %c0 = arith.constant 0 : index
    %c0_1 = arith.constant 0 : index
    %3 = vector.load %arg13[%c0, %c0_1] : memref<16x256xf32, #tpu.memory_space<vmem>>, vector<16x256xf32>
    %c0_2 = arith.constant 0 : index
    %c0_3 = arith.constant 0 : index
    %c0_4 = arith.constant 0 : index
    %4 = vector.load %arg3[%c0_2, %c0_3, %c0_4] : memref<1x1x256xf32, #tpu.memory_space<vmem>>, vector<1x1x256xf32>
    %5 = vector.shape_cast %4 : vector<1x1x256xf32> to vector<1x256xf32>
    %c0_5 = arith.constant 0 : index
    %c0_6 = arith.constant 0 : index
    %c0_7 = arith.constant 0 : index
    %6 = vector.load %arg4[%c0_5, %c0_6, %c0_7] : memref<1x1x256xf32, #tpu.memory_space<vmem>>, vector<1x1x256xf32>
    %7 = vector.shape_cast %6 : vector<1x1x256xf32> to vector<1x256xf32>
    %8 = tpu.iota {dimensions = array<i32: 1>} : vector<16x256xi32>
    %c243_i32 = arith.constant 243 : i32
    %9 = vector.broadcast %c243_i32 : i32 to vector<16x256xi32>
    %10 = arith.cmpi slt, %8, %9 : vector<16x256xi32>
    %cst = arith.constant 0.000000e+00 : f32
    %11 = vector.broadcast %cst : f32 to vector<16x256xf32>
    %12 = arith.select %10, %3, %11 : vector<16x256xi1>, vector<16x256xf32>
    %cst_8 = arith.constant dense<0.000000e+00> : vector<16xf32>
    %13 = vector.multi_reduction <add>, %12, %cst_8 [1] : vector<16x256xf32> to vector<16xf32>
    %14 = vector.shape_cast %13 : vector<16xf32> to vector<16x1xf32>
    %cst_9 = arith.constant 0.00411522621 : f32
    %15 = vector.broadcast %cst_9 : f32 to vector<16x1xf32>
    %16 = arith.mulf %14, %15 : vector<16x1xf32>
    %17 = vector.broadcast %16 : vector<16x1xf32> to vector<16x256xf32>
    %18 = arith.subf %3, %17 : vector<16x256xf32>
    %cst_10 = arith.constant 0.000000e+00 : f32
    %19 = vector.broadcast %cst_10 : f32 to vector<16x256xf32>
    %20 = arith.select %10, %18, %19 : vector<16x256xi1>, vector<16x256xf32>
    %21 = arith.mulf %20, %20 : vector<16x256xf32>
    %cst_11 = arith.constant dense<0.000000e+00> : vector<16xf32>
    %22 = vector.multi_reduction <add>, %21, %cst_11 [1] : vector<16x256xf32> to vector<16xf32>
    %23 = vector.shape_cast %22 : vector<16xf32> to vector<16x1xf32>
    %cst_12 = arith.constant 0.00411522621 : f32
    %24 = vector.broadcast %cst_12 : f32 to vector<16x1xf32>
    %25 = arith.mulf %23, %24 : vector<16x1xf32>
    %cst_13 = arith.constant 9.99999974E-6 : f32
    %26 = vector.broadcast %cst_13 : f32 to vector<16x1xf32>
    %27 = arith.addf %25, %26 : vector<16x1xf32>
    %28 = math.rsqrt %27 : vector<16x1xf32>
    %29 = vector.broadcast %28 : vector<16x1xf32> to vector<16x256xf32>
    %30 = arith.mulf %20, %29 : vector<16x256xf32>
    %31 = vector.broadcast %5 : vector<1x256xf32> to vector<16x256xf32>
    %32 = arith.mulf %30, %31 : vector<16x256xf32>
    %33 = vector.broadcast %7 : vector<1x256xf32> to vector<16x256xf32>
    %34 = arith.addf %32, %33 : vector<16x256xf32>
    %35 = arith.truncf %34 : vector<16x256xf32> to vector<16x256xbf16>
    %c0_14 = arith.constant 0 : index
    %c0_15 = arith.constant 0 : index
    %c0_16 = arith.constant 0 : index
    %36 = vector.load %arg5[%c0_14, %c0_15, %c0_16] : memref<1x256x768xbf16, #tpu.memory_space<vmem>>, vector<1x256x768xbf16>
    %37 = vector.shape_cast %36 : vector<1x256x768xbf16> to vector<256x768xbf16>
    %cst_17 = arith.constant dense<0.000000e+00> : vector<16x768xf32>
    %38 = tpu.matmul %35, %37, %cst_17 {dimension_numbers = #tpu.dot_dimension_numbers<[1], [0], [0], [1], [0, 0, 1, 1], [], []>} : vector<16x256xbf16>, vector<256x768xbf16>, vector<16x768xf32> -> vector<16x768xf32>
    %39 = vector.extract_strided_slice %38 {offsets = [0, 0], sizes = [16, 256], strides = [1, 1]} : vector<16x768xf32> to vector<16x256xf32>
    %40 = vector.extract_strided_slice %38 {offsets = [0, 256], sizes = [16, 256], strides = [1, 1]} : vector<16x768xf32> to vector<16x256xf32>
    %41 = vector.extract_strided_slice %38 {offsets = [0, 512], sizes = [16, 256], strides = [1, 1]} : vector<16x768xf32> to vector<16x256xf32>
    %42 = arith.truncf %39 : vector<16x256xf32> to vector<16x256xbf16>
    %43 = arith.truncf %40 : vector<16x256xf32> to vector<16x256xbf16>
    %cst_18 = arith.constant dense<0.000000e+00> : vector<16x16xf32>
    %44 = tpu.matmul %42, %43, %cst_18 {dimension_numbers = #tpu.dot_dimension_numbers<[1], [1], [0], [0], [0, 0, 1, 0], [], []>} : vector<16x256xbf16>, vector<16x256xbf16>, vector<16x16xf32> -> vector<16x16xf32>
    %cst_19 = arith.constant dense<0xFF800000> : vector<16xf32>
    %45 = vector.multi_reduction <maximumf>, %44, %cst_19 [1] : vector<16x16xf32> to vector<16xf32>
    %46 = vector.shape_cast %45 : vector<16xf32> to vector<16x1xf32>
    %47 = vector.broadcast %46 : vector<16x1xf32> to vector<16x16xf32>
    %48 = arith.subf %44, %47 : vector<16x16xf32>
    %49 = math.exp %48 : vector<16x16xf32>
    %cst_20 = arith.constant dense<0.000000e+00> : vector<16xf32>
    %50 = vector.multi_reduction <add>, %49, %cst_20 [1] : vector<16x16xf32> to vector<16xf32>
    %51 = vector.shape_cast %50 : vector<16xf32> to vector<16x1xf32>
    %52 = tpu.reciprocal %51 {approx = true} : vector<16x1xf32> -> vector<16x1xf32>
    %53 = vector.broadcast %52 : vector<16x1xf32> to vector<16x16xf32>
    %54 = arith.mulf %49, %53 : vector<16x16xf32>
    %55 = arith.truncf %54 : vector<16x16xf32> to vector<16x16xbf16>
    %56 = arith.truncf %41 : vector<16x256xf32> to vector<16x256xbf16>
    %cst_21 = arith.constant dense<0.000000e+00> : vector<16x256xf32>
    %57 = tpu.matmul %55, %56, %cst_21 {dimension_numbers = #tpu.dot_dimension_numbers<[1], [0], [0], [1], [0, 0, 1, 1], [], []>} : vector<16x16xbf16>, vector<16x256xbf16>, vector<16x256xf32> -> vector<16x256xf32>
    %58 = arith.addf %3, %57 : vector<16x256xf32>
    %c0_22 = arith.constant 0 : index
    %c0_23 = arith.constant 0 : index
    %c0_24 = arith.constant 0 : index
    %59 = vector.load %arg6[%c0_22, %c0_23, %c0_24] : memref<1x1x256xf32, #tpu.memory_space<vmem>>, vector<1x1x256xf32>
    %60 = vector.shape_cast %59 : vector<1x1x256xf32> to vector<1x256xf32>
    %c0_25 = arith.constant 0 : index
    %c0_26 = arith.constant 0 : index
    %c0_27 = arith.constant 0 : index
    %61 = vector.load %arg7[%c0_25, %c0_26, %c0_27] : memref<1x1x256xf32, #tpu.memory_space<vmem>>, vector<1x1x256xf32>
    %62 = vector.shape_cast %61 : vector<1x1x256xf32> to vector<1x256xf32>
    %63 = tpu.iota {dimensions = array<i32: 1>} : vector<16x256xi32>
    %c243_i32_28 = arith.constant 243 : i32
    %64 = vector.broadcast %c243_i32_28 : i32 to vector<16x256xi32>
    %65 = arith.cmpi slt, %63, %64 : vector<16x256xi32>
    %cst_29 = arith.constant 0.000000e+00 : f32
    %66 = vector.broadcast %cst_29 : f32 to vector<16x256xf32>
    %67 = arith.select %65, %58, %66 : vector<16x256xi1>, vector<16x256xf32>
    %cst_30 = arith.constant dense<0.000000e+00> : vector<16xf32>
    %68 = vector.multi_reduction <add>, %67, %cst_30 [1] : vector<16x256xf32> to vector<16xf32>
    %69 = vector.shape_cast %68 : vector<16xf32> to vector<16x1xf32>
    %cst_31 = arith.constant 0.00411522621 : f32
    %70 = vector.broadcast %cst_31 : f32 to vector<16x1xf32>
    %71 = arith.mulf %69, %70 : vector<16x1xf32>
    %72 = vector.broadcast %71 : vector<16x1xf32> to vector<16x256xf32>
    %73 = arith.subf %58, %72 : vector<16x256xf32>
    %cst_32 = arith.constant 0.000000e+00 : f32
    %74 = vector.broadcast %cst_32 : f32 to vector<16x256xf32>
    %75 = arith.select %65, %73, %74 : vector<16x256xi1>, vector<16x256xf32>
    %76 = arith.mulf %75, %75 : vector<16x256xf32>
    %cst_33 = arith.constant dense<0.000000e+00> : vector<16xf32>
    %77 = vector.multi_reduction <add>, %76, %cst_33 [1] : vector<16x256xf32> to vector<16xf32>
    %78 = vector.shape_cast %77 : vector<16xf32> to vector<16x1xf32>
    %cst_34 = arith.constant 0.00411522621 : f32
    %79 = vector.broadcast %cst_34 : f32 to vector<16x1xf32>
    %80 = arith.mulf %78, %79 : vector<16x1xf32>
    %cst_35 = arith.constant 9.99999974E-6 : f32
    %81 = vector.broadcast %cst_35 : f32 to vector<16x1xf32>
    %82 = arith.addf %80, %81 : vector<16x1xf32>
    %83 = math.rsqrt %82 : vector<16x1xf32>
    %84 = vector.broadcast %83 : vector<16x1xf32> to vector<16x256xf32>
    %85 = arith.mulf %75, %84 : vector<16x256xf32>
    %86 = vector.broadcast %60 : vector<1x256xf32> to vector<16x256xf32>
    %87 = arith.mulf %85, %86 : vector<16x256xf32>
    %88 = vector.broadcast %62 : vector<1x256xf32> to vector<16x256xf32>
    %89 = arith.addf %87, %88 : vector<16x256xf32>
    %90 = arith.truncf %89 : vector<16x256xf32> to vector<16x256xbf16>
    %c0_36 = arith.constant 0 : index
    %c0_37 = arith.constant 0 : index
    %c0_38 = arith.constant 0 : index
    %91 = vector.load %arg8[%c0_36, %c0_37, %c0_38] : memref<1x256x256xbf16, #tpu.memory_space<vmem>>, vector<1x256x256xbf16>
    %92 = vector.shape_cast %91 : vector<1x256x256xbf16> to vector<256x256xbf16>
    %cst_39 = arith.constant dense<0.000000e+00> : vector<16x256xf32>
    %93 = tpu.matmul %90, %92, %cst_39 {dimension_numbers = #tpu.dot_dimension_numbers<[1], [0], [0], [1], [0, 0, 1, 1], [], []>} : vector<16x256xbf16>, vector<256x256xbf16>, vector<16x256xf32> -> vector<16x256xf32>
    %c0_40 = arith.constant 0 : index
    %c0_41 = arith.constant 0 : index
    %c0_42 = arith.constant 0 : index
    %94 = vector.load %arg9[%c0_40, %c0_41, %c0_42] : memref<1x1x256xf32, #tpu.memory_space<vmem>>, vector<1x1x256xf32>
    %95 = vector.shape_cast %94 : vector<1x1x256xf32> to vector<1x256xf32>
    %96 = vector.broadcast %95 : vector<1x256xf32> to vector<16x256xf32>
    %97 = arith.addf %93, %96 : vector<16x256xf32>
    %cst_43 = arith.constant 5.000000e-01 : f32
    %98 = vector.broadcast %cst_43 : f32 to vector<16x256xf32>
    %99 = arith.mulf %98, %97 : vector<16x256xf32>
    %cst_44 = arith.constant 0.707106769 : f32
    %100 = vector.broadcast %cst_44 : f32 to vector<16x256xf32>
    %101 = arith.mulf %97, %100 : vector<16x256xf32>
    %102 = math.absf %101 : vector<16x256xf32>
    %cst_45 = arith.constant 0.327591091 : f32
    %103 = vector.broadcast %cst_45 : f32 to vector<16x256xf32>
    %104 = arith.mulf %103, %102 : vector<16x256xf32>
    %cst_46 = arith.constant 1.000000e+00 : f32
    %105 = vector.broadcast %cst_46 : f32 to vector<16x256xf32>
    %106 = arith.addf %105, %104 : vector<16x256xf32>
    %cst_47 = arith.constant 1.000000e+00 : f32
    %107 = vector.broadcast %cst_47 : f32 to vector<16x256xf32>
    %108 = arith.divf %107, %106 : vector<16x256xf32>
    %cst_48 = arith.constant 1.06140542 : f32
    %109 = vector.broadcast %cst_48 : f32 to vector<16x256xf32>
    %110 = arith.mulf %109, %108 : vector<16x256xf32>
    %cst_49 = arith.constant 1.45315206 : f32
    %111 = vector.broadcast %cst_49 : f32 to vector<16x256xf32>
    %112 = arith.subf %110, %111 : vector<16x256xf32>
    %113 = arith.mulf %112, %108 : vector<16x256xf32>
    %cst_50 = arith.constant 1.42141378 : f32
    %114 = vector.broadcast %cst_50 : f32 to vector<16x256xf32>
    %115 = arith.addf %113, %114 : vector<16x256xf32>
    %116 = arith.mulf %115, %108 : vector<16x256xf32>
    %cst_51 = arith.constant 0.284496725 : f32
    %117 = vector.broadcast %cst_51 : f32 to vector<16x256xf32>
    %118 = arith.subf %116, %117 : vector<16x256xf32>
    %119 = arith.mulf %118, %108 : vector<16x256xf32>
    %cst_52 = arith.constant 0.254829586 : f32
    %120 = vector.broadcast %cst_52 : f32 to vector<16x256xf32>
    %121 = arith.addf %119, %120 : vector<16x256xf32>
    %122 = arith.mulf %121, %108 : vector<16x256xf32>
    %cst_53 = arith.constant 0.000000e+00 : f32
    %123 = vector.broadcast %cst_53 : f32 to vector<16x256xf32>
    %124 = arith.subf %123, %102 : vector<16x256xf32>
    %125 = arith.mulf %124, %102 : vector<16x256xf32>
    %126 = math.exp %125 : vector<16x256xf32>
    %127 = arith.mulf %122, %126 : vector<16x256xf32>
    %cst_54 = arith.constant 1.000000e+00 : f32
    %128 = vector.broadcast %cst_54 : f32 to vector<16x256xf32>
    %129 = arith.subf %128, %127 : vector<16x256xf32>
    %cst_55 = arith.constant 0.000000e+00 : f32
    %130 = vector.broadcast %cst_55 : f32 to vector<16x256xf32>
    %131 = arith.cmpf oge, %101, %130 : vector<16x256xf32>
    %cst_56 = arith.constant 0.000000e+00 : f32
    %132 = vector.broadcast %cst_56 : f32 to vector<16x256xf32>
    %133 = arith.subf %132, %129 : vector<16x256xf32>
    %134 = arith.select %131, %129, %133 : vector<16x256xi1>, vector<16x256xf32>
    %cst_57 = arith.constant 1.000000e+00 : f32
    %135 = vector.broadcast %cst_57 : f32 to vector<16x256xf32>
    %136 = arith.addf %135, %134 : vector<16x256xf32>
    %137 = arith.mulf %99, %136 : vector<16x256xf32>
    %138 = arith.truncf %137 : vector<16x256xf32> to vector<16x256xbf16>
    %c0_58 = arith.constant 0 : index
    %c0_59 = arith.constant 0 : index
    %c0_60 = arith.constant 0 : index
    %139 = vector.load %arg10[%c0_58, %c0_59, %c0_60] : memref<1x256x256xbf16, #tpu.memory_space<vmem>>, vector<1x256x256xbf16>
    %140 = vector.shape_cast %139 : vector<1x256x256xbf16> to vector<256x256xbf16>
    %cst_61 = arith.constant dense<0.000000e+00> : vector<16x256xf32>
    %141 = tpu.matmul %138, %140, %cst_61 {dimension_numbers = #tpu.dot_dimension_numbers<[1], [0], [0], [1], [0, 0, 1, 1], [], []>} : vector<16x256xbf16>, vector<256x256xbf16>, vector<16x256xf32> -> vector<16x256xf32>
    %c0_62 = arith.constant 0 : index
    %c0_63 = arith.constant 0 : index
    %c0_64 = arith.constant 0 : index
    %142 = vector.load %arg11[%c0_62, %c0_63, %c0_64] : memref<1x1x256xf32, #tpu.memory_space<vmem>>, vector<1x1x256xf32>
    %143 = vector.shape_cast %142 : vector<1x1x256xf32> to vector<1x256xf32>
    %144 = vector.broadcast %143 : vector<1x256xf32> to vector<16x256xf32>
    %145 = arith.addf %141, %144 : vector<16x256xf32>
    %146 = arith.addf %58, %145 : vector<16x256xf32>
    %c0_65 = arith.constant 0 : index
    %c0_66 = arith.constant 0 : index
    %147 = vector.load %arg13[%c0_65, %c0_66] : memref<16x256xf32, #tpu.memory_space<vmem>>, vector<16x256xf32>
    tpu.vector_store %arg13[%c0_65, %c0_66], %146 {strides = array<i32>} : memref<16x256xf32, #tpu.memory_space<vmem>>, vector<16x256xf32>,
    %c0_i32_67 = arith.constant 0 : i32
    %148 = arith.cmpi eq, %arg1, %c0_i32_67 : i32
    %149 = arith.extui %148 : i1 to i32
    %c0_i32_68 = arith.constant 0 : i32
    %150 = arith.cmpi ne, %149, %c0_i32_68 : i32
    scf.if %150 {
      %c0_69 = arith.constant 0 : index
      %c0_70 = arith.constant 0 : index
      %151 = vector.load %arg13[%c0_69, %c0_70] : memref<16x256xf32, #tpu.memory_space<vmem>>, vector<16x256xf32>
      %c0_71 = arith.constant 0 : index
      %c0_72 = arith.constant 0 : index
      %c0_73 = arith.constant 0 : index
      %152 = vector.load %arg12[%c0_71, %c0_72, %c0_73] : memref<1x16x256xf32, #tpu.memory_space<vmem>>, vector<1x16x256xf32>
      %153 = vector.shape_cast %152 : vector<1x16x256xf32> to vector<16x256xf32>
      %154 = vector.shape_cast %151 : vector<16x256xf32> to vector<1x16x256xf32>
      tpu.vector_store %arg12[%c0_71, %c0_72, %c0_73], %154 {strides = array<i32>} : memref<1x16x256xf32, #tpu.memory_space<vmem>>, vector<1x16x256xf32>,
    } else {
    }
    return
  }
  func.func @transform_0(%arg0: i32, %arg1: i32) -> (i32, i32, i32) {
    %c0_i32 = arith.constant 0 : i32
    %c0_i32_0 = arith.constant 0 : i32
    %c0_i32_1 = arith.constant 0 : i32
    return %arg0, %c0_i32, %c0_i32_0 : i32, i32, i32
  }
  func.func @transform_1(%arg0: i32, %arg1: i32) -> (i32, i32, i32) {
    %c0_i32 = arith.constant 0 : i32
    %c0_i32_0 = arith.constant 0 : i32
    %c0_i32_1 = arith.constant 0 : i32
    return %arg1, %c0_i32, %c0_i32_0 : i32, i32, i32
  }
  func.func @transform_2(%arg0: i32, %arg1: i32) -> (i32, i32, i32) {
    %c0_i32 = arith.constant 0 : i32
    %c0_i32_0 = arith.constant 0 : i32
    %c0_i32_1 = arith.constant 0 : i32
    return %arg1, %c0_i32, %c0_i32_0 : i32, i32, i32
  }
  func.func @transform_3(%arg0: i32, %arg1: i32) -> (i32, i32, i32) {
    %c0_i32 = arith.constant 0 : i32
    %c0_i32_0 = arith.constant 0 : i32
    %c0_i32_1 = arith.constant 0 : i32
    return %arg1, %c0_i32, %c0_i32_0 : i32, i32, i32
  }
  func.func @transform_4(%arg0: i32, %arg1: i32) -> (i32, i32, i32) {
    %c0_i32 = arith.constant 0 : i32
    %c0_i32_0 = arith.constant 0 : i32
    %c0_i32_1 = arith.constant 0 : i32
    return %arg1, %c0_i32, %c0_i32_0 : i32, i32, i32
  }
  func.func @transform_5(%arg0: i32, %arg1: i32) -> (i32, i32, i32) {
    %c0_i32 = arith.constant 0 : i32
    %c0_i32_0 = arith.constant 0 : i32
    %c0_i32_1 = arith.constant 0 : i32
    return %arg1, %c0_i32, %c0_i32_0 : i32, i32, i32
  }
  func.func @transform_6(%arg0: i32, %arg1: i32) -> (i32, i32, i32) {
    %c0_i32 = arith.constant 0 : i32
    %c0_i32_0 = arith.constant 0 : i32
    %c0_i32_1 = arith.constant 0 : i32
    return %arg1, %c0_i32, %c0_i32_0 : i32, i32, i32
  }
  func.func @transform_7(%arg0: i32, %arg1: i32) -> (i32, i32, i32) {
    %c0_i32 = arith.constant 0 : i32
    %c0_i32_0 = arith.constant 0 : i32
    %c0_i32_1 = arith.constant 0 : i32
    return %arg1, %c0_i32, %c0_i32_0 : i32, i32, i32
  }
  func.func @transform_8(%arg0: i32, %arg1: i32) -> (i32, i32, i32) {
    %c0_i32 = arith.constant 0 : i32
    %c0_i32_0 = arith.constant 0 : i32
    %c0_i32_1 = arith.constant 0 : i32
    return %arg1, %c0_i32, %c0_i32_0 : i32, i32, i32
  }
  func.func @transform_9(%arg0: i32, %arg1: i32) -> (i32, i32, i32) {
    %c0_i32 = arith.constant 0 : i32
    %c0_i32_0 = arith.constant 0 : i32
    %c0_i32_1 = arith.constant 0 : i32
    return %arg1, %c0_i32, %c0_i32_0 : i32, i32, i32
  }
  func.func @transform_10(%arg0: i32, %arg1: i32) -> (i32, i32, i32) {
    %c0_i32 = arith.constant 0 : i32
    %c0_i32_0 = arith.constant 0 : i32
    %c0_i32_1 = arith.constant 0 : i32
    return %arg0, %c0_i32, %c0_i32_0 : i32, i32, i32
  }
}

module attributes {stable_mosaic.version = 11 : i64} {
  func.func @_linear_kernel(%arg0: i32, %arg1: i32, %arg2: memref<32x256xf32, #tpu.memory_space<vmem>>, %arg3: memref<256x128xbf16, #tpu.memory_space<vmem>>, %arg4: memref<1x128xf32, #tpu.memory_space<vmem>>, %arg5: memref<32x128xf32, #tpu.memory_space<vmem>>, %arg6: memref<32x128xf32, #tpu.memory_space<vmem>>) attributes {dimension_semantics = [#tpu.dimension_semantics<parallel>, #tpu.dimension_semantics<arbitrary>], iteration_bounds = array<i64: 1, 1>, scalar_prefetch = 0 : i64, scratch_operands = 1 : i64, tpu.core_type = #tpu.core_type<tc>, window_params = [{transform_indices = @transform_0, window_bounds = array<i64: 32, 256>}, {transform_indices = @transform_1, window_bounds = array<i64: 256, 128>}, {pipeline_mode = #tpu.pipeline_mode<synchronous>, transform_indices = @transform_2, window_bounds = array<i64: 1, 128>}, {transform_indices = @transform_3, window_bounds = array<i64: 32, 128>}]} {
    %c0_i32 = arith.constant 0 : i32
    %0 = arith.cmpi eq, %arg1, %c0_i32 : i32
    %1 = arith.extui %0 : i1 to i32
    %c0_i32_0 = arith.constant 0 : i32
    %2 = arith.cmpi ne, %1, %c0_i32_0 : i32
    scf.if %2 {
      %cst_10 = arith.constant 0.000000e+00 : f32
      %13 = vector.broadcast %cst_10 : f32 to vector<32x128xf32>
      %c0_11 = arith.constant 0 : index
      %c0_12 = arith.constant 0 : index
      %14 = vector.load %arg6[%c0_11, %c0_12] : memref<32x128xf32, #tpu.memory_space<vmem>>, vector<32x128xf32>
      tpu.vector_store %arg6[%c0_11, %c0_12], %13 {strides = array<i32>} : memref<32x128xf32, #tpu.memory_space<vmem>>, vector<32x128xf32>,
    } else {
    }
    %c0 = arith.constant 0 : index
    %c0_1 = arith.constant 0 : index
    %3 = vector.load %arg6[%c0, %c0_1] : memref<32x128xf32, #tpu.memory_space<vmem>>, vector<32x128xf32>
    %c0_2 = arith.constant 0 : index
    %c0_3 = arith.constant 0 : index
    %4 = vector.load %arg2[%c0_2, %c0_3] : memref<32x256xf32, #tpu.memory_space<vmem>>, vector<32x256xf32>
    %5 = arith.truncf %4 : vector<32x256xf32> to vector<32x256xbf16>
    %c0_4 = arith.constant 0 : index
    %c0_5 = arith.constant 0 : index
    %6 = vector.load %arg3[%c0_4, %c0_5] : memref<256x128xbf16, #tpu.memory_space<vmem>>, vector<256x128xbf16>
    %cst = arith.constant dense<0.000000e+00> : vector<32x128xf32>
    %7 = tpu.matmul %5, %6, %cst {dimension_numbers = #tpu.dot_dimension_numbers<[1], [0], [0], [1], [0, 0, 1, 1], [], []>} : vector<32x256xbf16>, vector<256x128xbf16>, vector<32x128xf32> -> vector<32x128xf32>
    %8 = arith.addf %3, %7 : vector<32x128xf32>
    %c0_6 = arith.constant 0 : index
    %c0_7 = arith.constant 0 : index
    %9 = vector.load %arg6[%c0_6, %c0_7] : memref<32x128xf32, #tpu.memory_space<vmem>>, vector<32x128xf32>
    tpu.vector_store %arg6[%c0_6, %c0_7], %8 {strides = array<i32>} : memref<32x128xf32, #tpu.memory_space<vmem>>, vector<32x128xf32>,
    %c0_i32_8 = arith.constant 0 : i32
    %10 = arith.cmpi eq, %arg1, %c0_i32_8 : i32
    %11 = arith.extui %10 : i1 to i32
    %c0_i32_9 = arith.constant 0 : i32
    %12 = arith.cmpi ne, %11, %c0_i32_9 : i32
    scf.if %12 {
      %c0_10 = arith.constant 0 : index
      %c0_11 = arith.constant 0 : index
      %13 = vector.load %arg6[%c0_10, %c0_11] : memref<32x128xf32, #tpu.memory_space<vmem>>, vector<32x128xf32>
      %c0_12 = arith.constant 0 : index
      %c0_13 = arith.constant 0 : index
      %14 = vector.load %arg4[%c0_12, %c0_13] : memref<1x128xf32, #tpu.memory_space<vmem>>, vector<1x128xf32>
      %15 = vector.broadcast %14 : vector<1x128xf32> to vector<32x128xf32>
      %16 = arith.addf %13, %15 : vector<32x128xf32>
      %c0_14 = arith.constant 0 : index
      %c0_15 = arith.constant 0 : index
      %17 = vector.load %arg5[%c0_14, %c0_15] : memref<32x128xf32, #tpu.memory_space<vmem>>, vector<32x128xf32>
      tpu.vector_store %arg5[%c0_14, %c0_15], %16 {strides = array<i32>} : memref<32x128xf32, #tpu.memory_space<vmem>>, vector<32x128xf32>,
    } else {
    }
    return
  }
  func.func @transform_0(%arg0: i32, %arg1: i32) -> (i32, i32) {
    %c0_i32 = arith.constant 0 : i32
    return %arg0, %arg1 : i32, i32
  }
  func.func @transform_1(%arg0: i32, %arg1: i32) -> (i32, i32) {
    %c0_i32 = arith.constant 0 : i32
    %c0_i32_0 = arith.constant 0 : i32
    return %arg1, %c0_i32 : i32, i32
  }
  func.func @transform_2(%arg0: i32, %arg1: i32) -> (i32, i32) {
    %c0_i32 = arith.constant 0 : i32
    %c0_i32_0 = arith.constant 0 : i32
    %c0_i32_1 = arith.constant 0 : i32
    return %c0_i32, %c0_i32_0 : i32, i32
  }
  func.func @transform_3(%arg0: i32, %arg1: i32) -> (i32, i32) {
    %c0_i32 = arith.constant 0 : i32
    %c0_i32_0 = arith.constant 0 : i32
    return %arg0, %c0_i32 : i32, i32
  }
}

module attributes {stable_mosaic.version = 11 : i64} {
  func.func @_layer_kernel(%arg0: i32, %arg1: i32, %arg2: memref<1x17x128xf32, #tpu.memory_space<vmem>>, %arg3: memref<1x1x128xf32, #tpu.memory_space<vmem>>, %arg4: memref<1x1x128xf32, #tpu.memory_space<vmem>>, %arg5: memref<1x128x384xbf16, #tpu.memory_space<vmem>>, %arg6: memref<1x32x128xbf16, #tpu.memory_space<vmem>>, %arg7: memref<1x1x128xf32, #tpu.memory_space<vmem>>, %arg8: memref<1x1x128xf32, #tpu.memory_space<vmem>>, %arg9: memref<1x1x128xf32, #tpu.memory_space<vmem>>, %arg10: memref<1x128x128xbf16, #tpu.memory_space<vmem>>, %arg11: memref<1x1x128xf32, #tpu.memory_space<vmem>>, %arg12: memref<1x128x128xbf16, #tpu.memory_space<vmem>>, %arg13: memref<1x1x128xf32, #tpu.memory_space<vmem>>, %arg14: memref<1x17x128xf32, #tpu.memory_space<vmem>>, %arg15: memref<17x128xf32, #tpu.memory_space<vmem>>) attributes {dimension_semantics = [#tpu.dimension_semantics<parallel>, #tpu.dimension_semantics<arbitrary>], iteration_bounds = array<i64: 2, 2>, scalar_prefetch = 0 : i64, scratch_operands = 1 : i64, tpu.core_type = #tpu.core_type<tc>, window_params = [{transform_indices = @transform_0, window_bounds = array<i64: 1, 17, 128>}, {transform_indices = @transform_1, window_bounds = array<i64: 1, 1, 128>}, {transform_indices = @transform_2, window_bounds = array<i64: 1, 1, 128>}, {transform_indices = @transform_3, window_bounds = array<i64: 1, 128, 384>}, {transform_indices = @transform_4, window_bounds = array<i64: 1, 32, 128>}, {transform_indices = @transform_5, window_bounds = array<i64: 1, 1, 128>}, {transform_indices = @transform_6, window_bounds = array<i64: 1, 1, 128>}, {transform_indices = @transform_7, window_bounds = array<i64: 1, 1, 128>}, {transform_indices = @transform_8, window_bounds = array<i64: 1, 128, 128>}, {transform_indices = @transform_9, window_bounds = array<i64: 1, 1, 128>}, {transform_indices = @transform_10, window_bounds = array<i64: 1, 128, 128>}, {transform_indices = @transform_11, window_bounds = array<i64: 1, 1, 128>}, {transform_indices = @transform_12, window_bounds = array<i64: 1, 17, 128>}]} {
    %c0_i32 = arith.constant 0 : i32
    %0 = arith.cmpi eq, %arg1, %c0_i32 : i32
    %1 = arith.extui %0 : i1 to i32
    %c0_i32_0 = arith.constant 0 : i32
    %2 = arith.cmpi ne, %1, %c0_i32_0 : i32
    scf.if %2 {
      %c0_79 = arith.constant 0 : index
      %c0_80 = arith.constant 0 : index
      %c0_81 = arith.constant 0 : index
      %179 = vector.load %arg2[%c0_79, %c0_80, %c0_81] : memref<1x17x128xf32, #tpu.memory_space<vmem>>, vector<1x17x128xf32>
      %180 = vector.shape_cast %179 : vector<1x17x128xf32> to vector<17x128xf32>
      %c0_82 = arith.constant 0 : index
      %c0_83 = arith.constant 0 : index
      %181 = vector.load %arg15[%c0_82, %c0_83] : memref<17x128xf32, #tpu.memory_space<vmem>>, vector<17x128xf32>
      tpu.vector_store %arg15[%c0_82, %c0_83], %180 {strides = array<i32>} : memref<17x128xf32, #tpu.memory_space<vmem>>, vector<17x128xf32>,
    } else {
    }
    %c0 = arith.constant 0 : index
    %c0_1 = arith.constant 0 : index
    %3 = vector.load %arg15[%c0, %c0_1] : memref<17x128xf32, #tpu.memory_space<vmem>>, vector<17x128xf32>
    %c0_2 = arith.constant 0 : index
    %c0_3 = arith.constant 0 : index
    %c0_4 = arith.constant 0 : index
    %4 = vector.load %arg3[%c0_2, %c0_3, %c0_4] : memref<1x1x128xf32, #tpu.memory_space<vmem>>, vector<1x1x128xf32>
    %5 = vector.shape_cast %4 : vector<1x1x128xf32> to vector<1x128xf32>
    %c0_5 = arith.constant 0 : index
    %c0_6 = arith.constant 0 : index
    %c0_7 = arith.constant 0 : index
    %6 = vector.load %arg4[%c0_5, %c0_6, %c0_7] : memref<1x1x128xf32, #tpu.memory_space<vmem>>, vector<1x1x128xf32>
    %7 = vector.shape_cast %6 : vector<1x1x128xf32> to vector<1x128xf32>
    %8 = tpu.iota {dimensions = array<i32: 1>} : vector<17x128xi32>
    %c32_i32 = arith.constant 32 : i32
    %9 = vector.broadcast %c32_i32 : i32 to vector<17x128xi32>
    %10 = arith.cmpi slt, %8, %9 : vector<17x128xi32>
    %cst = arith.constant 0.000000e+00 : f32
    %11 = vector.broadcast %cst : f32 to vector<17x128xf32>
    %12 = arith.select %10, %3, %11 : vector<17x128xi1>, vector<17x128xf32>
    %cst_8 = arith.constant dense<0.000000e+00> : vector<17xf32>
    %13 = vector.multi_reduction <add>, %12, %cst_8 [1] : vector<17x128xf32> to vector<17xf32>
    %14 = vector.shape_cast %13 : vector<17xf32> to vector<17x1xf32>
    %cst_9 = arith.constant 3.125000e-02 : f32
    %15 = vector.broadcast %cst_9 : f32 to vector<17x1xf32>
    %16 = arith.mulf %14, %15 : vector<17x1xf32>
    %17 = vector.broadcast %16 : vector<17x1xf32> to vector<17x128xf32>
    %18 = arith.subf %3, %17 : vector<17x128xf32>
    %cst_10 = arith.constant 0.000000e+00 : f32
    %19 = vector.broadcast %cst_10 : f32 to vector<17x128xf32>
    %20 = arith.select %10, %18, %19 : vector<17x128xi1>, vector<17x128xf32>
    %21 = arith.mulf %20, %20 : vector<17x128xf32>
    %cst_11 = arith.constant dense<0.000000e+00> : vector<17xf32>
    %22 = vector.multi_reduction <add>, %21, %cst_11 [1] : vector<17x128xf32> to vector<17xf32>
    %23 = vector.shape_cast %22 : vector<17xf32> to vector<17x1xf32>
    %cst_12 = arith.constant 3.125000e-02 : f32
    %24 = vector.broadcast %cst_12 : f32 to vector<17x1xf32>
    %25 = arith.mulf %23, %24 : vector<17x1xf32>
    %cst_13 = arith.constant 9.99999974E-6 : f32
    %26 = vector.broadcast %cst_13 : f32 to vector<17x1xf32>
    %27 = arith.addf %25, %26 : vector<17x1xf32>
    %28 = math.rsqrt %27 : vector<17x1xf32>
    %29 = vector.broadcast %28 : vector<17x1xf32> to vector<17x128xf32>
    %30 = arith.mulf %20, %29 : vector<17x128xf32>
    %31 = vector.broadcast %5 : vector<1x128xf32> to vector<17x128xf32>
    %32 = arith.mulf %30, %31 : vector<17x128xf32>
    %33 = vector.broadcast %7 : vector<1x128xf32> to vector<17x128xf32>
    %34 = arith.addf %32, %33 : vector<17x128xf32>
    %35 = arith.truncf %34 : vector<17x128xf32> to vector<17x128xbf16>
    %c0_14 = arith.constant 0 : index
    %c0_15 = arith.constant 0 : index
    %c0_16 = arith.constant 0 : index
    %36 = vector.load %arg5[%c0_14, %c0_15, %c0_16] : memref<1x128x384xbf16, #tpu.memory_space<vmem>>, vector<1x128x384xbf16>
    %37 = vector.shape_cast %36 : vector<1x128x384xbf16> to vector<128x384xbf16>
    %cst_17 = arith.constant dense<0.000000e+00> : vector<17x384xf32>
    %38 = tpu.matmul %35, %37, %cst_17 {dimension_numbers = #tpu.dot_dimension_numbers<[1], [0], [0], [1], [0, 0, 1, 1], [], []>} : vector<17x128xbf16>, vector<128x384xbf16>, vector<17x384xf32> -> vector<17x384xf32>
    %39 = vector.extract_strided_slice %38 {offsets = [0, 0], sizes = [17, 16], strides = [1, 1]} : vector<17x384xf32> to vector<17x16xf32>
    %40 = vector.extract_strided_slice %38 {offsets = [0, 128], sizes = [17, 16], strides = [1, 1]} : vector<17x384xf32> to vector<17x16xf32>
    %41 = vector.extract_strided_slice %38 {offsets = [0, 256], sizes = [17, 16], strides = [1, 1]} : vector<17x384xf32> to vector<17x16xf32>
    %42 = arith.truncf %39 : vector<17x16xf32> to vector<17x16xbf16>
    %43 = arith.truncf %40 : vector<17x16xf32> to vector<17x16xbf16>
    %cst_18 = arith.constant dense<0.000000e+00> : vector<17x17xf32>
    %44 = tpu.matmul %42, %43, %cst_18 {dimension_numbers = #tpu.dot_dimension_numbers<[1], [1], [0], [0], [0, 0, 1, 0], [], []>} : vector<17x16xbf16>, vector<17x16xbf16>, vector<17x17xf32> -> vector<17x17xf32>
    %cst_19 = arith.constant dense<0xFF800000> : vector<17xf32>
    %45 = vector.multi_reduction <maximumf>, %44, %cst_19 [1] : vector<17x17xf32> to vector<17xf32>
    %46 = vector.shape_cast %45 : vector<17xf32> to vector<17x1xf32>
    %47 = vector.broadcast %46 : vector<17x1xf32> to vector<17x17xf32>
    %48 = arith.subf %44, %47 : vector<17x17xf32>
    %49 = math.exp %48 : vector<17x17xf32>
    %cst_20 = arith.constant dense<0.000000e+00> : vector<17xf32>
    %50 = vector.multi_reduction <add>, %49, %cst_20 [1] : vector<17x17xf32> to vector<17xf32>
    %51 = vector.shape_cast %50 : vector<17xf32> to vector<17x1xf32>
    %52 = tpu.reciprocal %51 {approx = true} : vector<17x1xf32> -> vector<17x1xf32>
    %53 = vector.broadcast %52 : vector<17x1xf32> to vector<17x17xf32>
    %54 = arith.mulf %49, %53 : vector<17x17xf32>
    %55 = arith.truncf %54 : vector<17x17xf32> to vector<17x17xbf16>
    %56 = arith.truncf %41 : vector<17x16xf32> to vector<17x16xbf16>
    %cst_21 = arith.constant dense<0.000000e+00> : vector<17x16xf32>
    %57 = tpu.matmul %55, %56, %cst_21 {dimension_numbers = #tpu.dot_dimension_numbers<[1], [0], [0], [1], [0, 0, 1, 1], [], []>} : vector<17x17xbf16>, vector<17x16xbf16>, vector<17x16xf32> -> vector<17x16xf32>
    %58 = vector.extract_strided_slice %38 {offsets = [0, 16], sizes = [17, 16], strides = [1, 1]} : vector<17x384xf32> to vector<17x16xf32>
    %59 = vector.extract_strided_slice %38 {offsets = [0, 144], sizes = [17, 16], strides = [1, 1]} : vector<17x384xf32> to vector<17x16xf32>
    %60 = vector.extract_strided_slice %38 {offsets = [0, 272], sizes = [17, 16], strides = [1, 1]} : vector<17x384xf32> to vector<17x16xf32>
    %61 = arith.truncf %58 : vector<17x16xf32> to vector<17x16xbf16>
    %62 = arith.truncf %59 : vector<17x16xf32> to vector<17x16xbf16>
    %cst_22 = arith.constant dense<0.000000e+00> : vector<17x17xf32>
    %63 = tpu.matmul %61, %62, %cst_22 {dimension_numbers = #tpu.dot_dimension_numbers<[1], [1], [0], [0], [0, 0, 1, 0], [], []>} : vector<17x16xbf16>, vector<17x16xbf16>, vector<17x17xf32> -> vector<17x17xf32>
    %cst_23 = arith.constant dense<0xFF800000> : vector<17xf32>
    %64 = vector.multi_reduction <maximumf>, %63, %cst_23 [1] : vector<17x17xf32> to vector<17xf32>
    %65 = vector.shape_cast %64 : vector<17xf32> to vector<17x1xf32>
    %66 = vector.broadcast %65 : vector<17x1xf32> to vector<17x17xf32>
    %67 = arith.subf %63, %66 : vector<17x17xf32>
    %68 = math.exp %67 : vector<17x17xf32>
    %cst_24 = arith.constant dense<0.000000e+00> : vector<17xf32>
    %69 = vector.multi_reduction <add>, %68, %cst_24 [1] : vector<17x17xf32> to vector<17xf32>
    %70 = vector.shape_cast %69 : vector<17xf32> to vector<17x1xf32>
    %71 = tpu.reciprocal %70 {approx = true} : vector<17x1xf32> -> vector<17x1xf32>
    %72 = vector.broadcast %71 : vector<17x1xf32> to vector<17x17xf32>
    %73 = arith.mulf %68, %72 : vector<17x17xf32>
    %74 = arith.truncf %73 : vector<17x17xf32> to vector<17x17xbf16>
    %75 = arith.truncf %60 : vector<17x16xf32> to vector<17x16xbf16>
    %cst_25 = arith.constant dense<0.000000e+00> : vector<17x16xf32>
    %76 = tpu.matmul %74, %75, %cst_25 {dimension_numbers = #tpu.dot_dimension_numbers<[1], [0], [0], [1], [0, 0, 1, 1], [], []>} : vector<17x17xbf16>, vector<17x16xbf16>, vector<17x16xf32> -> vector<17x16xf32>
    %77 = tpu.concatenate %57, %76 in 1 : vector<17x16xf32>, vector<17x16xf32> -> vector<17x32xf32>
    %c0_26 = arith.constant 0 : index
    %c0_27 = arith.constant 0 : index
    %c0_28 = arith.constant 0 : index
    %78 = vector.load %arg6[%c0_26, %c0_27, %c0_28] : memref<1x32x128xbf16, #tpu.memory_space<vmem>>, vector<1x32x128xbf16>
    %79 = vector.shape_cast %78 : vector<1x32x128xbf16> to vector<32x128xbf16>
    %80 = arith.truncf %77 : vector<17x32xf32> to vector<17x32xbf16>
    %cst_29 = arith.constant dense<0.000000e+00> : vector<17x128xf32>
    %81 = tpu.matmul %80, %79, %cst_29 {dimension_numbers = #tpu.dot_dimension_numbers<[1], [0], [0], [1], [0, 0, 1, 1], [], []>} : vector<17x32xbf16>, vector<32x128xbf16>, vector<17x128xf32> -> vector<17x128xf32>
    %c0_30 = arith.constant 0 : index
    %c0_31 = arith.constant 0 : index
    %c0_32 = arith.constant 0 : index
    %82 = vector.load %arg7[%c0_30, %c0_31, %c0_32] : memref<1x1x128xf32, #tpu.memory_space<vmem>>, vector<1x1x128xf32>
    %83 = vector.shape_cast %82 : vector<1x1x128xf32> to vector<1x128xf32>
    %84 = vector.broadcast %83 : vector<1x128xf32> to vector<17x128xf32>
    %85 = arith.addf %81, %84 : vector<17x128xf32>
    %86 = arith.addf %3, %85 : vector<17x128xf32>
    %c0_33 = arith.constant 0 : index
    %c0_34 = arith.constant 0 : index
    %c0_35 = arith.constant 0 : index
    %87 = vector.load %arg8[%c0_33, %c0_34, %c0_35] : memref<1x1x128xf32, #tpu.memory_space<vmem>>, vector<1x1x128xf32>
    %88 = vector.shape_cast %87 : vector<1x1x128xf32> to vector<1x128xf32>
    %c0_36 = arith.constant 0 : index
    %c0_37 = arith.constant 0 : index
    %c0_38 = arith.constant 0 : index
    %89 = vector.load %arg9[%c0_36, %c0_37, %c0_38] : memref<1x1x128xf32, #tpu.memory_space<vmem>>, vector<1x1x128xf32>
    %90 = vector.shape_cast %89 : vector<1x1x128xf32> to vector<1x128xf32>
    %91 = tpu.iota {dimensions = array<i32: 1>} : vector<17x128xi32>
    %c32_i32_39 = arith.constant 32 : i32
    %92 = vector.broadcast %c32_i32_39 : i32 to vector<17x128xi32>
    %93 = arith.cmpi slt, %91, %92 : vector<17x128xi32>
    %cst_40 = arith.constant 0.000000e+00 : f32
    %94 = vector.broadcast %cst_40 : f32 to vector<17x128xf32>
    %95 = arith.select %93, %86, %94 : vector<17x128xi1>, vector<17x128xf32>
    %cst_41 = arith.constant dense<0.000000e+00> : vector<17xf32>
    %96 = vector.multi_reduction <add>, %95, %cst_41 [1] : vector<17x128xf32> to vector<17xf32>
    %97 = vector.shape_cast %96 : vector<17xf32> to vector<17x1xf32>
    %cst_42 = arith.constant 3.125000e-02 : f32
    %98 = vector.broadcast %cst_42 : f32 to vector<17x1xf32>
    %99 = arith.mulf %97, %98 : vector<17x1xf32>
    %100 = vector.broadcast %99 : vector<17x1xf32> to vector<17x128xf32>
    %101 = arith.subf %86, %100 : vector<17x128xf32>
    %cst_43 = arith.constant 0.000000e+00 : f32
    %102 = vector.broadcast %cst_43 : f32 to vector<17x128xf32>
    %103 = arith.select %93, %101, %102 : vector<17x128xi1>, vector<17x128xf32>
    %104 = arith.mulf %103, %103 : vector<17x128xf32>
    %cst_44 = arith.constant dense<0.000000e+00> : vector<17xf32>
    %105 = vector.multi_reduction <add>, %104, %cst_44 [1] : vector<17x128xf32> to vector<17xf32>
    %106 = vector.shape_cast %105 : vector<17xf32> to vector<17x1xf32>
    %cst_45 = arith.constant 3.125000e-02 : f32
    %107 = vector.broadcast %cst_45 : f32 to vector<17x1xf32>
    %108 = arith.mulf %106, %107 : vector<17x1xf32>
    %cst_46 = arith.constant 9.99999974E-6 : f32
    %109 = vector.broadcast %cst_46 : f32 to vector<17x1xf32>
    %110 = arith.addf %108, %109 : vector<17x1xf32>
    %111 = math.rsqrt %110 : vector<17x1xf32>
    %112 = vector.broadcast %111 : vector<17x1xf32> to vector<17x128xf32>
    %113 = arith.mulf %103, %112 : vector<17x128xf32>
    %114 = vector.broadcast %88 : vector<1x128xf32> to vector<17x128xf32>
    %115 = arith.mulf %113, %114 : vector<17x128xf32>
    %116 = vector.broadcast %90 : vector<1x128xf32> to vector<17x128xf32>
    %117 = arith.addf %115, %116 : vector<17x128xf32>
    %118 = arith.truncf %117 : vector<17x128xf32> to vector<17x128xbf16>
    %c0_47 = arith.constant 0 : index
    %c0_48 = arith.constant 0 : index
    %c0_49 = arith.constant 0 : index
    %119 = vector.load %arg10[%c0_47, %c0_48, %c0_49] : memref<1x128x128xbf16, #tpu.memory_space<vmem>>, vector<1x128x128xbf16>
    %120 = vector.shape_cast %119 : vector<1x128x128xbf16> to vector<128x128xbf16>
    %cst_50 = arith.constant dense<0.000000e+00> : vector<17x128xf32>
    %121 = tpu.matmul %118, %120, %cst_50 {dimension_numbers = #tpu.dot_dimension_numbers<[1], [0], [0], [1], [0, 0, 1, 1], [], []>} : vector<17x128xbf16>, vector<128x128xbf16>, vector<17x128xf32> -> vector<17x128xf32>
    %c0_51 = arith.constant 0 : index
    %c0_52 = arith.constant 0 : index
    %c0_53 = arith.constant 0 : index
    %122 = vector.load %arg11[%c0_51, %c0_52, %c0_53] : memref<1x1x128xf32, #tpu.memory_space<vmem>>, vector<1x1x128xf32>
    %123 = vector.shape_cast %122 : vector<1x1x128xf32> to vector<1x128xf32>
    %124 = vector.broadcast %123 : vector<1x128xf32> to vector<17x128xf32>
    %125 = arith.addf %121, %124 : vector<17x128xf32>
    %cst_54 = arith.constant 5.000000e-01 : f32
    %126 = vector.broadcast %cst_54 : f32 to vector<17x128xf32>
    %127 = arith.mulf %126, %125 : vector<17x128xf32>
    %cst_55 = arith.constant 0.707106769 : f32
    %128 = vector.broadcast %cst_55 : f32 to vector<17x128xf32>
    %129 = arith.mulf %125, %128 : vector<17x128xf32>
    %130 = math.absf %129 : vector<17x128xf32>
    %cst_56 = arith.constant 0.327591091 : f32
    %131 = vector.broadcast %cst_56 : f32 to vector<17x128xf32>
    %132 = arith.mulf %131, %130 : vector<17x128xf32>
    %cst_57 = arith.constant 1.000000e+00 : f32
    %133 = vector.broadcast %cst_57 : f32 to vector<17x128xf32>
    %134 = arith.addf %133, %132 : vector<17x128xf32>
    %cst_58 = arith.constant 1.000000e+00 : f32
    %135 = vector.broadcast %cst_58 : f32 to vector<17x128xf32>
    %136 = arith.divf %135, %134 : vector<17x128xf32>
    %cst_59 = arith.constant 1.06140542 : f32
    %137 = vector.broadcast %cst_59 : f32 to vector<17x128xf32>
    %138 = arith.mulf %137, %136 : vector<17x128xf32>
    %cst_60 = arith.constant 1.45315206 : f32
    %139 = vector.broadcast %cst_60 : f32 to vector<17x128xf32>
    %140 = arith.subf %138, %139 : vector<17x128xf32>
    %141 = arith.mulf %140, %136 : vector<17x128xf32>
    %cst_61 = arith.constant 1.42141378 : f32
    %142 = vector.broadcast %cst_61 : f32 to vector<17x128xf32>
    %143 = arith.addf %141, %142 : vector<17x128xf32>
    %144 = arith.mulf %143, %136 : vector<17x128xf32>
    %cst_62 = arith.constant 0.284496725 : f32
    %145 = vector.broadcast %cst_62 : f32 to vector<17x128xf32>
    %146 = arith.subf %144, %145 : vector<17x128xf32>
    %147 = arith.mulf %146, %136 : vector<17x128xf32>
    %cst_63 = arith.constant 0.254829586 : f32
    %148 = vector.broadcast %cst_63 : f32 to vector<17x128xf32>
    %149 = arith.addf %147, %148 : vector<17x128xf32>
    %150 = arith.mulf %149, %136 : vector<17x128xf32>
    %cst_64 = arith.constant 0.000000e+00 : f32
    %151 = vector.broadcast %cst_64 : f32 to vector<17x128xf32>
    %152 = arith.subf %151, %130 : vector<17x128xf32>
    %153 = arith.mulf %152, %130 : vector<17x128xf32>
    %154 = math.exp %153 : vector<17x128xf32>
    %155 = arith.mulf %150, %154 : vector<17x128xf32>
    %cst_65 = arith.constant 1.000000e+00 : f32
    %156 = vector.broadcast %cst_65 : f32 to vector<17x128xf32>
    %157 = arith.subf %156, %155 : vector<17x128xf32>
    %cst_66 = arith.constant 0.000000e+00 : f32
    %158 = vector.broadcast %cst_66 : f32 to vector<17x128xf32>
    %159 = arith.cmpf oge, %129, %158 : vector<17x128xf32>
    %cst_67 = arith.constant 0.000000e+00 : f32
    %160 = vector.broadcast %cst_67 : f32 to vector<17x128xf32>
    %161 = arith.subf %160, %157 : vector<17x128xf32>
    %162 = arith.select %159, %157, %161 : vector<17x128xi1>, vector<17x128xf32>
    %cst_68 = arith.constant 1.000000e+00 : f32
    %163 = vector.broadcast %cst_68 : f32 to vector<17x128xf32>
    %164 = arith.addf %163, %162 : vector<17x128xf32>
    %165 = arith.mulf %127, %164 : vector<17x128xf32>
    %166 = arith.truncf %165 : vector<17x128xf32> to vector<17x128xbf16>
    %c0_69 = arith.constant 0 : index
    %c0_70 = arith.constant 0 : index
    %c0_71 = arith.constant 0 : index
    %167 = vector.load %arg12[%c0_69, %c0_70, %c0_71] : memref<1x128x128xbf16, #tpu.memory_space<vmem>>, vector<1x128x128xbf16>
    %168 = vector.shape_cast %167 : vector<1x128x128xbf16> to vector<128x128xbf16>
    %cst_72 = arith.constant dense<0.000000e+00> : vector<17x128xf32>
    %169 = tpu.matmul %166, %168, %cst_72 {dimension_numbers = #tpu.dot_dimension_numbers<[1], [0], [0], [1], [0, 0, 1, 1], [], []>} : vector<17x128xbf16>, vector<128x128xbf16>, vector<17x128xf32> -> vector<17x128xf32>
    %c0_73 = arith.constant 0 : index
    %c0_74 = arith.constant 0 : index
    %c0_75 = arith.constant 0 : index
    %170 = vector.load %arg13[%c0_73, %c0_74, %c0_75] : memref<1x1x128xf32, #tpu.memory_space<vmem>>, vector<1x1x128xf32>
    %171 = vector.shape_cast %170 : vector<1x1x128xf32> to vector<1x128xf32>
    %172 = vector.broadcast %171 : vector<1x128xf32> to vector<17x128xf32>
    %173 = arith.addf %169, %172 : vector<17x128xf32>
    %174 = arith.addf %86, %173 : vector<17x128xf32>
    %c0_76 = arith.constant 0 : index
    %c0_77 = arith.constant 0 : index
    %175 = vector.load %arg15[%c0_76, %c0_77] : memref<17x128xf32, #tpu.memory_space<vmem>>, vector<17x128xf32>
    tpu.vector_store %arg15[%c0_76, %c0_77], %174 {strides = array<i32>} : memref<17x128xf32, #tpu.memory_space<vmem>>, vector<17x128xf32>,
    %c1_i32 = arith.constant 1 : i32
    %176 = arith.cmpi eq, %arg1, %c1_i32 : i32
    %177 = arith.extui %176 : i1 to i32
    %c0_i32_78 = arith.constant 0 : i32
    %178 = arith.cmpi ne, %177, %c0_i32_78 : i32
    scf.if %178 {
      %c0_79 = arith.constant 0 : index
      %c0_80 = arith.constant 0 : index
      %179 = vector.load %arg15[%c0_79, %c0_80] : memref<17x128xf32, #tpu.memory_space<vmem>>, vector<17x128xf32>
      %c0_81 = arith.constant 0 : index
      %c0_82 = arith.constant 0 : index
      %c0_83 = arith.constant 0 : index
      %180 = vector.load %arg14[%c0_81, %c0_82, %c0_83] : memref<1x17x128xf32, #tpu.memory_space<vmem>>, vector<1x17x128xf32>
      %181 = vector.shape_cast %180 : vector<1x17x128xf32> to vector<17x128xf32>
      %182 = vector.shape_cast %179 : vector<17x128xf32> to vector<1x17x128xf32>
      tpu.vector_store %arg14[%c0_81, %c0_82, %c0_83], %182 {strides = array<i32>} : memref<1x17x128xf32, #tpu.memory_space<vmem>>, vector<1x17x128xf32>,
    } else {
    }
    return
  }
  func.func @transform_0(%arg0: i32, %arg1: i32) -> (i32, i32, i32) {
    %c0_i32 = arith.constant 0 : i32
    %c0_i32_0 = arith.constant 0 : i32
    %c0_i32_1 = arith.constant 0 : i32
    return %arg0, %c0_i32, %c0_i32_0 : i32, i32, i32
  }
  func.func @transform_1(%arg0: i32, %arg1: i32) -> (i32, i32, i32) {
    %c0_i32 = arith.constant 0 : i32
    %c0_i32_0 = arith.constant 0 : i32
    %c0_i32_1 = arith.constant 0 : i32
    return %arg1, %c0_i32, %c0_i32_0 : i32, i32, i32
  }
  func.func @transform_2(%arg0: i32, %arg1: i32) -> (i32, i32, i32) {
    %c0_i32 = arith.constant 0 : i32
    %c0_i32_0 = arith.constant 0 : i32
    %c0_i32_1 = arith.constant 0 : i32
    return %arg1, %c0_i32, %c0_i32_0 : i32, i32, i32
  }
  func.func @transform_3(%arg0: i32, %arg1: i32) -> (i32, i32, i32) {
    %c0_i32 = arith.constant 0 : i32
    %c0_i32_0 = arith.constant 0 : i32
    %c0_i32_1 = arith.constant 0 : i32
    return %arg1, %c0_i32, %c0_i32_0 : i32, i32, i32
  }
  func.func @transform_4(%arg0: i32, %arg1: i32) -> (i32, i32, i32) {
    %c0_i32 = arith.constant 0 : i32
    %c0_i32_0 = arith.constant 0 : i32
    %c0_i32_1 = arith.constant 0 : i32
    return %arg1, %c0_i32, %c0_i32_0 : i32, i32, i32
  }
  func.func @transform_5(%arg0: i32, %arg1: i32) -> (i32, i32, i32) {
    %c0_i32 = arith.constant 0 : i32
    %c0_i32_0 = arith.constant 0 : i32
    %c0_i32_1 = arith.constant 0 : i32
    return %arg1, %c0_i32, %c0_i32_0 : i32, i32, i32
  }
  func.func @transform_6(%arg0: i32, %arg1: i32) -> (i32, i32, i32) {
    %c0_i32 = arith.constant 0 : i32
    %c0_i32_0 = arith.constant 0 : i32
    %c0_i32_1 = arith.constant 0 : i32
    return %arg1, %c0_i32, %c0_i32_0 : i32, i32, i32
  }
  func.func @transform_7(%arg0: i32, %arg1: i32) -> (i32, i32, i32) {
    %c0_i32 = arith.constant 0 : i32
    %c0_i32_0 = arith.constant 0 : i32
    %c0_i32_1 = arith.constant 0 : i32
    return %arg1, %c0_i32, %c0_i32_0 : i32, i32, i32
  }
  func.func @transform_8(%arg0: i32, %arg1: i32) -> (i32, i32, i32) {
    %c0_i32 = arith.constant 0 : i32
    %c0_i32_0 = arith.constant 0 : i32
    %c0_i32_1 = arith.constant 0 : i32
    return %arg1, %c0_i32, %c0_i32_0 : i32, i32, i32
  }
  func.func @transform_9(%arg0: i32, %arg1: i32) -> (i32, i32, i32) {
    %c0_i32 = arith.constant 0 : i32
    %c0_i32_0 = arith.constant 0 : i32
    %c0_i32_1 = arith.constant 0 : i32
    return %arg1, %c0_i32, %c0_i32_0 : i32, i32, i32
  }
  func.func @transform_10(%arg0: i32, %arg1: i32) -> (i32, i32, i32) {
    %c0_i32 = arith.constant 0 : i32
    %c0_i32_0 = arith.constant 0 : i32
    %c0_i32_1 = arith.constant 0 : i32
    return %arg1, %c0_i32, %c0_i32_0 : i32, i32, i32
  }
  func.func @transform_11(%arg0: i32, %arg1: i32) -> (i32, i32, i32) {
    %c0_i32 = arith.constant 0 : i32
    %c0_i32_0 = arith.constant 0 : i32
    %c0_i32_1 = arith.constant 0 : i32
    return %arg1, %c0_i32, %c0_i32_0 : i32, i32, i32
  }
  func.func @transform_12(%arg0: i32, %arg1: i32) -> (i32, i32, i32) {
    %c0_i32 = arith.constant 0 : i32
    %c0_i32_0 = arith.constant 0 : i32
    %c0_i32_1 = arith.constant 0 : i32
    return %arg0, %c0_i32, %c0_i32_0 : i32, i32, i32
  }
}

module attributes {stable_mosaic.version = 11 : i64} {
  func.func @_head_kernel(%arg0: i32, %arg1: memref<2x128xf32, #tpu.memory_space<vmem>>, %arg2: memref<1x128xf32, #tpu.memory_space<vmem>>, %arg3: memref<1x128xf32, #tpu.memory_space<vmem>>, %arg4: memref<128x128xbf16, #tpu.memory_space<vmem>>, %arg5: memref<1x128xf32, #tpu.memory_space<vmem>>, %arg6: memref<2x128xf32, #tpu.memory_space<vmem>>) attributes {dimension_semantics = [#tpu.dimension_semantics<arbitrary>], iteration_bounds = array<i64: 1>, scalar_prefetch = 0 : i64, scratch_operands = 0 : i64, tpu.core_type = #tpu.core_type<tc>, window_params = [{pipeline_mode = #tpu.pipeline_mode<synchronous>, transform_indices = @transform_0, window_bounds = array<i64: 2, 128>}, {pipeline_mode = #tpu.pipeline_mode<synchronous>, transform_indices = @transform_1, window_bounds = array<i64: 1, 128>}, {pipeline_mode = #tpu.pipeline_mode<synchronous>, transform_indices = @transform_2, window_bounds = array<i64: 1, 128>}, {pipeline_mode = #tpu.pipeline_mode<synchronous>, transform_indices = @transform_3, window_bounds = array<i64: 128, 128>}, {pipeline_mode = #tpu.pipeline_mode<synchronous>, transform_indices = @transform_4, window_bounds = array<i64: 1, 128>}, {pipeline_mode = #tpu.pipeline_mode<synchronous>, transform_indices = @transform_5, window_bounds = array<i64: 2, 128>}]} {
    %c0 = arith.constant 0 : index
    %c0_0 = arith.constant 0 : index
    %0 = vector.load %arg1[%c0, %c0_0] : memref<2x128xf32, #tpu.memory_space<vmem>>, vector<2x128xf32>
    %c0_1 = arith.constant 0 : index
    %c0_2 = arith.constant 0 : index
    %1 = vector.load %arg2[%c0_1, %c0_2] : memref<1x128xf32, #tpu.memory_space<vmem>>, vector<1x128xf32>
    %c0_3 = arith.constant 0 : index
    %c0_4 = arith.constant 0 : index
    %2 = vector.load %arg3[%c0_3, %c0_4] : memref<1x128xf32, #tpu.memory_space<vmem>>, vector<1x128xf32>
    %3 = tpu.iota {dimensions = array<i32: 1>} : vector<2x128xi32>
    %c32_i32 = arith.constant 32 : i32
    %4 = vector.broadcast %c32_i32 : i32 to vector<2x128xi32>
    %5 = arith.cmpi slt, %3, %4 : vector<2x128xi32>
    %cst = arith.constant 0.000000e+00 : f32
    %6 = vector.broadcast %cst : f32 to vector<2x128xf32>
    %7 = arith.select %5, %0, %6 : vector<2x128xi1>, vector<2x128xf32>
    %cst_5 = arith.constant dense<0.000000e+00> : vector<2xf32>
    %8 = vector.multi_reduction <add>, %7, %cst_5 [1] : vector<2x128xf32> to vector<2xf32>
    %9 = vector.shape_cast %8 : vector<2xf32> to vector<2x1xf32>
    %cst_6 = arith.constant 3.125000e-02 : f32
    %10 = vector.broadcast %cst_6 : f32 to vector<2x1xf32>
    %11 = arith.mulf %9, %10 : vector<2x1xf32>
    %12 = vector.broadcast %11 : vector<2x1xf32> to vector<2x128xf32>
    %13 = arith.subf %0, %12 : vector<2x128xf32>
    %cst_7 = arith.constant 0.000000e+00 : f32
    %14 = vector.broadcast %cst_7 : f32 to vector<2x128xf32>
    %15 = arith.select %5, %13, %14 : vector<2x128xi1>, vector<2x128xf32>
    %16 = arith.mulf %15, %15 : vector<2x128xf32>
    %cst_8 = arith.constant dense<0.000000e+00> : vector<2xf32>
    %17 = vector.multi_reduction <add>, %16, %cst_8 [1] : vector<2x128xf32> to vector<2xf32>
    %18 = vector.shape_cast %17 : vector<2xf32> to vector<2x1xf32>
    %cst_9 = arith.constant 3.125000e-02 : f32
    %19 = vector.broadcast %cst_9 : f32 to vector<2x1xf32>
    %20 = arith.mulf %18, %19 : vector<2x1xf32>
    %cst_10 = arith.constant 9.99999974E-6 : f32
    %21 = vector.broadcast %cst_10 : f32 to vector<2x1xf32>
    %22 = arith.addf %20, %21 : vector<2x1xf32>
    %23 = math.rsqrt %22 : vector<2x1xf32>
    %24 = vector.broadcast %23 : vector<2x1xf32> to vector<2x128xf32>
    %25 = arith.mulf %15, %24 : vector<2x128xf32>
    %26 = vector.broadcast %1 : vector<1x128xf32> to vector<2x128xf32>
    %27 = arith.mulf %25, %26 : vector<2x128xf32>
    %28 = vector.broadcast %2 : vector<1x128xf32> to vector<2x128xf32>
    %29 = arith.addf %27, %28 : vector<2x128xf32>
    %30 = arith.truncf %29 : vector<2x128xf32> to vector<2x128xbf16>
    %c0_11 = arith.constant 0 : index
    %c0_12 = arith.constant 0 : index
    %31 = vector.load %arg4[%c0_11, %c0_12] : memref<128x128xbf16, #tpu.memory_space<vmem>>, vector<128x128xbf16>
    %cst_13 = arith.constant dense<0.000000e+00> : vector<2x128xf32>
    %32 = tpu.matmul %30, %31, %cst_13 {dimension_numbers = #tpu.dot_dimension_numbers<[1], [0], [0], [1], [0, 0, 1, 1], [], []>} : vector<2x128xbf16>, vector<128x128xbf16>, vector<2x128xf32> -> vector<2x128xf32>
    %c0_14 = arith.constant 0 : index
    %c0_15 = arith.constant 0 : index
    %33 = vector.load %arg5[%c0_14, %c0_15] : memref<1x128xf32, #tpu.memory_space<vmem>>, vector<1x128xf32>
    %34 = vector.broadcast %33 : vector<1x128xf32> to vector<2x128xf32>
    %35 = arith.addf %32, %34 : vector<2x128xf32>
    %c0_16 = arith.constant 0 : index
    %c0_17 = arith.constant 0 : index
    %36 = vector.load %arg6[%c0_16, %c0_17] : memref<2x128xf32, #tpu.memory_space<vmem>>, vector<2x128xf32>
    tpu.vector_store %arg6[%c0_16, %c0_17], %35 {strides = array<i32>} : memref<2x128xf32, #tpu.memory_space<vmem>>, vector<2x128xf32>,
    return
  }
  func.func @transform_0(%arg0: i32) -> (i32, i32) {
    %c0_i32 = arith.constant 0 : i32
    %c0_i32_0 = arith.constant 0 : i32
    %c0_i32_1 = arith.constant 0 : i32
    return %c0_i32, %c0_i32_0 : i32, i32
  }
  func.func @transform_1(%arg0: i32) -> (i32, i32) {
    %c0_i32 = arith.constant 0 : i32
    %c0_i32_0 = arith.constant 0 : i32
    %c0_i32_1 = arith.constant 0 : i32
    return %c0_i32, %c0_i32_0 : i32, i32
  }
  func.func @transform_2(%arg0: i32) -> (i32, i32) {
    %c0_i32 = arith.constant 0 : i32
    %c0_i32_0 = arith.constant 0 : i32
    %c0_i32_1 = arith.constant 0 : i32
    return %c0_i32, %c0_i32_0 : i32, i32
  }
  func.func @transform_3(%arg0: i32) -> (i32, i32) {
    %c0_i32 = arith.constant 0 : i32
    %c0_i32_0 = arith.constant 0 : i32
    %c0_i32_1 = arith.constant 0 : i32
    return %c0_i32, %c0_i32_0 : i32, i32
  }
  func.func @transform_4(%arg0: i32) -> (i32, i32) {
    %c0_i32 = arith.constant 0 : i32
    %c0_i32_0 = arith.constant 0 : i32
    %c0_i32_1 = arith.constant 0 : i32
    return %c0_i32, %c0_i32_0 : i32, i32
  }
  func.func @transform_5(%arg0: i32) -> (i32, i32) {
    %c0_i32 = arith.constant 0 : i32
    %c0_i32_0 = arith.constant 0 : i32
    %c0_i32_1 = arith.constant 0 : i32
    return %c0_i32, %c0_i32_0 : i32, i32
  }
}

</mosaic_0001>

<bundles_post_ra>
// kernel: fwd.5
= control target key start
LH: loop header
LB: loop body
LE: loop exit
PB: predicated region body
PF: predicated region fallthrough
CT: control target
= control target key end

     0   :  { %s2578_s13 = smov 0   ;;  %s2580_s14 = smov 0   ;;  %s3140_s0 = inlined_call_operand.vmem [shape: f32[2,64,128], index: 0, kind: input, shape index: {}]   ;;  %s3141_s1 = inlined_call_operand.vmem [shape: f32[1,1,128], index: 1, kind: input, shape index: {}, may-alias: {1,4}]   ;;  %s3142_s2 = inlined_call_operand.vmem [shape: f32[1,1,128], index: 2, kind: input, shape index: {}, may-alias: {2,5,9}]   ;;  %s3143_s3 = inlined_call_operand.vmem [shape: bf16[1,128,384], index: 3, kind: input, shape index: {}]   ;;  %s3144_s4 = inlined_call_operand.vmem [shape: f32[1,1,128], index: 4, kind: input, shape index: {}, may-alias: {1,4}]   ;;  %s3145_s5 = inlined_call_operand.vmem [shape: f32[1,1,128], index: 5, kind: input, shape index: {}, may-alias: {2,5,9}]   ;;  %s3146_s6 = inlined_call_operand.vmem [shape: bf16[1,128,128], index: 6, kind: input, shape index: {}]   ;;  %s3147_s7 = inlined_call_operand.vmem [shape: f32[1,1,128], index: 7, kind: input, shape index: {}]   ;;  %s3148_s8 = inlined_call_operand.vmem [shape: bf16[1,128,128], index: 8, kind: input, shape index: {}]   ;;  %s3149_s9 = inlined_call_operand.vmem [shape: f32[1,1,128], index: 9, kind: input, shape index: {}, may-alias: {2,5,9}]   ;;  %s3150_s10 = inlined_call_operand.vmem [shape: f32[2,64,128], index: 10, kind: output, shape index: {}]  }
   0x1   :  { %s2582_s15 = smov 0  }
   0x2 LB: > { %s32_s16 = sadd.s32 1, %s2516_s14  ;;  %p2098_p0 = scmp.ge.s32.totalorder %s2520_s15, 1  ;;  %s2520_s15 = sphi %s2582_s15, %s20_s15   ;;  %s2516_s14 = sphi %s2580_s14, %s3152_s14   ;;  %s2512_s13 = sphi %s2578_s13, %s3151_s13  }
   0x3   : > { %p34_p1 = scmp.ge.s32.totalorder %s32_s16, 2  ;;  %p402_p2 = scmp.lt.s32.totalorder %s2520_s15, 3 }
   0x5   : > { %s3154_s16 = smov (%p34_p1, %s32_s16), 0  ;;  %p403_p3 = pnand %p2098_p0, %p402_p2 }
   0x6   : > { %p473_p4 = scmp.lt.s32.totalorder (!%p403_p3), %s2512_s13, 1  ;;  %v547_v0 = vlaneseq (!%p403_p3)  ;;  %v2354_v18 = vld [vmem:[%s3143_s3 + $0x4] ss:$12 sps:$4 sm:$0xff] (!%p403_p3)   ;;  %v2356_v19 = vld [vmem:[%s3143_s3] ss:$12 sps:$4 sm:$0xff] (!%p403_p3)   ;;  %vm1057_vm1 = vcmask (!%p403_p3), 523264  }
   0x7   : > { %406 = sbr.rel (%p403_p3) target bundleno = 2160 (0x870), region = 60  ;;  %v2357_v20 = vld [vmem:[%s3143_s3 + $0x1c] ss:$12 sps:$4 sm:$0xff] (!%p403_p3)   ;;  %846 = vmatprep.subr.bf16.mxu0 (!%p403_p3), %v2354_v18  ;;  %v2360_v62 = vld [vmem:[%s3143_s3 + $0x18] ss:$12 sps:$4 sm:$0xff] (!%p403_p3)  }
   0x8   : > { %v2598_v1 = vand.u32 (!%p403_p3), 127, %v547_v0  ;;  %v2359_v21 = vld [vmem:[%s3143_s3 + $0x8] ss:$12 sps:$4 sm:$0xff] (!%p403_p3)   ;;  %847 = vmatpush1.bf16.msra.mxu0 (!%p403_p3), %v2356_v19  ;;  %v2363_v0 = vld [vmem:[%s3143_s3 + $0x20] ss:$12 sps:$4 sm:$0xff] (!%p403_p3)  }
   0x9   : > { %2225 = vmatprep.subr.bf16.mxu1 (!%p403_p3), %v2359_v21  ;;  %848 = vmatprep.subr.bf16.mxu0 (!%p403_p3), %v2357_v20  ;;  %v2361_v63 = vld [vmem:[%s3143_s3 + $0x34] ss:$12 sps:$4 sm:$0xff] (!%p403_p3)   ;;  %v2376_v19 = vld [vmem:[%s3143_s3 + $0x78] ss:$12 sps:$4 sm:$0xff] (!%p403_p3)  }
   0xa   : > { %vm549_vm0 = vcmp.lt.s32.totalorder (!%p403_p3), %v2598_v1, 27  ;;  %2226 = vmatpush3.bf16.msra.mxu1 (!%p403_p3), %v2359_v21  ;;  %v2375_v18 = vld [vmem:[%s3143_s3 + $0x68] ss:$12 sps:$4 sm:$0xff] (!%p403_p3)   ;;  %v2379_v21 = vld [vmem:[%s3143_s3 + $0x80] ss:$12 sps:$4 sm:$0xff] (!%p403_p3)   ;;  %v2389_v1 = vld [vmem:[%s3146_s6 + $0x18] sm:$0xff] (!%p403_p3)  }
   0xb   : > { %2227 = vmatprep.subr.bf16.mxu1 (!%p403_p3), %v2363_v0  ;;  %v2377_v20 = vld [vmem:[%s3143_s3 + $0x94] ss:$12 sps:$4 sm:$0xff] (!%p403_p3)  }
   0xc   : > { %849 = vmatpush1.bf16.msra.mxu0 (!%p403_p3), %v2360_v62 }
   0xd   : > { %850 = vmatprep.subr.bf16.mxu0 (!%p403_p3), %v2361_v63 }
   0xe   : > { %s3156_s13 = smov (!%p473_p4, %s2512_s13), 1  ;;  %2228 = vmatpush3.bf16.msra.mxu1 %v2363_v0 }
   0xf   : > { %s2171_s17 = sshll.u32 %s3156_s13, 6 }
  0x10   : > { %s477_s20 = scalar_lea.vmem %s3140_s0, %s2171_s17  ;;  %s515_s25 = scalar_lea.vmem %s3150_s10, %s2171_s17 }
  0x11   : > { %v2607_v2 = vld [vmem:[%s477_s20] sm:$0xff]  ;;  %v2609_v3 = vld [vmem:[%s477_s20 + $0x10] sm:$0xff]  ;;  %v2611_v4 = vld [vmem:[%s477_s20 + $0x8] sm:$0xff] }
  0x12   : > { %v550_v5 = vsel %vm549_vm0, %v2607_v2, 0.0  ;;  %v552_v6 = vsel %vm549_vm0, %v2609_v3, 0.0  ;;  %v2619_v7 = vld [vmem:[%s477_s20 + $0x18] sm:$0xff]  ;;  %v2621_v8 = vld [vmem:[%s477_s20 + $0x20] sm:$0xff]  ;;  %v2623_v9 = vld [vmem:[%s477_s20 + $0x28] sm:$0xff]  ;;  %v551_v10 = vsel %vm549_vm0, %v2611_v4, 0.0 }
  0x13   : > { %558 = vadd.xlane.f32.xlu0 %v550_v5  ;;  %562 = vadd.xlane.f32.xlu1 %v552_v6  ;;  %v2628_v11 = vld [vmem:[%s477_s20 + $0x30] sm:$0xff]  ;;  %v2630_v12 = vld [vmem:[%s477_s20 + $0x38] sm:$0xff]  ;;  %v553_v13 = vsel %vm549_vm0, %v2619_v7, 0.0  ;;  %v554_v14 = vsel %vm549_vm0, %v2621_v8, 0.0  ;;  %v555_v15 = vsel %vm549_vm0, %v2623_v9, 0.0 }
  0x14   : > { %v556_v16 = vsel %vm549_vm0, %v2628_v11, 0.0  ;;  %v557_v17 = vsel %vm549_vm0, %v2630_v12, 0.0  ;;  %v2364_v5 = vld [vmem:[%s3143_s3 + $0x30] ss:$12 sps:$4 sm:$0xff]   ;;  %v2365_v6 = vld [vmem:[%s3143_s3 + $0x4c] ss:$12 sps:$4 sm:$0xff]  }
  0x15   : > { %851 = vmatpush1.bf16.msra.mxu0 %v2364_v5 }
  0x16   : > { %852 = vmatprep.subr.bf16.mxu0 %v2365_v6 }
  0x17   : > { %560 = vadd.xlane.f32.xlu0 %v551_v10  ;;  %564 = vadd.xlane.f32.xlu1 %v553_v13  ;;  %v2367_v10 = vld [vmem:[%s3143_s3 + $0x38] ss:$12 sps:$4 sm:$0xff]   ;;  %v2368_v13 = vld [vmem:[%s3143_s3 + $0x48] ss:$12 sps:$4 sm:$0xff]  }
  0x18   : > { %2229 = vmatprep.subr.bf16.mxu1 %v2367_v10 }
  0x19   : > { %853 = vmatpush1.bf16.msra.mxu0 %v2368_v13  ;;  %2230 = vmatpush3.bf16.msra.mxu1 %v2367_v10  ;;  %v2104_v10 = vld [vmem:[%s3142_s2] ss:$0 sm:$0xff] }
  0x1b   : > { %566 = vadd.xlane.f32.xlu0 %v554_v14  ;;  %568 = vadd.xlane.f32.xlu1 %v555_v15  ;;  %v2369_v14 = vld [vmem:[%s3143_s3 + $0x64] ss:$12 sps:$4 sm:$0xff]  }
  0x1c   : > { %v2371_v15 = vld [vmem:[%s3143_s3 + $0x50] ss:$12 sps:$4 sm:$0xff]   ;;  %854 = vmatprep.subr.bf16.mxu0 %v2369_v14 }
  0x1d   : > { %2231 = vmatprep.subr.bf16.mxu1 %v2371_v15 }
  0x1e   : > { %2232 = vmatpush3.bf16.msra.mxu1 %v2371_v15 }
  0x1f   : > { %570 = vadd.xlane.f32.xlu0 %v556_v16  ;;  %572 = vadd.xlane.f32.xlu1 %v557_v17  ;;  %v2372_v16 = vld [vmem:[%s3143_s3 + $0x60] ss:$12 sps:$4 sm:$0xff]   ;;  %v2373_v17 = vld [vmem:[%s3143_s3 + $0x7c] ss:$12 sps:$4 sm:$0xff]  }
  0x20   : > { %855 = vmatpush1.bf16.msra.mxu0 %v2372_v16  ;;  %2233 = vmatprep.subr.bf16.mxu1 %v2375_v18 }
  0x21   : > { %856 = vmatprep.subr.bf16.mxu0 %v2373_v17 }
  0x22   : > { %2234 = vmatpush3.bf16.msra.mxu1 %v2375_v18 }
  0x23   : > { %2235 = vmatprep.subr.bf16.mxu1 %v2379_v21 }
  0x24   : > { %857 = vmatpush1.bf16.msra.mxu0 %v2376_v19 }
  0x25   : > { %858 = vmatprep.subr.bf16.mxu0 %v2377_v20 }
  0x26   : > { %2236 = vmatpush3.bf16.msra.mxu1 %v2379_v21 }
  0xa0   : > { %v559_v22 = vpop.xlane.xlu0 %558  ;;  %v563_v23 = vpop.xlane.xlu1 %562 }
  0xa1   : > { %v574_v24 = vmul.f32 0.037037037, %v559_v22  ;;  %v576_v25 = vmul.f32 0.037037037, %v563_v23  ;;  %v2380_v22 = vld [vmem:[%s3143_s3 + $0x90] ss:$12 sps:$4 sm:$0xff]  }
  0xa2   : > { %v2381_v23 = vld [vmem:[%s3143_s3 + $0xac] ss:$12 sps:$4 sm:$0xff]   ;;  %859 = vmatpush1.bf16.msra.mxu0 %v2380_v22 }
  0xa3   : > { %v582_v26 = vsub.f32 %v2607_v2, %v574_v24  ;;  %v584_v27 = vsub.f32 %v2609_v3, %v576_v25  ;;  %v2383_v24 = vld [vmem:[%s3143_s3 + $0x98] ss:$12 sps:$4 sm:$0xff]   ;;  %v2384_v25 = vld [vmem:[%s3143_s3 + $0xa8] ss:$12 sps:$4 sm:$0xff]   ;;  %860 = vmatprep.subr.bf16.mxu0 %v2381_v23 }
  0xa4   : > { %v561_v28 = vpop.xlane.xlu0 %560  ;;  %v565_v29 = vpop.xlane.xlu1 %564  ;;  %2237 = vmatprep.subr.bf16.mxu1 %v2383_v24 }
  0xa5   : > { %v575_v30 = vmul.f32 0.037037037, %v561_v28  ;;  %v577_v31 = vmul.f32 0.037037037, %v565_v29  ;;  %v2663_v32 = vsel %vm549_vm0, %v582_v26, 0.0  ;;  %v2667_v33 = vsel %vm549_vm0, %v584_v27, 0.0  ;;  %2238 = vmatpush3.bf16.msra.mxu1 %v2383_v24 }
  0xa6   : > { %v598_v34 = vmul.f32 %v2663_v32, %v2663_v32  ;;  %v600_v39 = vmul.f32 %v2667_v33, %v2667_v33  ;;  %v2522_v26 = vmov 0   ;;  %861 = vmatpush1.bf16.msra.mxu0 %v2384_v25  ;;  %v2385_v27 = vld [vmem:[%s3143_s3 + $0xb0] ss:$12 sps:$4 sm:$0xff]  }
  0xa7   : > { %v583_v35 = vsub.f32 %v2611_v4, %v575_v30  ;;  %v585_v36 = vsub.f32 %v2619_v7, %v577_v31  ;;  %878 = vmatprep.mubr.bf16.mxu0 %v2522_v26  ;;  %2239 = vmatprep.subr.bf16.mxu1 %v2385_v27 }
  0xa8   : > { %606 = vadd.xlane.f32.xlu0 %v598_v34  ;;  %v567_v37 = vpop.xlane.xlu0 %566  ;;  %v569_v38 = vpop.xlane.xlu1 %568 }
  0xa9   : > { %v578_v40 = vmul.f32 0.037037037, %v567_v37  ;;  %v579_v41 = vmul.f32 0.037037037, %v569_v38  ;;  %v2677_v42 = vsel %vm549_vm0, %v583_v35, 0.0  ;;  %v2681_v43 = vsel %vm549_vm0, %v585_v36, 0.0  ;;  %2240 = vmatpush3.bf16.msra.mxu1 %v2385_v27 }
  0xaa   : > { %v599_v44 = vmul.f32 %v2677_v42, %v2677_v42  ;;  %v601_v49 = vmul.f32 %v2681_v43, %v2681_v43 }
  0xab   : > { %v586_v45 = vsub.f32 %v2621_v8, %v578_v40  ;;  %v587_v46 = vsub.f32 %v2623_v9, %v579_v41 }
  0xac   : > { %610 = vadd.xlane.f32.xlu0 %v600_v39  ;;  %608 = vadd.xlane.f32.xlu1 %v599_v44  ;;  %v571_v47 = vpop.xlane.xlu0 %570  ;;  %v573_v48 = vpop.xlane.xlu1 %572 }
  0xad   : > { %v580_v50 = vmul.f32 0.037037037, %v571_v47  ;;  %v581_v51 = vmul.f32 0.037037037, %v573_v48  ;;  %v2691_v52 = vsel %vm549_vm0, %v586_v45, 0.0  ;;  %v2695_v53 = vsel %vm549_vm0, %v587_v46, 0.0 }
  0xae   : > { %v602_v54 = vmul.f32 %v2691_v52, %v2691_v52  ;;  %v603_v57 = vmul.f32 %v2695_v53, %v2695_v53 }
  0xaf   : > { %v588_v55 = vsub.f32 %v2628_v11, %v580_v50  ;;  %v589_v56 = vsub.f32 %v2630_v12, %v581_v51 }
  0xb0   : > { %612 = vadd.xlane.f32.xlu1 %v601_v49  ;;  %614 = vadd.xlane.f32.xlu0 %v602_v54 }
  0xb1   : > { %v2705_v58 = vsel %vm549_vm0, %v588_v55, 0.0  ;;  %v2709_v59 = vsel %vm549_vm0, %v589_v56, 0.0 }
  0xb2   : > { %v604_v60 = vmul.f32 %v2705_v58, %v2705_v58  ;;  %v605_v61 = vmul.f32 %v2709_v59, %v2709_v59 }
  0xb4   : > { %616 = vadd.xlane.f32.xlu1 %v603_v57  ;;  %618 = vadd.xlane.f32.xlu0 %v604_v60 }
  0xb8   : > { %620 = vadd.xlane.f32.xlu1 %v605_v61  ;;  %v2103_v61 = vld [vmem:[%s3141_s1] ss:$0 sm:$0xff] }
 0x135   : > { %v607_v28 = vpop.xlane.xlu0 %606 }
 0x136   : > { %v622_v29 = vmul.f32 0.037037037, %v607_v28 }
 0x138   : > { %v630_v30 = vadd.f32 1e-05, %v622_v29 }
 0x139   : > { %v609_v31 = vpop.xlane.xlu1 %608  ;;  %v611_v34 = vpop.xlane.xlu0 %610 }
 0x13a   : > { %2402 = vrsqrt.f32 %v630_v30  ;;  %v623_v35 = vmul.f32 0.037037037, %v609_v31  ;;  %v624_v36 = vmul.f32 0.037037037, %v611_v34 }
 0x13c   : > { %v631_v37 = vadd.f32 1e-05, %v623_v35  ;;  %v632_v38 = vadd.f32 1e-05, %v624_v36 }
 0x13d   : > { %v613_v39 = vpop.xlane.xlu1 %612  ;;  %v615_v40 = vpop.xlane.xlu0 %614 }
 0x13e   : > { %2404 = vrsqrt.f32 %v631_v37  ;;  %v625_v41 = vmul.f32 0.037037037, %v613_v39  ;;  %v626_v44 = vmul.f32 0.037037037, %v615_v40 }
 0x13f   : > { %2406 = vrsqrt.f32 %v632_v38 }
 0x140   : > { %v633_v45 = vadd.f32 1e-05, %v625_v41  ;;  %v634_v46 = vadd.f32 1e-05, %v626_v44 }
 0x141   : > { %v617_v47 = vpop.xlane.xlu1 %616  ;;  %v619_v48 = vpop.xlane.xlu0 %618 }
 0x142   : > { %2408 = vrsqrt.f32 %v633_v45  ;;  %v627_v49 = vmul.f32 0.037037037, %v617_v47  ;;  %v628_v50 = vmul.f32 0.037037037, %v619_v48 }
 0x143   : > { %2410 = vrsqrt.f32 %v634_v46 }
 0x144   : > { %v2403_v51 = vpop.eup %2402  ;;  %v635_v54 = vadd.f32 1e-05, %v627_v49  ;;  %v636_v55 = vadd.f32 1e-05, %v628_v50 }
 0x145   : > { %v621_v56 = vpop.xlane.xlu1 %620  ;;  %v646_v57 = vmul.f32 %v2403_v51, %v2663_v32 }
 0x146   : > { %2412 = vrsqrt.f32 %v635_v54  ;;  %v629_v60 = vmul.f32 0.037037037, %v621_v56 }
 0x147   : > { %2414 = vrsqrt.f32 %v636_v55  ;;  %v660_v6 = vmul.f32 %v2103_v61, %v646_v57 }
 0x148   : > { %v2405_v62 = vpop.eup %2404  ;;  %v637_v63 = vadd.f32 1e-05, %v629_v60 }
 0x149   : > { %v2407_v0 = vpop.eup %2406  ;;  %v647_v5 = vmul.f32 %v2405_v62, %v2677_v42  ;;  %v674_v17 = vadd.f32 %v2104_v10, %v660_v6 }
 0x14a   : > { %2416 = vrsqrt.f32 %v637_v63  ;;  %v648_v32 = vmul.f32 %v2407_v0, %v2667_v33 }
 0x14b   : > { %v661_v13 = vmul.f32 %v2103_v61, %v647_v5 }
 0x14c   : > { %v2409_v14 = vpop.eup %2408  ;;  %v662_v15 = vmul.f32 %v2103_v61, %v648_v32 }
 0x14d   : > { %v2411_v16 = vpop.eup %2410  ;;  %v675_v18 = vadd.f32 %v2104_v10, %v661_v13  ;;  %v649_v19 = vmul.f32 %v2409_v14, %v2681_v43 }
 0x14e   : > { %v650_v20 = vmul.f32 %v2411_v16, %v2691_v52  ;;  %v676_v23 = vadd.f32 %v2104_v10, %v662_v15 }
 0x14f   : > { %v682_v21 = vpack.c.bf16 %v675_v18, %v674_v17  ;;  %v663_v42 = vmul.f32 %v2103_v61, %v649_v19 }
 0x150   : > { %v2413_v22 = vpop.eup %2412  ;;  %v664_v27 = vmul.f32 %v2103_v61, %v650_v20 }
 0x151   : > { %v2415_v24 = vpop.eup %2414  ;;  %879 = vmatmul.mubr.bf16.vlgmr.msra.gmra.mrb[0].mxu0 %v682_v21  ;;  %2241 = vmatprep.mubr.bf16.mxu1 %v682_v21  ;;  %v677_v25 = vadd.f32 %v2104_v10, %v663_v42  ;;  %v651_v33 = vmul.f32 %v2413_v22, %v2695_v53 }
 0x152   : > { %888 = vmatprep.mubr.bf16.mxu0 %v2522_v26  ;;  %v652_v28 = vmul.f32 %v2415_v24, %v2705_v58  ;;  %v678_v52 = vadd.f32 %v2104_v10, %v664_v27 }
 0x153   : > { %v683_v29 = vpack.c.bf16 %v677_v25, %v676_v23  ;;  %v665_v30 = vmul.f32 %v2103_v61, %v651_v33 }
 0x154   : > { %v2417_v43 = vpop.eup %2416  ;;  %v666_v35 = vmul.f32 %v2103_v61, %v652_v28 }
 0x155   : > { %2242 = vmatmul.mubr.bf16.vlgmr.msra.gmra.mrb[0].mxu1 %v683_v29  ;;  %v679_v31 = vadd.f32 %v2104_v10, %v665_v30  ;;  %v653_v34 = vmul.f32 %v2417_v43, %v2709_v59 }
 0x156   : > { %v680_v38 = vadd.f32 %v2104_v10, %v666_v35 }
 0x157   : > { %v684_v36 = vpack.c.bf16 %v679_v31, %v678_v52  ;;  %v667_v37 = vmul.f32 %v2103_v61, %v653_v34 }
 0x159   : > { %889 = vmatmul.mubr.bf16.gmra.mrb[4].mxu0 %v683_v29  ;;  %2245 = vmatprep.mubr.bf16.mxu1 %v684_v36  ;;  %v681_v53 = vadd.f32 %v2104_v10, %v667_v37 }
 0x15a   : > { %898 = vmatprep.mubr.bf16.mxu0 %v2522_v26 }
 0x15b   : > { %v685_v39 = vpack.c.bf16 %v681_v53, %v680_v38 }
 0x15d   : > { %2246 = vmatmul.mubr.bf16.gmra.mrb[4].mxu1 %v685_v39 }
 0x161   : > { %899 = vmatmul.mubr.bf16.gmra.mrb[8].mxu0 %v684_v36 }
 0x162   : > { %908 = vmatprep.mubr.bf16.mxu0 %v2522_v26 }
 0x169   : > { %909 = vmatmul.mubr.bf16.gmra.mrb[12].mxu0 %v685_v39 }
 0x224   : > { %v880_v58 = vpop.f32.mrb[0].mxu0 }
 0x225   : > { %v882_v40 = vpop.f32.mrb[1].mxu0 }
 0x226   : > { %v884_v41 = vpop.f32.mrb[2].mxu0 }
 0x227   : > { %v984_v44 = vpack.c.bf16 %v884_v41, %v880_v58  ;;  %v886_v59 = vpop.f32.mrb[3].mxu0 }
 0x228   : > { %v988_v45 = vpack.c.bf16 %v886_v59, %v882_v40  ;;  %v2243_v46 = vpop.f32.mrb[0].mxu1 }
 0x229   : > { %v953_v47 = vpop.f32.mrb[1].mxu1  ;;  %2257 = vmatprep.mubr.bf16.mxu0 %v984_v44 }
 0x22a   : > { %v2244_v48 = vpop.f32.mrb[2].mxu1  ;;  %2249 = vmatprep.subr.bf16.mxu0 %v988_v45 }
 0x22b   : > { %v1151_v49 = vpack.c.bf16 %v2244_v48, %v2243_v46  ;;  %v956_v50 = vpop.f32.mrb[3].mxu1  ;;  %2250 = vmatpush3.bf16.xpose.msra.mxu0 %v988_v45 }
 0x22c   : > { %v1150_v51 = vpack.c.bf16 %v956_v50, %v953_v47  ;;  %v890_v54 = vpop.f32.mrb[4].mxu0 }
 0x22d   : > { %v892_v55 = vpop.f32.mrb[5].mxu0 }
 0x22e   : > { %v894_v56 = vpop.f32.mrb[6].mxu0  ;;  %2265 = vmatprep.subr.bf16.mxu1 %v1150_v51 }
 0x22f   : > { %v985_v26 = vpack.c.bf16 %v894_v56, %v890_v54  ;;  %v896_v57 = vpop.f32.mrb[7].mxu0  ;;  %2266 = vmatpush3.bf16.msra.mxu1 %v1150_v51 }
 0x230   : > { %v989_v60 = vpack.c.bf16 %v896_v57, %v892_v55  ;;  %v2247_v61 = vpop.f32.mrb[4].mxu1  ;;  %2267 = vmatprep.subr.bf16.mxu1 %v1151_v49 }
 0x231   : > { %v969_v62 = vpop.f32.mrb[5].mxu1 }
 0x232   : > { %v2248_v63 = vpop.f32.mrb[6].mxu1  ;;  %2251 = vmatprep.subr.bf16.mxu0 %v989_v60 }
 0x233   : > { %v1153_v0 = vpack.c.bf16 %v2248_v63, %v2247_v61  ;;  %v972_v5 = vpop.f32.mrb[7].mxu1  ;;  %2252 = vmatpush3.bf16.xpose.msra.mxu0 %v989_v60  ;;  %2268 = vmatpush3.bf16.msra.mxu1 %v1151_v49 }
 0x234   : > { %v1152_v6 = vpack.c.bf16 %v972_v5, %v969_v62  ;;  %v900_v10 = vpop.f32.mrb[8].mxu0 }
 0x235   : > { %v902_v32 = vpop.f32.mrb[9].mxu0 }
 0x236   : > { %v904_v13 = vpop.f32.mrb[10].mxu0  ;;  %2269 = vmatprep.subr.bf16.mxu1 %v1152_v6 }
 0x237   : > { %v986_v14 = vpack.c.bf16 %v904_v13, %v900_v10  ;;  %v906_v15 = vpop.f32.mrb[11].mxu0  ;;  %2270 = vmatpush3.bf16.msra.mxu1 %v1152_v6 }
 0x238   : > { %v990_v16 = vpack.c.bf16 %v906_v15, %v902_v32  ;;  %2271 = vmatprep.subr.bf16.mxu1 %v1153_v0 }
 0x23a   : > { %2253 = vmatprep.subr.bf16.mxu0 %v990_v16 }
 0x23b   : > { %2254 = vmatpush3.bf16.xpose.msra.mxu0 %v990_v16  ;;  %2272 = vmatpush3.bf16.msra.mxu1 %v1153_v0 }
 0x23c   : > { %v910_v17 = vpop.f32.mrb[12].mxu0 }
 0x23d   : > { %v912_v18 = vpop.f32.mrb[13].mxu0 }
 0x23e   : > { %v914_v19 = vpop.f32.mrb[14].mxu0 }
 0x23f   : > { %v987_v20 = vpack.c.bf16 %v914_v19, %v910_v17  ;;  %v916_v21 = vpop.f32.mrb[15].mxu0 }
 0x240   : > { %v991_v42 = vpack.c.bf16 %v916_v21, %v912_v18 }
 0x242   : > { %2255 = vmatprep.subr.bf16.mxu0 %v991_v42 }
 0x243   : > { %2256 = vmatpush3.bf16.xpose.msra.mxu0 %v991_v42 }
 0x24a   : > { %2258 = vmatmul.mubr.bf16.vlgmr.msra.gmra.mrb[16].mxu0 %v985_v26 }
 0x24b   : > { %2261 = vmatprep.mubr.bf16.mxu0 %v986_v14 }
 0x252   : > { %2262 = vmatmul.mubr.bf16.gmra.mrb[20].mxu0 %v987_v20 }
 0x31d   : > { %v2259_v22 = vpop.f32.mrb[16].mxu0 }
 0x31e   : > { %v1026_v23 = vpop.f32.mrb[17].mxu0  ;;  %v1064_v28 = vsel %vm1057_vm1, %v2259_v22, -inf }
 0x31f   : > { %v2260_v24 = vpop.f32.mrb[18].mxu0  ;;  %v1058_v25 = vsel %vm1057_vm1, %v1026_v23, -inf }
 0x320   : > { %1059 = vmax.xlane.f32.xlu0 %v1058_v25  ;;  %v1029_v33 = vpop.f32.mrb[19].mxu0  ;;  %v1067_v30 = vsel %vm1057_vm1, %v2260_v24, -inf }
 0x321   : > { %v1061_v27 = vsel %vm1057_vm1, %v1029_v33, -inf }
 0x322   : > { %1062 = vmax.xlane.f32.xlu1 %v1061_v27 }
 0x324   : > { %1065 = vmax.xlane.f32.xlu0 %v1064_v28 }
 0x325   : > { %v2263_v29 = vpop.f32.mrb[20].mxu0 }
 0x326   : > { %1068 = vmax.xlane.f32.xlu1 %v1067_v30  ;;  %v1042_v43 = vpop.f32.mrb[21].mxu0  ;;  %v1076_v36 = vsel %vm1057_vm1, %v2263_v29, -inf }
 0x327   : > { %v2264_v52 = vpop.f32.mrb[22].mxu0  ;;  %v1070_v31 = vsel %vm1057_vm1, %v1042_v43, -inf }
 0x328   : > { %1071 = vmax.xlane.f32.xlu0 %v1070_v31  ;;  %v1045_v34 = vpop.f32.mrb[23].mxu0  ;;  %v1079_v37 = vsel %vm1057_vm1, %v2264_v52, -inf }
 0x329   : > { %v1073_v35 = vsel %vm1057_vm1, %v1045_v34, -inf }
 0x32a   : > { %1074 = vmax.xlane.f32.xlu1 %v1073_v35 }
 0x32c   : > { %1077 = vmax.xlane.f32.xlu0 %v1076_v36 }
 0x32e   : > { %1080 = vmax.xlane.f32.xlu1 %v1079_v37 }
 0x3ad   : > { %v1060_v38 = vpop.xlane.xlu0 %1059 }
 0x3ae   : > { %v1082_v53 = vsub.f32 %v1026_v23, %v1060_v38 }
 0x3af   : > { %v1063_v39 = vpop.xlane.xlu1 %1062 }
 0x3b0   : > { %v1090_v58 = vmul.f32 1.442695, %v1082_v53  ;;  %v1083_v40 = vsub.f32 %v1029_v33, %v1063_v39 }
 0x3b1   : > { %v1066_v41 = vpop.xlane.xlu0 %1065 }
 0x3b2   : > { %2418 = vpow2.f32 %v1090_v58  ;;  %v1092_v44 = vmul.f32 1.442695, %v1083_v40  ;;  %v1084_v59 = vsub.f32 %v2259_v22, %v1066_v41 }
 0x3b3   : > { %v1069_v45 = vpop.xlane.xlu1 %1068 }
 0x3b4   : > { %2420 = vpow2.f32 %v1092_v44  ;;  %v1094_v46 = vmul.f32 1.442695, %v1084_v59  ;;  %v1085_v47 = vsub.f32 %v2260_v24, %v1069_v45 }
 0x3b5   : > { %v1072_v48 = vpop.xlane.xlu0 %1071 }
 0x3b6   : > { %2422 = vpow2.f32 %v1094_v46  ;;  %v1096_v49 = vmul.f32 1.442695, %v1085_v47  ;;  %v1086_v50 = vsub.f32 %v1042_v43, %v1072_v48 }
 0x3b7   : > { %v1075_v51 = vpop.xlane.xlu1 %1074 }
 0x3b8   : > { %2424 = vpow2.f32 %v1096_v49  ;;  %v1098_v54 = vmul.f32 1.442695, %v1086_v50  ;;  %v1087_v55 = vsub.f32 %v1045_v34, %v1075_v51 }
 0x3b9   : > { %v1078_v56 = vpop.xlane.xlu0 %1077 }
 0x3ba   : > { %2426 = vpow2.f32 %v1098_v54  ;;  %v1100_v26 = vmul.f32 1.442695, %v1087_v55  ;;  %v1088_v57 = vsub.f32 %v2263_v29, %v1078_v56 }
 0x3bb   : > { %v1081_v60 = vpop.xlane.xlu1 %1080 }
 0x3bc   : > { %v2419_v61 = vpop.eup %2418  ;;  %2428 = vpow2.f32 %v1100_v26  ;;  %v1102_v62 = vmul.f32 1.442695, %v1088_v57  ;;  %v1089_v63 = vsub.f32 %v2264_v52, %v1081_v60 }
 0x3bd   : > { %v1106_v0 = vsel %vm1057_vm1, %v2419_v61, 0.0 }
 0x3be   : > { %v2421_v5 = vpop.eup %2420  ;;  %2430 = vpow2.f32 %v1102_v62  ;;  %v1104_v6 = vmul.f32 1.442695, %v1089_v63  ;;  %1107 = vadd.xlane.f32.xlu0 %v1106_v0 }
 0x3bf   : > { %v1109_v10 = vsel %vm1057_vm1, %v2421_v5, 0.0 }
 0x3c0   : > { %v2423_v32 = vpop.eup %2422  ;;  %2432 = vpow2.f32 %v1104_v6  ;;  %1110 = vadd.xlane.f32.xlu1 %v1109_v10 }
 0x3c1   : > { %v1112_v13 = vsel %vm1057_vm1, %v2423_v32, 0.0 }
 0x3c2   : > { %v2425_v14 = vpop.eup %2424  ;;  %1113 = vadd.xlane.f32.xlu0 %v1112_v13 }
 0x3c3   : > { %v1115_v15 = vsel %vm1057_vm1, %v2425_v14, 0.0 }
 0x3c4   : > { %v2427_v16 = vpop.eup %2426  ;;  %1116 = vadd.xlane.f32.xlu1 %v1115_v15 }
 0x3c5   : > { %v1118_v17 = vsel %vm1057_vm1, %v2427_v16, 0.0 }
 0x3c6   : > { %v2429_v18 = vpop.eup %2428  ;;  %1119 = vadd.xlane.f32.xlu0 %v1118_v17 }
 0x3c7   : > { %v1121_v19 = vsel %vm1057_vm1, %v2429_v18, 0.0 }
 0x3c8   : > { %v2431_v20 = vpop.eup %2430  ;;  %1122 = vadd.xlane.f32.xlu1 %v1121_v19 }
 0x3c9   : > { %v1124_v21 = vsel %vm1057_vm1, %v2431_v20, 0.0 }
 0x3ca   : > { %v2433_v42 = vpop.eup %2432  ;;  %1125 = vadd.xlane.f32.xlu0 %v1124_v21 }
 0x3cb   : > { %v1127_v22 = vsel %vm1057_vm1, %v2433_v42, 0.0 }
 0x3cc   : > { %1128 = vadd.xlane.f32.xlu1 %v1127_v22 }
 0x44b   : > { %v1108_v23 = vpop.xlane.xlu0 %1107 }
 0x44c   : > { %2434 = vrcp.f32 %v1108_v23 }
 0x44d   : > { %v1111_v24 = vpop.xlane.xlu1 %1110 }
 0x44e   : > { %2436 = vrcp.f32 %v1111_v24 }
 0x44f   : > { %v1114_v25 = vpop.xlane.xlu0 %1113 }
 0x450   : > { %2438 = vrcp.f32 %v1114_v25 }
 0x451   : > { %v1117_v33 = vpop.xlane.xlu1 %1116 }
 0x452   : > { %2440 = vrcp.f32 %v1117_v33 }
 0x453   : > { %v1120_v27 = vpop.xlane.xlu0 %1119 }
 0x454   : > { %2442 = vrcp.f32 %v1120_v27 }
 0x455   : > { %v1123_v28 = vpop.xlane.xlu1 %1122 }
 0x456   : > { %v2435_v29 = vpop.eup %2434  ;;  %2444 = vrcp.f32 %v1123_v28 }
 0x457   : > { %v1126_v30 = vpop.xlane.xlu0 %1125  ;;  %v1138_v31 = vmul.f32 %v2435_v29, %v2419_v61 }
 0x458   : > { %v2437_v43 = vpop.eup %2436  ;;  %2446 = vrcp.f32 %v1126_v30 }
 0x459   : > { %v1129_v52 = vpop.xlane.xlu1 %1128  ;;  %v1139_v34 = vmul.f32 %v2437_v43, %v2421_v5 }
 0x45a   : > { %v2439_v35 = vpop.eup %2438  ;;  %2448 = vrcp.f32 %v1129_v52 }
 0x45b   : > { %v1146_v36 = vpack.c.bf16 %v1139_v34, %v1138_v31  ;;  %v1140_v38 = vmul.f32 %v2439_v35, %v2423_v32 }
 0x45c   : > { %v2441_v37 = vpop.eup %2440 }
 0x45d   : > { %v1141_v53 = vmul.f32 %v2441_v37, %v2425_v14  ;;  %2273 = vmatprep.mubr.msk.bf16.mxu1 %vm1057_vm1, %v1146_v36 }
 0x45e   : > { %v2443_v39 = vpop.eup %2442 }
 0x45f   : > { %v1147_v58 = vpack.c.bf16 %v1141_v53, %v1140_v38  ;;  %v1142_v41 = vmul.f32 %v2443_v39, %v2427_v16 }
 0x460   : > { %v2445_v40 = vpop.eup %2444 }
 0x461   : > { %2274 = vmatmul.mubr.msk.bf16.vlgmr.msra.gmra.mrb[8].mxu1 %vm1057_vm1, %v1147_v58  ;;  %v1143_v44 = vmul.f32 %v2445_v40, %v2429_v18 }
 0x462   : > { %v2447_v59 = vpop.eup %2446 }
 0x463   : > { %v1148_v45 = vpack.c.bf16 %v1143_v44, %v1142_v41  ;;  %v1144_v47 = vmul.f32 %v2447_v59, %v2431_v20 }
 0x464   : > { %v2449_v46 = vpop.eup %2448 }
 0x465   : > { %2277 = vmatprep.mubr.msk.bf16.mxu1 %vm1057_vm1, %v1148_v45  ;;  %v1145_v48 = vmul.f32 %v2449_v46, %v2433_v42 }
 0x467   : > { %v1149_v49 = vpack.c.bf16 %v1145_v48, %v1144_v47 }
 0x469   : > { %2278 = vmatmul.mubr.msk.bf16.gmra.mrb[12].mxu1 %vm1057_vm1, %v1149_v49 }
 0x534   : > { %v2275_v50 = vpop.f32.mrb[8].mxu1 }
 0x535   : > { %v1200_v51 = vpop.f32.mrb[9].mxu1  ;;  %v2817_v26 = vadd.f32 %v2275_v50, %v2609_v3 }
 0x536   : > { %v2814_v54 = vadd.f32 %v1200_v51, %v2607_v2  ;;  %v2276_v55 = vpop.f32.mrb[10].mxu1 }
 0x537   : > { %v1203_v56 = vpop.f32.mrb[11].mxu1  ;;  %v2826_v61 = vadd.f32 %v2276_v55, %v2619_v7  ;;  %v1243_v3 = vsel %vm549_vm0, %v2817_v26, 0.0  ;;  %v2387_v55 = vld [vmem:[%s3146_s6 + $0x8] sm:$0xff]  }
 0x538   : > { %v2820_v57 = vadd.f32 %v1203_v56, %v2611_v4  ;;  %v1241_v60 = vsel %vm549_vm0, %v2814_v54, 0.0  ;;  %v2388_v56 = vld [vmem:[%s3146_s6 + $0x10] sm:$0xff]  }
 0x539   : > { %1249 = vadd.xlane.f32.xlu0 %v1241_v60  ;;  %v1244_v7 = vsel %vm549_vm0, %v2826_v61, 0.0  ;;  %v2390_v60 = vld [vmem:[%s3146_s6 + $0x20] sm:$0xff]  }
 0x53a   : > { %v1242_v2 = vsel %vm549_vm0, %v2820_v57, 0.0 }
 0x53b   : > { %1251 = vadd.xlane.f32.xlu1 %v1242_v2  ;;  %v2391_v2 = vld [vmem:[%s3146_s6 + $0x28] sm:$0xff]  }
 0x53c   : > { %v2279_v62 = vpop.f32.mrb[12].mxu1 }
 0x53d   : > { %1253 = vadd.xlane.f32.xlu0 %v1243_v3  ;;  %v1216_v4 = vpop.f32.mrb[13].mxu1  ;;  %v2841_v6 = vadd.f32 %v2279_v62, %v2628_v11  ;;  %v2392_v62 = vld [vmem:[%s3146_s6 + $0x30] sm:$0xff]   ;;  %v2393_v3 = vld [vmem:[%s3146_s6 + $0x38] sm:$0xff]  }
 0x53e   : > { %v2835_v63 = vadd.f32 %v1216_v4, %v2621_v8  ;;  %v2280_v0 = vpop.f32.mrb[14].mxu1 }
 0x53f   : > { %1255 = vadd.xlane.f32.xlu1 %v1244_v7  ;;  %v1219_v5 = vpop.f32.mrb[15].mxu1  ;;  %v2850_v8 = vadd.f32 %v2280_v0, %v2630_v12  ;;  %v1247_v11 = vsel %vm549_vm0, %v2841_v6, 0.0  ;;  %v2386_v12 = vld [vmem:[%s3146_s6] sm:$0xff]  }
 0x540   : > { %v2844_v10 = vadd.f32 %v1219_v5, %v2623_v9  ;;  %v1245_v32 = vsel %vm549_vm0, %v2835_v63, 0.0  ;;  %2281 = vmatprep.subr.bf16.mxu1 %v2386_v12 }
 0x541   : > { %1257 = vadd.xlane.f32.xlu0 %v1245_v32  ;;  %v1248_v9 = vsel %vm549_vm0, %v2850_v8, 0.0  ;;  %2282 = vmatpush3.bf16.msra.mxu1 %v2386_v12 }
 0x542   : > { %v1246_v13 = vsel %vm549_vm0, %v2844_v10, 0.0  ;;  %2283 = vmatprep.subr.bf16.mxu1 %v2387_v55 }
 0x543   : > { %1259 = vadd.xlane.f32.xlu1 %v1246_v13 }
 0x545   : > { %1261 = vadd.xlane.f32.xlu0 %v1247_v11  ;;  %2284 = vmatpush3.bf16.msra.mxu1 %v2387_v55 }
 0x546   : > { %2285 = vmatprep.subr.bf16.mxu1 %v2388_v56 }
 0x547   : > { %1263 = vadd.xlane.f32.xlu1 %v1248_v9 }
 0x549   : > { %2286 = vmatpush3.bf16.msra.mxu1 %v2388_v56 }
 0x54a   : > { %2287 = vmatprep.subr.bf16.mxu1 %v2389_v1 }
 0x54d   : > { %2288 = vmatpush3.bf16.msra.mxu1 %v2389_v1 }
 0x54e   : > { %2289 = vmatprep.subr.bf16.mxu1 %v2390_v60 }
 0x551   : > { %2290 = vmatpush3.bf16.msra.mxu1 %v2390_v60 }
 0x552   : > { %2291 = vmatprep.subr.bf16.mxu1 %v2391_v2 }
 0x555   : > { %2292 = vmatpush3.bf16.msra.mxu1 %v2391_v2 }
 0x556   : > { %2293 = vmatprep.subr.bf16.mxu1 %v2392_v62 }
 0x559   : > { %2294 = vmatpush3.bf16.msra.mxu1 %v2392_v62 }
 0x55a   : > { %2295 = vmatprep.subr.bf16.mxu1 %v2393_v3 }
 0x55d   : > { %2296 = vmatpush3.bf16.msra.mxu1 %v2393_v3 }
 0x5c6   : > { %v1250_v14 = vpop.xlane.xlu0 %1249 }
 0x5c7   : > { %v1265_v15 = vmul.f32 0.037037037, %v1250_v14 }
 0x5c8   : > { %v1252_v16 = vpop.xlane.xlu1 %1251 }
 0x5c9   : > { %v1273_v17 = vsub.f32 %v2814_v54, %v1265_v15  ;;  %v1266_v18 = vmul.f32 0.037037037, %v1252_v16 }
 0x5ca   : > { %v1254_v19 = vpop.xlane.xlu0 %1253 }
 0x5cb   : > { %v1274_v20 = vsub.f32 %v2820_v57, %v1266_v18  ;;  %v1267_v21 = vmul.f32 0.037037037, %v1254_v19  ;;  %v2868_v42 = vsel %vm549_vm0, %v1273_v17, 0.0 }
 0x5cc   : > { %v1256_v22 = vpop.xlane.xlu1 %1255  ;;  %v1289_v23 = vmul.f32 %v2868_v42, %v2868_v42 }
 0x5cd   : > { %v1275_v24 = vsub.f32 %v2817_v26, %v1267_v21  ;;  %v1268_v25 = vmul.f32 0.037037037, %v1256_v22  ;;  %v2875_v33 = vsel %vm549_vm0, %v1274_v20, 0.0 }
 0x5ce   : > { %1297 = vadd.xlane.f32.xlu0 %v1289_v23  ;;  %v1258_v27 = vpop.xlane.xlu0 %1257  ;;  %v1290_v28 = vmul.f32 %v2875_v33, %v2875_v33 }
 0x5cf   : > { %v1276_v29 = vsub.f32 %v2826_v61, %v1268_v25  ;;  %v1269_v30 = vmul.f32 0.037037037, %v1258_v27  ;;  %v2882_v43 = vsel %vm549_vm0, %v1275_v24, 0.0 }
 0x5d0   : > { %1299 = vadd.xlane.f32.xlu1 %v1290_v28  ;;  %v1260_v52 = vpop.xlane.xlu1 %1259  ;;  %v1291_v31 = vmul.f32 %v2882_v43, %v2882_v43  ;;  %v2133_v28 = vld [vmem:[%s3144_s4] ss:$0 sm:$0xff] }
 0x5d1   : > { %v1277_v34 = vsub.f32 %v2835_v63, %v1269_v30  ;;  %v1270_v35 = vmul.f32 0.037037037, %v1260_v52  ;;  %v2889_v36 = vsel %vm549_vm0, %v1276_v29, 0.0 }
 0x5d2   : > { %1301 = vadd.xlane.f32.xlu0 %v1291_v31  ;;  %v1262_v37 = vpop.xlane.xlu0 %1261  ;;  %v1292_v38 = vmul.f32 %v2889_v36, %v2889_v36 }
 0x5d3   : > { %v1278_v53 = vsub.f32 %v2844_v10, %v1270_v35  ;;  %v1271_v39 = vmul.f32 0.037037037, %v1262_v37  ;;  %v2896_v58 = vsel %vm549_vm0, %v1277_v34, 0.0 }
 0x5d4   : > { %1303 = vadd.xlane.f32.xlu1 %v1292_v38  ;;  %v1264_v40 = vpop.xlane.xlu1 %1263  ;;  %v1293_v41 = vmul.f32 %v2896_v58, %v2896_v58 }
 0x5d5   : > { %v1279_v44 = vsub.f32 %v2841_v6, %v1271_v39  ;;  %v1272_v59 = vmul.f32 0.037037037, %v1264_v40  ;;  %v2903_v45 = vsel %vm549_vm0, %v1278_v53, 0.0  ;;  %v2134_v53 = vld [vmem:[%s3145_s5] ss:$0 sm:$0xff] }
 0x5d6   : > { %1305 = vadd.xlane.f32.xlu0 %v1293_v41  ;;  %v1294_v46 = vmul.f32 %v2903_v45, %v2903_v45 }
 0x5d7   : > { %v1280_v47 = vsub.f32 %v2850_v8, %v1272_v59  ;;  %v2910_v48 = vsel %vm549_vm0, %v1279_v44, 0.0 }
 0x5d8   : > { %1307 = vadd.xlane.f32.xlu1 %v1294_v46  ;;  %v1295_v49 = vmul.f32 %v2910_v48, %v2910_v48 }
 0x5d9   : > { %v2916_v50 = vsel %vm549_vm0, %v1280_v47, 0.0 }
 0x5da   : > { %1309 = vadd.xlane.f32.xlu0 %v1295_v49  ;;  %v1296_v51 = vmul.f32 %v2916_v50, %v2916_v50 }
 0x5dc   : > { %1311 = vadd.xlane.f32.xlu1 %v1296_v51 }
 0x65b   : > { %v1298_v4 = vpop.xlane.xlu0 %1297 }
 0x65c   : > { %v1313_v0 = vmul.f32 0.037037037, %v1298_v4 }
 0x65d   : > { %v1300_v7 = vpop.xlane.xlu1 %1299 }
 0x65e   : > { %v1321_v5 = vadd.f32 1e-05, %v1313_v0  ;;  %v1314_v32 = vmul.f32 0.037037037, %v1300_v7 }
 0x65f   : > { %v1302_v13 = vpop.xlane.xlu0 %1301 }
 0x660   : > { %2450 = vrsqrt.f32 %v1321_v5  ;;  %v1322_v11 = vadd.f32 1e-05, %v1314_v32  ;;  %v1315_v9 = vmul.f32 0.037037037, %v1302_v13 }
 0x661   : > { %v1304_v12 = vpop.xlane.xlu1 %1303 }
 0x662   : > { %2452 = vrsqrt.f32 %v1322_v11  ;;  %v1323_v14 = vadd.f32 1e-05, %v1315_v9  ;;  %v1316_v15 = vmul.f32 0.037037037, %v1304_v12 }
 0x663   : > { %v1306_v16 = vpop.xlane.xlu0 %1305 }
 0x664   : > { %2454 = vrsqrt.f32 %v1323_v14  ;;  %v1324_v17 = vadd.f32 1e-05, %v1316_v15  ;;  %v1317_v18 = vmul.f32 0.037037037, %v1306_v16  ;;  %v2397_v14 = vld [vmem:[%s3148_s8 + $0x18] sm:$0xff]   ;;  %v2398_v15 = vld [vmem:[%s3148_s8 + $0x20] sm:$0xff]  }
 0x665   : > { %v1308_v19 = vpop.xlane.xlu1 %1307  ;;  %v2399_v16 = vld [vmem:[%s3148_s8 + $0x28] sm:$0xff]  }
 0x666   : > { %2456 = vrsqrt.f32 %v1324_v17  ;;  %v1325_v20 = vadd.f32 1e-05, %v1317_v18  ;;  %v1318_v21 = vmul.f32 0.037037037, %v1308_v19  ;;  %v2400_v17 = vld [vmem:[%s3148_s8 + $0x30] sm:$0xff]   ;;  %v2401_v18 = vld [vmem:[%s3148_s8 + $0x38] sm:$0xff]  }
 0x667   : > { %v1310_v22 = vpop.xlane.xlu0 %1309  ;;  %v2135_v19 = vld [vmem:[%s3147_s7] ss:$0 sm:$0xff] }
 0x668   : > { %2458 = vrsqrt.f32 %v1325_v20  ;;  %v1326_v23 = vadd.f32 1e-05, %v1318_v21  ;;  %v1319_v24 = vmul.f32 0.037037037, %v1310_v22 }
 0x669   : > { %v1312_v25 = vpop.xlane.xlu1 %1311 }
 0x66a   : > { %v2451_v27 = vpop.eup %2450  ;;  %2460 = vrsqrt.f32 %v1326_v23  ;;  %v1327_v29 = vadd.f32 1e-05, %v1319_v24  ;;  %v1320_v30 = vmul.f32 0.037037037, %v1312_v25 }
 0x66b   : > { %v1337_v52 = vmul.f32 %v2451_v27, %v2868_v42 }
 0x66c   : > { %v2453_v31 = vpop.eup %2452  ;;  %2462 = vrsqrt.f32 %v1327_v29  ;;  %v1328_v34 = vadd.f32 1e-05, %v1320_v30 }
 0x66d   : > { %v1338_v35 = vmul.f32 %v2453_v31, %v2875_v33  ;;  %v1351_v37 = vmul.f32 %v2133_v28, %v1337_v52 }
 0x66e   : > { %v2455_v38 = vpop.eup %2454  ;;  %2464 = vrsqrt.f32 %v1328_v34 }
 0x66f   : > { %v1339_v39 = vmul.f32 %v2455_v38, %v2882_v43  ;;  %v1352_v40 = vmul.f32 %v2133_v28, %v1338_v35  ;;  %v1365_v42 = vadd.f32 %v2134_v53, %v1351_v37 }
 0x670   : > { %v2457_v41 = vpop.eup %2456 }
 0x671   : > { %v1353_v44 = vmul.f32 %v2133_v28, %v1339_v39  ;;  %v1340_v59 = vmul.f32 %v2457_v41, %v2889_v36  ;;  %v1366_v46 = vadd.f32 %v2134_v53, %v1352_v40 }
 0x672   : > { %v2459_v47 = vpop.eup %2458 }
 0x673   : > { %v1354_v49 = vmul.f32 %v2133_v28, %v1340_v59  ;;  %v1373_v51 = vpack.c.bf16 %v1366_v46, %v1365_v42  ;;  %v1341_v33 = vmul.f32 %v2459_v47, %v2896_v58  ;;  %v1367_v56 = vadd.f32 %v2134_v53, %v1353_v44 }
 0x674   : > { %v2461_v55 = vpop.eup %2460 }
 0x675   : > { %2297 = vmatprep.mubr.bf16.mxu1 %v1373_v51  ;;  %v1368_v1 = vadd.f32 %v2134_v53, %v1354_v49  ;;  %v1342_v60 = vmul.f32 %v2461_v55, %v2903_v45  ;;  %v1355_v2 = vmul.f32 %v2133_v28, %v1341_v33  ;;  %v2394_v45 = vld [vmem:[%s3148_s8] sm:$0xff]  }
 0x676   : > { %v2463_v43 = vpop.eup %2462  ;;  %2305 = vmatprep.subr.bf16.mxu0 %v2394_v45 }
 0x677   : > { %v1374_v62 = vpack.c.bf16 %v1368_v1, %v1367_v56  ;;  %v1356_v3 = vmul.f32 %v2133_v28, %v1342_v60  ;;  %v1343_v4 = vmul.f32 %v2463_v43, %v2910_v48  ;;  %v1369_v0 = vadd.f32 %v2134_v53, %v1355_v2  ;;  %2306 = vmatpush3.bf16.msra.mxu0 %v2394_v45  ;;  %v2395_v48 = vld [vmem:[%s3148_s8 + $0x8] sm:$0xff]  }
 0x678   : > { %v2465_v36 = vpop.eup %2464  ;;  %2307 = vmatprep.subr.bf16.mxu0 %v2395_v48 }
 0x679   : > { %2298 = vmatmul.mubr.bf16.vlgmr.msra.gmra.mrb[16].mxu1 %v1374_v62  ;;  %v1370_v7 = vadd.f32 %v2134_v53, %v1356_v3  ;;  %v1344_v5 = vmul.f32 %v2465_v36, %v2916_v50  ;;  %v1357_v32 = vmul.f32 %v2133_v28, %v1343_v4  ;;  %v2396_v50 = vld [vmem:[%s3148_s8 + $0x10] sm:$0xff]  }
 0x67b   : > { %v1375_v58 = vpack.c.bf16 %v1370_v7, %v1369_v0  ;;  %v1358_v13 = vmul.f32 %v2133_v28, %v1344_v5  ;;  %v1371_v11 = vadd.f32 %v2134_v53, %v1357_v32  ;;  %2308 = vmatpush3.bf16.msra.mxu0 %v2395_v48 }
 0x67c   : > { %2309 = vmatprep.subr.bf16.mxu0 %v2396_v50 }
 0x67d   : > { %2301 = vmatprep.mubr.bf16.mxu1 %v1375_v58  ;;  %v1372_v9 = vadd.f32 %v2134_v53, %v1358_v13 }
 0x67f   : > { %v1376_v12 = vpack.c.bf16 %v1372_v9, %v1371_v11  ;;  %2310 = vmatpush3.bf16.msra.mxu0 %v2396_v50 }
 0x680   : > { %2311 = vmatprep.subr.bf16.mxu0 %v2397_v14 }
 0x681   : > { %2302 = vmatmul.mubr.bf16.gmra.mrb[20].mxu1 %v1376_v12 }
 0x683   : > { %2312 = vmatpush3.bf16.msra.mxu0 %v2397_v14 }
 0x684   : > { %2313 = vmatprep.subr.bf16.mxu0 %v2398_v15 }
 0x687   : > { %2314 = vmatpush3.bf16.msra.mxu0 %v2398_v15 }
 0x688   : > { %2315 = vmatprep.subr.bf16.mxu0 %v2399_v16 }
 0x68b   : > { %2316 = vmatpush3.bf16.msra.mxu0 %v2399_v16 }
 0x68c   : > { %2317 = vmatprep.subr.bf16.mxu0 %v2400_v17 }
 0x68f   : > { %2318 = vmatpush3.bf16.msra.mxu0 %v2400_v17 }
 0x690   : > { %2319 = vmatprep.subr.bf16.mxu0 %v2401_v18 }
 0x693   : > { %2320 = vmatpush3.bf16.msra.mxu0 %v2401_v18 }
 0x74c   : > { %v2299_v20 = vpop.f32.mrb[16].mxu1 }
 0x74d   : > { %v1491_v21 = vadd.f32 %v2299_v20, %v2135_v19  ;;  %v1482_v22 = vpop.f32.mrb[17].mxu1 }
 0x74e   : > { %v2982_v23 = vadd.f32 %v2135_v19, %v1482_v22  ;;  %v2300_v24 = vpop.f32.mrb[18].mxu1 }
 0x74f   : > { %v2984_v25 = vmul.f32 0.70710677, %v1491_v21  ;;  %v2986_v27 = vadd.f32 %v2300_v24, %v2135_v19  ;;  %v1485_v28 = vpop.f32.mrb[19].mxu1  ;;  %v3026_v11 = vmul.f32 0.5, %v1491_v21 }
 0x750   : > { %v2989_v29 = vmul.f32 0.70710677, %v2982_v23  ;;  %v2991_v30 = vadd.f32 %v2135_v19, %v1485_v28 }
 0x751   : > { %v1531_v52 = vand.u32 2147483647, %v2984_v25  ;;  %v2995_v31 = vmul.f32 0.70710677, %v2986_v27  ;;  %vm1691_vm2 = vcmp.ge.f32.partialorder %v2984_v25, 0.0 }
 0x752   : > { %v1529_v34 = vand.u32 2147483647, %v2989_v29  ;;  %v2999_v35 = vmul.f32 0.70710677, %v2991_v30  ;;  %vm1689_vm3 = vcmp.ge.f32.partialorder %v2989_v29, 0.0 }
 0x753   : > { %v1539_v37 = vmul.f32 0.3275911, %v1531_v52  ;;  %v1532_v38 = vand.u32 2147483647, %v2995_v31  ;;  %v1643_v43 = vsub.f32 0.0, %v1531_v52  ;;  %vm1692_vm4 = vcmp.ge.f32.partialorder %v2995_v31, 0.0 }
 0x754   : > { %v1537_v53 = vmul.f32 0.3275911, %v1529_v34  ;;  %v1530_v39 = vand.u32 2147483647, %v2999_v35  ;;  %v2303_v44 = vpop.f32.mrb[20].mxu1  ;;  %v1641_v4 = vsub.f32 0.0, %v1529_v34 }
 0x755   : > { %v1547_v40 = vadd.f32 1.0, %v1539_v37  ;;  %v1540_v41 = vmul.f32 0.3275911, %v1532_v38  ;;  %v1498_v46 = vpop.f32.mrb[21].mxu1  ;;  %v3003_v55 = vadd.f32 %v2303_v44, %v2135_v19  ;;  %v1644_v0 = vsub.f32 0.0, %v1532_v38 }
 0x756   : > { %v1545_v59 = vadd.f32 1.0, %v1537_v53  ;;  %v1538_v42 = vmul.f32 0.3275911, %v1530_v39  ;;  %v2304_v49 = vpop.f32.mrb[22].mxu1  ;;  %v3005_v56 = vadd.f32 %v2135_v19, %v1498_v46  ;;  %v1642_v7 = vsub.f32 0.0, %v1530_v39 }
 0x757   : > { %2466 = vrcp.f32 %v1547_v40  ;;  %v1548_v47 = vadd.f32 1.0, %v1540_v41  ;;  %v1501_v51 = vpop.f32.mrb[23].mxu1  ;;  %v3007_v1 = vadd.f32 %v2304_v49, %v2135_v19  ;;  %v3010_v60 = vmul.f32 0.70710677, %v3003_v55 }
 0x758   : > { %2468 = vrcp.f32 %v1545_v59  ;;  %v1546_v33 = vadd.f32 1.0, %v1538_v42  ;;  %v3012_v2 = vadd.f32 %v2135_v19, %v1501_v51  ;;  %v3015_v62 = vmul.f32 0.70710677, %v3005_v56 }
 0x759   : > { %2470 = vrcp.f32 %v1548_v47  ;;  %v3018_v3 = vmul.f32 0.70710677, %v3007_v1  ;;  %v1535_v36 = vand.u32 2147483647, %v3010_v60  ;;  %v1651_v9 = vmul.f32 %v1643_v43, %v1531_v52 }
 0x75a   : > { %2472 = vrcp.f32 %v1546_v33  ;;  %v1533_v5 = vand.u32 2147483647, %v3015_v62  ;;  %v3024_v13 = vmul.f32 0.70710677, %v3012_v2  ;;  %v1649_v50 = vmul.f32 %v1641_v4, %v1529_v34 }
 0x75b   : > { %v1536_v32 = vand.u32 2147483647, %v3018_v3  ;;  %v1543_v58 = vmul.f32 0.3275911, %v1535_v36  ;;  %v1647_v15 = vsub.f32 0.0, %v1535_v36  ;;  %v1652_v19 = vmul.f32 %v1644_v0, %v1532_v38 }
 0x75c   : > { %v1541_v12 = vmul.f32 0.3275911, %v1533_v5  ;;  %v1534_v16 = vand.u32 2147483647, %v3024_v13  ;;  %v1650_v20 = vmul.f32 %v1642_v7, %v1530_v39  ;;  %v1645_v24 = vsub.f32 0.0, %v1533_v5 }
 0x75d   : > { %v1544_v45 = vmul.f32 0.3275911, %v1536_v32  ;;  %v1551_v14 = vadd.f32 1.0, %v1543_v58  ;;  %v1661_v37 = vmul.f32 1.442695, %v1651_v9  ;;  %v1655_v44 = vmul.f32 %v1647_v15, %v1535_v36 }
 0x75e   : > { %v1549_v22 = vadd.f32 1.0, %v1541_v12  ;;  %v1542_v34 = vmul.f32 0.3275911, %v1534_v16  ;;  %v1657_v41 = vmul.f32 1.442695, %v1649_v50  ;;  %v1648_v59 = vsub.f32 0.0, %v1536_v32 }
 0x75f   : > { %2474 = vrcp.f32 %v1551_v14  ;;  %v1552_v28 = vadd.f32 1.0, %v1544_v45  ;;  %v1663_v39 = vmul.f32 1.442695, %v1652_v19  ;;  %v1659_v51 = vmul.f32 1.442695, %v1650_v20 }
 0x760   : > { %2476 = vrcp.f32 %v1549_v22  ;;  %v1550_v46 = vadd.f32 1.0, %v1542_v34  ;;  %v1653_v33 = vmul.f32 %v1645_v24, %v1533_v5  ;;  %v1669_v7 = vmul.f32 1.442695, %v1655_v44 }
 0x761   : > { %v3028_v48 = vpop.eup %2466  ;;  %2478 = vrcp.f32 %v1552_v28  ;;  %v1656_v58 = vmul.f32 %v1648_v59, %v1536_v32  ;;  %v1646_v14 = vsub.f32 0.0, %v1534_v16  ;;  %v3050_v32 = vmul.f32 0.5, %v2982_v23 }
 0x762   : > { %v3031_v17 = vpop.eup %2468  ;;  %v1571_v18 = vmul.f32 1.0614054, %v3028_v48  ;;  %2480 = vpow2.f32 %v1661_v37  ;;  %v1665_v5 = vmul.f32 1.442695, %v1653_v33  ;;  %vm1690_vm5 = vcmp.ge.f32.partialorder %v2999_v35, 0.0 }
 0x763   : > { %v1569_v21 = vmul.f32 1.0614054, %v3031_v17  ;;  %v3035_v53 = vpop.eup %2470  ;;  %2482 = vrcp.f32 %v1550_v46  ;;  %v1654_v44 = vmul.f32 %v1646_v14, %v1534_v16  ;;  %vm1695_vm6 = vcmp.ge.f32.partialorder %v3010_v60, 0.0 }
 0x764   : > { %v2146_v52 = vadd.f32 -1.4531521, %v1571_v18  ;;  %v1572_v38 = vmul.f32 1.0614054, %v3035_v53  ;;  %v3039_v47 = vpop.eup %2472  ;;  %2484 = vpow2.f32 %v1657_v41  ;;  %vm1696_vm7 = vcmp.ge.f32.partialorder %v3018_v3, 0.0 }
 0x765   : > { %v2144_v40 = vadd.f32 -1.4531521, %v1569_v21  ;;  %v1570_v0 = vmul.f32 1.0614054, %v3039_v47  ;;  %2486 = vpow2.f32 %v1663_v39  ;;  %v1671_v21 = vmul.f32 1.442695, %v1656_v58 }
 0x766   : > { %v1587_v42 = vmul.f32 %v3028_v48, %v2146_v52  ;;  %v2147_v4 = vadd.f32 -1.4531521, %v1572_v38  ;;  %2488 = vpow2.f32 %v1659_v51  ;;  %vm1693_vm8 = vcmp.ge.f32.partialorder %v3015_v62, 0.0 }
 0x767   : > { %v1585_v49 = vmul.f32 %v3031_v17, %v2144_v40  ;;  %v2145_v45 = vadd.f32 -1.4531521, %v1570_v0  ;;  %2490 = vpow2.f32 %v1669_v7  ;;  %vm1694_vm9 = vcmp.ge.f32.partialorder %v3024_v13, 0.0 }
 0x768   : > { %v1595_v43 = vadd.f32 1.4214138, %v1587_v42  ;;  %v1588_v12 = vmul.f32 %v3035_v53, %v2147_v4  ;;  %2492 = vpow2.f32 %v1665_v5 }
 0x769   : > { %v1593_v36 = vadd.f32 1.4214138, %v1585_v49  ;;  %v1586_v19 = vmul.f32 %v3039_v47, %v2145_v45  ;;  %v3047_v20 = vpop.eup %2474  ;;  %v3064_v49 = vmul.f32 0.5, %v2986_v27  ;;  %2494 = vpow2.f32 %v1671_v21 }
 0x76a   : > { %v1603_v9 = vmul.f32 %v3028_v48, %v1595_v43  ;;  %v1596_v18 = vadd.f32 1.4214138, %v1588_v12  ;;  %v3052_v24 = vpop.eup %2476  ;;  %v1575_v34 = vmul.f32 1.0614054, %v3047_v20 }
 0x76b   : > { %v1601_v50 = vmul.f32 %v3031_v17, %v1593_v36  ;;  %v1594_v37 = vadd.f32 1.4214138, %v1586_v19  ;;  %v1573_v41 = vmul.f32 1.0614054, %v3052_v24  ;;  %v3060_v39 = vpop.eup %2478 }
 0x76c   : > { %v2154_v15 = vadd.f32 -0.28449672, %v1603_v9  ;;  %v1604_v52 = vmul.f32 %v3035_v53, %v1596_v18  ;;  %v2150_v38 = vadd.f32 -1.4531521, %v1575_v34  ;;  %v2481_v33 = vpop.eup %2480  ;;  %v1576_v27 = vmul.f32 1.0614054, %v3060_v39 }
 0x76d   : > { %v2152_v22 = vadd.f32 -0.28449672, %v1601_v50  ;;  %v1602_v42 = vmul.f32 %v3039_v47, %v1594_v37  ;;  %v2148_v51 = vadd.f32 -1.4531521, %v1573_v41  ;;  %v3070_v36 = vpop.eup %2482  ;;  %v1667_v9 = vmul.f32 1.442695, %v1654_v44 }
 0x76e   : > { %v1619_v28 = vmul.f32 %v3028_v48, %v2154_v15  ;;  %v2155_v59 = vadd.f32 -0.28449672, %v1604_v52  ;;  %v1591_v0 = vmul.f32 %v3047_v20, %v2150_v38  ;;  %v2485_v12 = vpop.eup %2484  ;;  %v2151_v19 = vadd.f32 -1.4531521, %v1576_v27 }
 0x76f   : > { %v1617_v40 = vmul.f32 %v3031_v17, %v2152_v22  ;;  %v2153_v4 = vadd.f32 -0.28449672, %v1602_v42  ;;  %v1589_v58 = vmul.f32 %v3052_v24, %v2148_v51  ;;  %v2487_v14 = vpop.eup %2486  ;;  %v1574_v22 = vmul.f32 1.0614054, %v3070_v36 }
 0x770   : > { %v1627_v23 = vadd.f32 0.2548296, %v1619_v28  ;;  %v1620_v16 = vmul.f32 %v3035_v53, %v2155_v59  ;;  %v1599_v5 = vadd.f32 1.4214138, %v1591_v0  ;;  %v1592_v44 = vmul.f32 %v3060_v39, %v2151_v19 }
 0x771   : > { %v1625_v46 = vadd.f32 0.2548296, %v1617_v40  ;;  %v1597_v18 = vadd.f32 1.4214138, %v1589_v58  ;;  %2496 = vpow2.f32 %v1667_v9 }
 0x772   : > { %v1635_v43 = vmul.f32 %v3028_v48, %v1627_v23  ;;  %v1628_v50 = vadd.f32 0.2548296, %v1620_v16  ;;  %v1618_v48 = vmul.f32 %v3039_v47, %v2153_v4  ;;  %v1607_v37 = vmul.f32 %v3047_v20, %v1599_v5 }
 0x773   : > { %v1633_v7 = vmul.f32 %v3031_v17, %v1625_v46  ;;  %v2489_v17 = vpop.eup %2488  ;;  %v1605_v41 = vmul.f32 %v3052_v24, %v1597_v18  ;;  %v2149_v23 = vadd.f32 -1.4531521, %v1574_v22  ;;  %v1600_v16 = vadd.f32 1.4214138, %v1592_v44 }
 0x774   : > { %v1675_v45 = vmul.f32 %v2481_v33, %v1635_v43  ;;  %v1636_v28 = vmul.f32 %v3035_v53, %v1628_v50  ;;  %v1626_v52 = vadd.f32 0.2548296, %v1618_v48  ;;  %v2491_v34 = vpop.eup %2490  ;;  %v2158_v46 = vadd.f32 -0.28449672, %v1607_v37 }
 0x775   : > { %v1673_v15 = vmul.f32 %v2485_v12, %v1633_v7  ;;  %v2493_v51 = vpop.eup %2492  ;;  %v2156_v43 = vadd.f32 -0.28449672, %v1605_v41  ;;  %v1590_v53 = vmul.f32 %v3070_v36, %v2149_v23  ;;  %v1514_v41 = vmul.f32 0.5, %v2991_v30 }
 0x776   : > { %v1683_v21 = vsub.f32 1.0, %v1675_v45  ;;  %v1676_v42 = vmul.f32 %v2487_v14, %v1636_v28  ;;  %v1634_v38 = vmul.f32 %v3039_v47, %v1626_v52  ;;  %v1623_v58 = vmul.f32 %v3047_v20, %v2158_v46  ;;  %v2495_v27 = vpop.eup %2494 }
 0x777   : > { %v1681_v40 = vsub.f32 1.0, %v1673_v15  ;;  %v1621_v47 = vmul.f32 %v3052_v24, %v2156_v43  ;;  %v1608_v45 = vmul.f32 %v3060_v39, %v1600_v16  ;;  %v1598_v18 = vadd.f32 1.4214138, %v1590_v53 }
 0x778   : > { %v1699_v59 = vsub.f32 0.0, %v1683_v21  ;;  %v1684_v0 = vsub.f32 1.0, %v1676_v42  ;;  %v1674_v7 = vmul.f32 %v2489_v17, %v1634_v38  ;;  %v1631_v14 = vadd.f32 0.2548296, %v1623_v58 }
 0x779   : > { %v1697_v33 = vsub.f32 0.0, %v1681_v40  ;;  %v1629_v25 = vadd.f32 0.2548296, %v1621_v47  ;;  %v2159_v15 = vadd.f32 -0.28449672, %v1608_v45  ;;  %v1606_v37 = vmul.f32 %v3070_v36, %v1598_v18 }
 0x77a   : > { %v1707_v4 = vsel %vm1691_vm2, %v1683_v21, %v1699_v59  ;;  %v1700_v48 = vsub.f32 0.0, %v1684_v0  ;;  %v1682_v5 = vsub.f32 1.0, %v1674_v7  ;;  %v1639_v17 = vmul.f32 %v3047_v20, %v1631_v14 }
 0x77b   : > { %v1705_v12 = vsel %vm1689_vm3, %v1681_v40, %v1697_v33  ;;  %v1715_v50 = vadd.f32 1.0, %v1707_v4  ;;  %v1637_v28 = vmul.f32 %v3052_v24, %v1629_v25  ;;  %v1624_v52 = vmul.f32 %v3060_v39, %v2159_v15 }
 0x77c   : > { %v1713_v19 = vadd.f32 1.0, %v1705_v12  ;;  %v1708_v22 = vsel %vm1692_vm4, %v1684_v0, %v1700_v48  ;;  %v1698_v29 = vsub.f32 0.0, %v1682_v5  ;;  %v1679_v44 = vmul.f32 %v2491_v34, %v1639_v17  ;;  %v2497_v34 = vpop.eup %2496 }
 0x77d   : > { %v1716_v21 = vadd.f32 1.0, %v1708_v22  ;;  %v1723_v40 = vmul.f32 %v1715_v50, %v3026_v11  ;;  %v1677_v59 = vmul.f32 %v2493_v51, %v1637_v28  ;;  %v1632_v20 = vadd.f32 0.2548296, %v1624_v52 }
 0x77e   : > { %v1706_v9 = vsel %vm1690_vm5, %v1682_v5, %v1698_v29  ;;  %v1687_v42 = vsub.f32 1.0, %v1679_v44  ;;  %v2157_v38 = vadd.f32 -0.28449672, %v1606_v37  ;;  %v1721_v24 = vmul.f32 %v1713_v19, %v3050_v32 }
 0x77f   : > { %v1724_v31 = vmul.f32 %v1716_v21, %v3064_v49  ;;  %v1714_v23 = vadd.f32 1.0, %v1706_v9  ;;  %v1640_v43 = vmul.f32 %v3060_v39, %v1632_v20  ;;  %v1685_v16 = vsub.f32 1.0, %v1677_v59 }
 0x780   : > { %v1703_v11 = vsub.f32 0.0, %v1687_v42  ;;  %v1622_v30 = vmul.f32 %v3070_v36, %v2157_v38  ;;  %v1519_v12 = vmul.f32 0.5, %v3003_v55  ;;  %v1520_v47 = vmul.f32 0.5, %v3007_v1  ;;  %v2160_v1 = vld [vmem:[%s3149_s9] ss:$0 sm:$0xff] }
 0x781   : > { %v1730_v46 = vpack.c.bf16 %v1724_v31, %v1723_v40  ;;  %v1722_v33 = vmul.f32 %v1714_v23, %v1514_v41  ;;  %v1680_v35 = vmul.f32 %v2495_v27, %v1640_v43  ;;  %v1701_v0 = vsub.f32 0.0, %v1685_v16 }
 0x782   : > { %v1630_v49 = vadd.f32 0.2548296, %v1622_v30  ;;  %v1711_v51 = vsel %vm1695_vm6, %v1687_v42, %v1703_v11  ;;  %v1517_v15 = vmul.f32 0.5, %v3005_v56  ;;  %v1518_v55 = vmul.f32 0.5, %v3012_v2 }
 0x783   : > { %v1729_v53 = vpack.c.bf16 %v1722_v33, %v1721_v24  ;;  %v1688_v4 = vsub.f32 1.0, %v1680_v35  ;;  %v1719_v58 = vadd.f32 1.0, %v1711_v51  ;;  %v1709_v60 = vsel %vm1693_vm8, %v1685_v16, %v1701_v0 }
 0x784   : > { %v1638_v32 = vmul.f32 %v3070_v36, %v1630_v49  ;;  %v1717_v36 = vadd.f32 1.0, %v1709_v60 }
 0x785   : > { %2321 = vmatprep.mubr.bf16.mxu0 %v1729_v53  ;;  %v1704_v7 = vsub.f32 0.0, %v1688_v4  ;;  %v1727_v48 = vmul.f32 %v1719_v58, %v1519_v12 }
 0x786   : > { %2322 = vmatmul.mubr.bf16.vlgmr.msra.gmra.mrb[24].mxu0 %v1730_v46  ;;  %v1678_v39 = vmul.f32 %v2497_v34, %v1638_v32  ;;  %v1725_v18 = vmul.f32 %v1717_v36, %v1517_v15 }
 0x787   : > { %v1712_v27 = vsel %vm1696_vm7, %v1688_v4, %v1704_v7 }
 0x788   : > { %v1720_v45 = vadd.f32 1.0, %v1712_v27  ;;  %v1686_v50 = vsub.f32 1.0, %v1678_v39 }
 0x78a   : > { %v1728_v5 = vmul.f32 %v1720_v45, %v1520_v47  ;;  %v1702_v14 = vsub.f32 0.0, %v1686_v50 }
 0x78c   : > { %v1710_v25 = vsel %vm1694_vm9, %v1686_v50, %v1702_v14  ;;  %v1732_v3 = vpack.c.bf16 %v1728_v5, %v1727_v48 }
 0x78d   : > { %v1718_v62 = vadd.f32 1.0, %v1710_v25 }
 0x78f   : > { %v1726_v19 = vmul.f32 %v1718_v62, %v1518_v55 }
 0x791   : > { %v1731_v22 = vpack.c.bf16 %v1726_v19, %v1725_v18 }
 0x793   : > { %2325 = vmatprep.mubr.bf16.mxu0 %v1731_v22 }
 0x794   : > { %2326 = vmatmul.mubr.bf16.gmra.mrb[28].mxu0 %v1732_v3 }
 0x859   : > { %v2323_v29 = vpop.f32.mrb[24].mxu0 }
 0x85a   : > { %v1847_v17 = vadd.f32 %v2323_v29, %v2160_v1  ;;  %v1838_v21 = vpop.f32.mrb[25].mxu0 }
 0x85b   : > { %v1839_v56 = vadd.f32 %v2160_v1, %v1838_v21  ;;  %v2324_v2 = vpop.f32.mrb[26].mxu0 }
 0x85c   : > { %v1871_v13 = vadd.f32 %v1847_v17, %v2817_v26  ;;  %v1850_v28 = vadd.f32 %v2324_v2, %v2160_v1  ;;  %v1841_v52 = vpop.f32.mrb[27].mxu0 }
 0x85d   : > { %v1869_v37 = vadd.f32 %v1839_v56, %v2814_v54  ;;  %v1842_v40 = vadd.f32 %v2160_v1, %v1841_v52 }
 0x85e   : > { %1898 = vst [vmem:[%s515_s25 + $0x10] sm:$0xff] %v1871_v13  ;;  %v1872_v41 = vadd.f32 %v1850_v28, %v2826_v61 }
 0x85f   : > { %1896 = vst [vmem:[%s515_s25] sm:$0xff] %v1869_v37  ;;  %v1870_v9 = vadd.f32 %v1842_v40, %v2820_v57 }
 0x860   : > { %1899 = vst [vmem:[%s515_s25 + $0x18] sm:$0xff] %v1872_v41 }
 0x861   : > { %1897 = vst [vmem:[%s515_s25 + $0x8] sm:$0xff] %v1870_v9 }
 0x867   : > { %v2327_v44 = vpop.f32.mrb[28].mxu0 }
 0x868   : > { %v1863_v31 = vadd.f32 %v2327_v44, %v2160_v1  ;;  %v1854_v23 = vpop.f32.mrb[29].mxu0 }
 0x869   : > { %v1855_v59 = vadd.f32 %v2160_v1, %v1854_v23  ;;  %v2328_v20 = vpop.f32.mrb[30].mxu0 }
 0x86a   : > { %v1875_v26 = vadd.f32 %v1863_v31, %v2841_v6  ;;  %v1866_v42 = vadd.f32 %v2328_v20, %v2160_v1  ;;  %v1857_v38 = vpop.f32.mrb[31].mxu0 }
 0x86b   : > { %v1873_v54 = vadd.f32 %v1855_v59, %v2835_v63  ;;  %v1858_v24 = vadd.f32 %v2160_v1, %v1857_v38 }
 0x86c   : > { %1902 = vst [vmem:[%s515_s25 + $0x30] sm:$0xff] %v1875_v26  ;;  %v1876_v61 = vadd.f32 %v1866_v42, %v2850_v8 }
 0x86d   : > { %1900 = vst [vmem:[%s515_s25 + $0x20] sm:$0xff] %v1873_v54  ;;  %v1874_v57 = vadd.f32 %v1858_v24, %v2844_v10 }
 0x86e   : > { %1903 = vst [vmem:[%s515_s25 + $0x38] sm:$0xff] %v1876_v61 }
 0x86f   : > { %1901 = vst [vmem:[%s515_s25 + $0x28] sm:$0xff] %v1874_v57 }
 0x870 PF: > { %s20_s15 = sadd.s32 1, %s2520_s15   ;;  %s3151_s13 = smov %s2516_s14 }
 0x871   : > { %p17_p5 = scmp.ge.s32.totalorder %s20_s15, 4   ;;  %s3152_s14 = smov %s3154_s16 }
 0x873   :  { %19 = sbr.rel (!%p17_p5) target bundleno = 2 (0x2), region = 125 }

// kernel: fwd.7
= control target key start
LH: loop header
LB: loop body
LE: loop exit
PB: predicated region body
PF: predicated region fallthrough
CT: control target
= control target key end

     0   :  { %s434_s1 = inlined_call_operand.vmem [shape: bf16[256,128], index: 1, kind: input, shape index: {}]   ;;  %s435_s0 = inlined_call_operand.vmem [shape: f32[32,256], index: 0, kind: input, shape index: {}]   ;;  %s436_s2 = inlined_call_operand.vmem [shape: f32[1,128], index: 2, kind: input, shape index: {}]   ;;  %s437_s3 = inlined_call_operand.vmem [shape: f32[32,128], index: 3, kind: output, shape index: {}]  }
   0x1   :  { %v311_v0 = vld [vmem:[%s434_s1 + $0x40] sm:$0xff]   ;;  %v313_v2 = vld [vmem:[%s434_s1 + $0x48] sm:$0xff]   ;;  %v315_v4 = vld [vmem:[%s434_s1 + $0x50] sm:$0xff]  }
   0x2   :  { %v312_v1 = vld [vmem:[%s434_s1] sm:$0xff]   ;;  %267 = vmatprep.subr.bf16.mxu0 %v311_v0  ;;  %295 = vmatprep.subr.bf16.mxu1 %v311_v0  ;;  %v314_v3 = vld [vmem:[%s434_s1 + $0x8] sm:$0xff]   ;;  %v316_v5 = vld [vmem:[%s434_s1 + $0x10] sm:$0xff]  }
   0x3   :  { %268 = vmatpush3.bf16.msra.mxu0 %v312_v1  ;;  %303 = vmatpush3.bf16.msra.mxu1 %v312_v1  ;;  %v317_v6 = vld [vmem:[%s434_s1 + $0x58] sm:$0xff]   ;;  %v319_v8 = vld [vmem:[%s434_s1 + $0x60] sm:$0xff]   ;;  %v321_v10 = vld [vmem:[%s434_s1 + $0x68] sm:$0xff]  }
   0x4   :  { %269 = vmatprep.subr.bf16.mxu0 %v313_v2  ;;  %296 = vmatprep.subr.bf16.mxu1 %v313_v2  ;;  %v318_v7 = vld [vmem:[%s434_s1 + $0x18] sm:$0xff]   ;;  %v320_v9 = vld [vmem:[%s434_s1 + $0x20] sm:$0xff]   ;;  %v28_v11 = vld [vmem:[%s435_s0 + $0x8] sm:$0xff] }
   0x5   :  { %v30_v12 = vld [vmem:[%s435_s0 + $0x18] sm:$0xff]  ;;  %v32_v13 = vld [vmem:[%s435_s0 + $0x28] sm:$0xff]  ;;  %v323_v18 = vld [vmem:[%s434_s1 + $0x70] sm:$0xff]  }
   0x6   :  { %v36_v14 = vpack.c.bf16 %v30_v12, %v28_v11  ;;  %v34_v15 = vld [vmem:[%s435_s0 + $0x38] sm:$0xff]  ;;  %v322_v17 = vld [vmem:[%s434_s1 + $0x28] sm:$0xff]   ;;  %v324_v19 = vld [vmem:[%s434_s1 + $0x30] sm:$0xff]  }
   0x7   :  { %270 = vmatpush3.bf16.msra.mxu0 %v314_v3  ;;  %304 = vmatpush3.bf16.msra.mxu1 %v314_v3  ;;  %v38_v16 = vpack.c.bf16 %v34_v15, %v32_v13  ;;  %v325_v20 = vld [vmem:[%s434_s1 + $0x78] sm:$0xff]   ;;  %v27_v22 = vld [vmem:[%s435_s0] sm:$0xff]  ;;  %v29_v23 = vld [vmem:[%s435_s0 + $0x10] sm:$0xff] }
   0x8   :  { %271 = vmatprep.subr.bf16.mxu0 %v315_v4  ;;  %297 = vmatprep.subr.bf16.mxu1 %v315_v4  ;;  %v326_v21 = vld [vmem:[%s434_s1 + $0x38] sm:$0xff]   ;;  %v31_v24 = vld [vmem:[%s435_s0 + $0x20] sm:$0xff]  ;;  %v33_v25 = vld [vmem:[%s435_s0 + $0x30] sm:$0xff]  ;;  %v35_v26 = vpack.c.bf16 %v29_v23, %v27_v22 }
   0x9   :  { %199 = vmatprep.mubr.bf16.mxu0 %v36_v14  ;;  %207 = vmatprep.mubr.bf16.mxu1 %v38_v16  ;;  %v37_v27 = vpack.c.bf16 %v33_v25, %v31_v24  ;;  %v266_v31 = vld [vmem:[%s436_s2] ss:$0 sm:$0xff] }
   0xb   :  { %272 = vmatpush3.bf16.msra.mxu0 %v316_v5  ;;  %305 = vmatpush3.bf16.msra.mxu1 %v316_v5 }
   0xc   :  { %273 = vmatprep.subr.bf16.mxu0 %v317_v6  ;;  %298 = vmatprep.subr.bf16.mxu1 %v317_v6 }
   0xf   :  { %274 = vmatpush3.bf16.msra.mxu0 %v318_v7  ;;  %306 = vmatpush3.bf16.msra.mxu1 %v318_v7 }
  0x10   :  { %275 = vmatprep.subr.bf16.mxu0 %v319_v8  ;;  %299 = vmatprep.subr.bf16.mxu1 %v319_v8 }
  0x13   :  { %276 = vmatpush3.bf16.msra.mxu0 %v320_v9  ;;  %307 = vmatpush3.bf16.msra.mxu1 %v320_v9 }
  0x14   :  { %277 = vmatprep.subr.bf16.mxu0 %v321_v10  ;;  %300 = vmatprep.subr.bf16.mxu1 %v321_v10 }
  0x17   :  { %278 = vmatpush3.bf16.msra.mxu0 %v322_v17  ;;  %308 = vmatpush3.bf16.msra.mxu1 %v322_v17 }
  0x18   :  { %279 = vmatprep.subr.bf16.mxu0 %v323_v18  ;;  %301 = vmatprep.subr.bf16.mxu1 %v323_v18 }
  0x1b   :  { %280 = vmatpush3.bf16.msra.mxu0 %v324_v19  ;;  %309 = vmatpush3.bf16.msra.mxu1 %v324_v19 }
  0x1c   :  { %281 = vmatprep.subr.bf16.mxu0 %v325_v20  ;;  %302 = vmatprep.subr.bf16.mxu1 %v325_v20 }
  0x1f   :  { %282 = vmatpush3.bf16.msra.mxu0 %v326_v21  ;;  %310 = vmatpush3.bf16.msra.mxu1 %v326_v21 }
  0x22   :  { %200 = vmatmul.mubr.bf16.vlgmr.msra.gmra.mrb[0].mxu0 %v35_v26  ;;  %208 = vmatmul.mubr.bf16.vlgmr.msra.gmra.mrb[0].mxu1 %v37_v27 }
  0xf5   :  { %v283_v28 = vpop.f32.mrb[0].mxu0  ;;  %v289_v29 = vpop.f32.mrb[0].mxu1 }
  0xf6   :  { %v284_v30 = vpop.f32.mrb[1].mxu0  ;;  %v290_v32 = vpop.f32.mrb[1].mxu1 }
  0xf7   :  { %v285_v33 = vadd.f32 %v284_v30, %v283_v28  ;;  %v291_v34 = vadd.f32 %v290_v32, %v289_v29  ;;  %v286_v35 = vpop.f32.mrb[2].mxu0  ;;  %v292_v36 = vpop.f32.mrb[2].mxu1 }
  0xf8   :  { %v287_v37 = vpop.f32.mrb[3].mxu0  ;;  %v293_v38 = vpop.f32.mrb[3].mxu1 }
  0xf9   :  { %v238_v39 = vadd.f32 %v285_v33, %v266_v31  ;;  %v240_v40 = vadd.f32 %v291_v34, %v266_v31  ;;  %v288_v41 = vadd.f32 %v287_v37, %v286_v35  ;;  %v294_v42 = vadd.f32 %v293_v38, %v292_v36 }
  0xfb   :  { %242 = vst [vmem:[%s437_s3] sm:$0xff] %v238_v39  ;;  %244 = vst [vmem:[%s437_s3 + $0x10] sm:$0xff] %v240_v40  ;;  %v239_v43 = vadd.f32 %v288_v41, %v266_v31  ;;  %v241_v44 = vadd.f32 %v294_v42, %v266_v31 }
  0xfd   :  { %243 = vst [vmem:[%s437_s3 + $0x8] sm:$0xff] %v239_v43  ;;  %245 = vst [vmem:[%s437_s3 + $0x18] sm:$0xff] %v241_v44 }

// kernel: fwd.6
= control target key start
LH: loop header
LB: loop body
LE: loop exit
PB: predicated region body
PF: predicated region fallthrough
CT: control target
= control target key end

     0   :  { %s2920_s13 = smov 0   ;;  %s2922_s14 = smov 0   ;;  %s3597_s0 = inlined_call_operand.vmem [shape: f32[2,16,256], index: 0, kind: input, shape index: {}]   ;;  %s3598_s1 = inlined_call_operand.vmem [shape: f32[1,1,256], index: 1, kind: input, shape index: {}, may-alias: {1,4}]   ;;  %s3599_s2 = inlined_call_operand.vmem [shape: f32[1,1,256], index: 2, kind: input, shape index: {}, may-alias: {2,5,9}]   ;;  %s3600_s3 = inlined_call_operand.vmem [shape: bf16[1,256,768], index: 3, kind: input, shape index: {}]   ;;  %s3601_s4 = inlined_call_operand.vmem [shape: f32[1,1,256], index: 4, kind: input, shape index: {}, may-alias: {1,4}]   ;;  %s3602_s5 = inlined_call_operand.vmem [shape: f32[1,1,256], index: 5, kind: input, shape index: {}, may-alias: {2,5,9}]   ;;  %s3603_s6 = inlined_call_operand.vmem [shape: bf16[1,256,256], index: 6, kind: input, shape index: {}]   ;;  %s3604_s7 = inlined_call_operand.vmem [shape: f32[1,1,256], index: 7, kind: input, shape index: {}]   ;;  %s3605_s8 = inlined_call_operand.vmem [shape: bf16[1,256,256], index: 8, kind: input, shape index: {}]   ;;  %s3606_s9 = inlined_call_operand.vmem [shape: f32[1,1,256], index: 9, kind: input, shape index: {}, may-alias: {2,5,9}]   ;;  %s3607_s10 = inlined_call_operand.vmem [shape: f32[2,16,256], index: 10, kind: output, shape index: {}]  }
   0x1   :  { %s2924_s15 = smov 0  }
   0x2 LB: > { %s32_s16 = sadd.s32 1, %s2858_s14  ;;  %p2365_p0 = scmp.ge.s32.totalorder %s2862_s15, 1  ;;  %s2862_s15 = sphi %s2924_s15, %s20_s15   ;;  %s2858_s14 = sphi %s2922_s14, %s3609_s14   ;;  %s2854_s13 = sphi %s2920_s13, %s3608_s13  }
   0x3   : > { %p34_p1 = scmp.ge.s32.totalorder %s32_s16, 2  ;;  %p408_p2 = scmp.lt.s32.totalorder %s2862_s15, 3 }
   0x5   : > { %s3611_s16 = smov (%p34_p1, %s32_s16), 0  ;;  %p409_p3 = pnand %p2365_p0, %p408_p2 }
   0x6   : > { %p485_p4 = scmp.lt.s32.totalorder (!%p409_p3), %s2854_s13, 1  ;;  %v553_v0 = vlaneseq (!%p409_p3)  ;;  %v2568_v11 = vld [vmem:[%s3600_s3 + $0x4] ss:$24 sps:$4 sm:$0xff] (!%p409_p3)   ;;  %v2570_v12 = vld [vmem:[%s3600_s3] ss:$24 sps:$4 sm:$0xff] (!%p409_p3)   ;;  %vm1380_vm1 = vcmask (!%p409_p3), 130048  }
   0x7   : > { %412 = sbr.rel (%p409_p3) target bundleno = 2122 (0x84a), region = 60  ;;  %v2571_v13 = vld [vmem:[%s3600_s3 + $0xc] ss:$24 sps:$4 sm:$0xff] (!%p409_p3)   ;;  %v2573_v14 = vld [vmem:[%s3600_s3 + $0x8] ss:$24 sps:$4 sm:$0xff] (!%p409_p3)   ;;  %1206 = vmatprep.subr.bf16.mxu0 (!%p409_p3), %v2568_v11 }
   0x8   : > { %v554_v1 = vand.u32 (!%p409_p3), 127, %v553_v0  ;;  %v2574_v15 = vld [vmem:[%s3600_s3 + $0x34] ss:$24 sps:$4 sm:$0xff] (!%p409_p3)   ;;  %1249 = vmatprep.subr.bf16.mxu1 (!%p409_p3), %v2571_v13  ;;  %1207 = vmatpush1.bf16.msra.mxu0 (!%p409_p3), %v2570_v12  ;;  %v2576_v17 = vld [vmem:[%s3600_s3 + $0x30] ss:$24 sps:$4 sm:$0xff] (!%p409_p3)  }
   0x9   : > { %v2577_v16 = vld [vmem:[%s3600_s3 + $0x3c] ss:$24 sps:$4 sm:$0xff] (!%p409_p3)   ;;  %1250 = vmatpush1.bf16.msra.mxu1 (!%p409_p3), %v2573_v14  ;;  %v2579_v18 = vld [vmem:[%s3600_s3 + $0x38] ss:$24 sps:$4 sm:$0xff] (!%p409_p3)   ;;  %1208 = vmatprep.subr.bf16.mxu0 (!%p409_p3), %v2574_v15  ;;  %v2583_v20 = vld [vmem:[%s3600_s3 + $0x6c] ss:$24 sps:$4 sm:$0xff] (!%p409_p3)  }
   0xa   : > { %v2942_v2 = vadd.s32 (!%p409_p3), 128, %v554_v1  ;;  %1251 = vmatprep.subr.bf16.mxu1 (!%p409_p3), %v2577_v16  ;;  %v2580_v19 = vld [vmem:[%s3600_s3 + $0x64] ss:$24 sps:$4 sm:$0xff] (!%p409_p3)   ;;  %v2582_v21 = vld [vmem:[%s3600_s3 + $0x60] ss:$24 sps:$4 sm:$0xff] (!%p409_p3)  }
   0xb   : > { %v2585_v22 = vld [vmem:[%s3600_s3 + $0x68] ss:$24 sps:$4 sm:$0xff] (!%p409_p3)   ;;  %v2586_v23 = vld [vmem:[%s3600_s3 + $0x94] ss:$24 sps:$4 sm:$0xff] (!%p409_p3)   ;;  %v2591_v26 = vld [vmem:[%s3600_s3 + $0x98] ss:$24 sps:$4 sm:$0xff] (!%p409_p3)  }
   0xc   : > { %vm557_vm0 = vcmp.lt.s32.totalorder (!%p409_p3), %v2942_v2, 243  ;;  %1209 = vmatpush1.bf16.msra.mxu0 (!%p409_p3), %v2576_v17  ;;  %v2589_v24 = vld [vmem:[%s3600_s3 + $0x9c] ss:$24 sps:$4 sm:$0xff] (!%p409_p3)   ;;  %v2588_v25 = vld [vmem:[%s3600_s3 + $0x90] ss:$24 sps:$4 sm:$0xff] (!%p409_p3)  }
   0xd   : > { %1252 = vmatpush1.bf16.msra.mxu1 (!%p409_p3), %v2579_v18  ;;  %1210 = vmatprep.subr.bf16.mxu0 (!%p409_p3), %v2580_v19  ;;  %v2592_v27 = vld [vmem:[%s3600_s3 + $0xc4] ss:$24 sps:$4 sm:$0xff] (!%p409_p3)   ;;  %v2594_v29 = vld [vmem:[%s3600_s3 + $0xc0] ss:$24 sps:$4 sm:$0xff] (!%p409_p3)   ;;  %v2598_v31 = vld [vmem:[%s3600_s3 + $0xf4] ss:$24 sps:$4 sm:$0xff] (!%p409_p3)  }
   0xe   : > { %s3613_s13 = smov (!%p485_p4, %s2854_s13), 1  ;;  %1253 = vmatprep.subr.bf16.mxu1 %v2583_v20  ;;  %v2595_v28 = vld [vmem:[%s3600_s3 + $0xcc] ss:$24 sps:$4 sm:$0xff]   ;;  %v2597_v30 = vld [vmem:[%s3600_s3 + $0xc8] ss:$24 sps:$4 sm:$0xff]  }
   0xf   : > { %s2541_s17 = sshll.u32 %s3613_s13, 5  ;;  %v2601_v32 = vld [vmem:[%s3600_s3 + $0xfc] ss:$24 sps:$4 sm:$0xff]   ;;  %v2600_v33 = vld [vmem:[%s3600_s3 + $0xf0] ss:$24 sps:$4 sm:$0xff]  }
  0x10   : > { %s489_s20 = scalar_lea.vmem %s3597_s0, %s2541_s17  ;;  %1211 = vmatpush1.bf16.msra.mxu0 %v2582_v21  ;;  %v2603_v34 = vld [vmem:[%s3600_s3 + $0xf8] ss:$24 sps:$4 sm:$0xff]   ;;  %v2604_v35 = vld [vmem:[%s3600_s3 + $0x124] ss:$24 sps:$4 sm:$0xff]   ;;  %v2609_v38 = vld [vmem:[%s3600_s3 + $0x128] ss:$24 sps:$4 sm:$0xff]   ;;  %s533_s25 = scalar_lea.vmem %s3607_s10, %s2541_s17 }
  0x11   : > { %v2949_v3 = vld [vmem:[%s489_s20] sm:$0xff]  ;;  %v2951_v4 = vld [vmem:[%s489_s20 + $0x8] sm:$0xff]  ;;  %v2954_v5 = vld [vmem:[%s489_s20 + $0x10] sm:$0xff]  ;;  %1254 = vmatpush1.bf16.msra.mxu1 %v2585_v22  ;;  %1212 = vmatprep.subr.bf16.mxu0 %v2586_v23 }
  0x12   : > { %v559_v6 = vsel %vm557_vm0, %v2951_v4, 0.0  ;;  %v2959_v7 = vld [vmem:[%s489_s20 + $0x18] sm:$0xff]  ;;  %1255 = vmatprep.subr.bf16.mxu1 %v2589_v24  ;;  %v2607_v36 = vld [vmem:[%s3600_s3 + $0x12c] ss:$24 sps:$4 sm:$0xff]   ;;  %v2612_v41 = vld [vmem:[%s3600_s3 + $0x150] ss:$24 sps:$4 sm:$0xff]  }
  0x13   : > { %v562_v8 = vadd.f32 %v559_v6, %v2949_v3  ;;  %v561_v9 = vsel %vm557_vm0, %v2959_v7, 0.0  ;;  %v2606_v37 = vld [vmem:[%s3600_s3 + $0x120] ss:$24 sps:$4 sm:$0xff]   ;;  %v2610_v39 = vld [vmem:[%s3600_s3 + $0x154] ss:$24 sps:$4 sm:$0xff]  }
  0x14   : > { %v565_v10 = vadd.f32 %v561_v9, %v2954_v5  ;;  %1213 = vmatpush1.bf16.msra.mxu0 %v2588_v25  ;;  %v2613_v40 = vld [vmem:[%s3600_s3 + $0x15c] ss:$24 sps:$4 sm:$0xff]   ;;  %v2615_v42 = vld [vmem:[%s3600_s3 + $0x158] ss:$24 sps:$4 sm:$0xff]   ;;  %v2619_v44 = vld [vmem:[%s3600_s3 + $0x18c] ss:$24 sps:$4 sm:$0xff]  }
  0x15   : > { %563 = vadd.xlane.f32.xlu0 %v562_v8  ;;  %1256 = vmatpush1.bf16.msra.mxu1 %v2591_v26  ;;  %v2616_v43 = vld [vmem:[%s3600_s3 + $0x184] ss:$24 sps:$4 sm:$0xff]   ;;  %v2618_v45 = vld [vmem:[%s3600_s3 + $0x180] ss:$24 sps:$4 sm:$0xff]   ;;  %v2622_v47 = vld [vmem:[%s3600_s3 + $0x1b4] ss:$24 sps:$4 sm:$0xff]  }
  0x16   : > { %1214 = vmatprep.subr.bf16.mxu0 %v2592_v27  ;;  %1257 = vmatprep.subr.bf16.mxu1 %v2595_v28  ;;  %v2621_v46 = vld [vmem:[%s3600_s3 + $0x188] ss:$24 sps:$4 sm:$0xff]   ;;  %v2625_v6 = vld [vmem:[%s3600_s3 + $0x1bc] ss:$24 sps:$4 sm:$0xff]   ;;  %v2627_v8 = vld [vmem:[%s3600_s3 + $0x1b8] ss:$24 sps:$4 sm:$0xff]  }
  0x17   : > { %v2624_v1 = vld [vmem:[%s3600_s3 + $0x1b0] ss:$24 sps:$4 sm:$0xff]   ;;  %v2628_v9 = vld [vmem:[%s3600_s3 + $0x1e4] ss:$24 sps:$4 sm:$0xff]   ;;  %v2634_v13 = vld [vmem:[%s3600_s3 + $0x214] ss:$24 sps:$4 sm:$0xff]  }
  0x18   : > { %1215 = vmatpush1.bf16.msra.mxu0 %v2594_v29  ;;  %v2631_v11 = vld [vmem:[%s3600_s3 + $0x1ec] ss:$24 sps:$4 sm:$0xff]   ;;  %v2633_v12 = vld [vmem:[%s3600_s3 + $0x1e8] ss:$24 sps:$4 sm:$0xff]   ;;  %v2637_v15 = vld [vmem:[%s3600_s3 + $0x21c] ss:$24 sps:$4 sm:$0xff]  }
  0x19   : > { %566 = vadd.xlane.f32.xlu0 %v565_v10  ;;  %1258 = vmatpush1.bf16.msra.mxu1 %v2597_v30  ;;  %v2630_v10 = vld [vmem:[%s3600_s3 + $0x1e0] ss:$24 sps:$4 sm:$0xff]   ;;  %v2636_v14 = vld [vmem:[%s3600_s3 + $0x210] ss:$24 sps:$4 sm:$0xff]   ;;  %v2640_v17 = vld [vmem:[%s3600_s3 + $0x244] ss:$24 sps:$4 sm:$0xff]  }
  0x1a   : > { %1216 = vmatprep.subr.bf16.mxu0 %v2598_v31  ;;  %1259 = vmatprep.subr.bf16.mxu1 %v2601_v32  ;;  %v2639_v16 = vld [vmem:[%s3600_s3 + $0x218] ss:$24 sps:$4 sm:$0xff]   ;;  %v2643_v19 = vld [vmem:[%s3600_s3 + $0x24c] ss:$24 sps:$4 sm:$0xff]   ;;  %v2645_v20 = vld [vmem:[%s3600_s3 + $0x248] ss:$24 sps:$4 sm:$0xff]  }
  0x1b   : > { %v2642_v18 = vld [vmem:[%s3600_s3 + $0x240] ss:$24 sps:$4 sm:$0xff]   ;;  %v2646_v21 = vld [vmem:[%s3600_s3 + $0x274] ss:$24 sps:$4 sm:$0xff]   ;;  %v2648_v23 = vld [vmem:[%s3600_s3 + $0x270] ss:$24 sps:$4 sm:$0xff]  }
  0x1c   : > { %1217 = vmatpush1.bf16.msra.mxu0 %v2600_v33  ;;  %v2649_v22 = vld [vmem:[%s3600_s3 + $0x27c] ss:$24 sps:$4 sm:$0xff]   ;;  %v2651_v24 = vld [vmem:[%s3600_s3 + $0x278] ss:$24 sps:$4 sm:$0xff]   ;;  %v2655_v26 = vld [vmem:[%s3600_s3 + $0x2ac] ss:$24 sps:$4 sm:$0xff]  }
  0x1d   : > { %1260 = vmatpush1.bf16.msra.mxu1 %v2603_v34  ;;  %1218 = vmatprep.subr.bf16.mxu0 %v2604_v35  ;;  %v2652_v25 = vld [vmem:[%s3600_s3 + $0x2a4] ss:$24 sps:$4 sm:$0xff]   ;;  %v2654_v27 = vld [vmem:[%s3600_s3 + $0x2a0] ss:$24 sps:$4 sm:$0xff]   ;;  %v2658_v29 = vld [vmem:[%s3600_s3 + $0x2d4] ss:$24 sps:$4 sm:$0xff]  }
  0x1e   : > { %1261 = vmatprep.subr.bf16.mxu1 %v2607_v36  ;;  %v2657_v28 = vld [vmem:[%s3600_s3 + $0x2a8] ss:$24 sps:$4 sm:$0xff]   ;;  %v2661_v30 = vld [vmem:[%s3600_s3 + $0x2dc] ss:$24 sps:$4 sm:$0xff]   ;;  %v2663_v32 = vld [vmem:[%s3600_s3 + $0x2d8] ss:$24 sps:$4 sm:$0xff]  }
  0x1f   : > { %v2660_v31 = vld [vmem:[%s3600_s3 + $0x2d0] ss:$24 sps:$4 sm:$0xff]   ;;  %v2666_v33 = vld [vmem:[%s3600_s3 + $0x14] ss:$24 sps:$4 sm:$0xff]  }
  0x20   : > { %1219 = vmatpush1.bf16.msra.mxu0 %v2606_v37  ;;  %v2747_v2 = vld [vmem:[%s3603_s6 + $0xb4] ss:$8 sps:$4 sm:$0xff]  }
  0x21   : > { %1262 = vmatpush1.bf16.msra.mxu1 %v2609_v38  ;;  %1220 = vmatprep.subr.bf16.mxu0 %v2610_v39 }
  0x22   : > { %1263 = vmatprep.subr.bf16.mxu1 %v2613_v40  ;;  %v600_v40 = vshrl.u32 %v553_v0, 7 }
  0x24   : > { %1221 = vmatpush1.bf16.msra.mxu0 %v2612_v41  ;;  %v3186_v41 = vsub.s32 0, %v600_v40 }
  0x25   : > { %1264 = vmatpush1.bf16.msra.mxu1 %v2615_v42  ;;  %1222 = vmatprep.subr.bf16.mxu0 %v2616_v43  ;;  %v3188_v42 = vsub.s32 1, %v600_v40  ;;  %v551_v43 = vld [vmem:[%s3598_s1] sm:$0x3] }
  0x26   : > { %1265 = vmatprep.subr.bf16.mxu1 %v2619_v44 }
  0x28   : > { %1223 = vmatpush1.bf16.msra.mxu0 %v2618_v45  ;;  %v552_v45 = vld [vmem:[%s3599_s2] sm:$0x3] }
  0x29   : > { %1266 = vmatpush1.bf16.msra.mxu1 %v2621_v46  ;;  %1224 = vmatprep.subr.bf16.mxu0 %v2622_v47  ;;  %v606_v47 = vrot.slane %v551_v43, %v3188_v42 }
  0x2a   : > { %1267 = vmatprep.subr.bf16.mxu1 %v2625_v6  ;;  %v2664_v6 = vld [vmem:[%s3600_s3 + $0x10] ss:$24 sps:$4 sm:$0xff]  }
  0x2c   : > { %1225 = vmatpush1.bf16.msra.mxu0 %v2624_v1 }
  0x2d   : > { %1268 = vmatpush1.bf16.msra.mxu1 %v2627_v8  ;;  %1226 = vmatprep.subr.bf16.mxu0 %v2628_v9  ;;  %v2672_v9 = vld [vmem:[%s3600_s3 + $0x74] ss:$24 sps:$4 sm:$0xff]  }
  0x2e   : > { %1269 = vmatprep.subr.bf16.mxu1 %v2631_v11  ;;  %v2675_v11 = vld [vmem:[%s3600_s3 + $0xa4] ss:$24 sps:$4 sm:$0xff]  }
  0x30   : > { %1227 = vmatpush1.bf16.msra.mxu0 %v2630_v10  ;;  %v2670_v10 = vld [vmem:[%s3600_s3 + $0x70] ss:$24 sps:$4 sm:$0xff]  }
  0x31   : > { %1270 = vmatpush1.bf16.msra.mxu1 %v2633_v12  ;;  %1228 = vmatprep.subr.bf16.mxu0 %v2634_v13  ;;  %v2673_v12 = vld [vmem:[%s3600_s3 + $0xa0] ss:$24 sps:$4 sm:$0xff]   ;;  %v2678_v13 = vld [vmem:[%s3600_s3 + $0xd4] ss:$24 sps:$4 sm:$0xff]  }
  0x32   : > { %1271 = vmatprep.subr.bf16.mxu1 %v2637_v15  ;;  %v2681_v15 = vld [vmem:[%s3600_s3 + $0x104] ss:$24 sps:$4 sm:$0xff]  }
  0x34   : > { %1229 = vmatpush1.bf16.msra.mxu0 %v2636_v14  ;;  %v2676_v14 = vld [vmem:[%s3600_s3 + $0xd0] ss:$24 sps:$4 sm:$0xff]  }
  0x35   : > { %1272 = vmatpush1.bf16.msra.mxu1 %v2639_v16  ;;  %1230 = vmatprep.subr.bf16.mxu0 %v2640_v17  ;;  %v2679_v16 = vld [vmem:[%s3600_s3 + $0x100] ss:$24 sps:$4 sm:$0xff]   ;;  %v2684_v17 = vld [vmem:[%s3600_s3 + $0x134] ss:$24 sps:$4 sm:$0xff]  }
  0x36   : > { %1273 = vmatprep.subr.bf16.mxu1 %v2643_v19  ;;  %v2687_v19 = vld [vmem:[%s3600_s3 + $0x164] ss:$24 sps:$4 sm:$0xff]  }
  0x38   : > { %1231 = vmatpush1.bf16.msra.mxu0 %v2642_v18  ;;  %v2682_v18 = vld [vmem:[%s3600_s3 + $0x130] ss:$24 sps:$4 sm:$0xff]  }
  0x39   : > { %1274 = vmatpush1.bf16.msra.mxu1 %v2645_v20  ;;  %1232 = vmatprep.subr.bf16.mxu0 %v2646_v21  ;;  %v2685_v20 = vld [vmem:[%s3600_s3 + $0x160] ss:$24 sps:$4 sm:$0xff]   ;;  %v2690_v21 = vld [vmem:[%s3600_s3 + $0x194] ss:$24 sps:$4 sm:$0xff]  }
  0x3a   : > { %1275 = vmatprep.subr.bf16.mxu1 %v2649_v22  ;;  %v2688_v22 = vld [vmem:[%s3600_s3 + $0x190] ss:$24 sps:$4 sm:$0xff]  }
  0x3c   : > { %1233 = vmatpush1.bf16.msra.mxu0 %v2648_v23  ;;  %v2693_v23 = vld [vmem:[%s3600_s3 + $0x1c4] ss:$24 sps:$4 sm:$0xff]  }
  0x3d   : > { %1276 = vmatpush1.bf16.msra.mxu1 %v2651_v24  ;;  %1234 = vmatprep.subr.bf16.mxu0 %v2652_v25  ;;  %v2691_v24 = vld [vmem:[%s3600_s3 + $0x1c0] ss:$24 sps:$4 sm:$0xff]   ;;  %v2696_v25 = vld [vmem:[%s3600_s3 + $0x1f4] ss:$24 sps:$4 sm:$0xff]  }
  0x3e   : > { %1277 = vmatprep.subr.bf16.mxu1 %v2655_v26  ;;  %v2694_v26 = vld [vmem:[%s3600_s3 + $0x1f0] ss:$24 sps:$4 sm:$0xff]  }
  0x40   : > { %1235 = vmatpush1.bf16.msra.mxu0 %v2654_v27  ;;  %v2699_v27 = vld [vmem:[%s3600_s3 + $0x224] ss:$24 sps:$4 sm:$0xff]  }
  0x41   : > { %1278 = vmatpush1.bf16.msra.mxu1 %v2657_v28  ;;  %1236 = vmatprep.subr.bf16.mxu0 %v2658_v29  ;;  %v2697_v28 = vld [vmem:[%s3600_s3 + $0x220] ss:$24 sps:$4 sm:$0xff]   ;;  %v2702_v29 = vld [vmem:[%s3600_s3 + $0x254] ss:$24 sps:$4 sm:$0xff]  }
  0x42   : > { %1279 = vmatprep.subr.bf16.mxu1 %v2661_v30  ;;  %v2700_v30 = vld [vmem:[%s3600_s3 + $0x250] ss:$24 sps:$4 sm:$0xff]  }
  0x44   : > { %1237 = vmatpush1.bf16.msra.mxu0 %v2660_v31  ;;  %v2705_v31 = vld [vmem:[%s3600_s3 + $0x284] ss:$24 sps:$4 sm:$0xff]  }
  0x45   : > { %1280 = vmatpush1.bf16.msra.mxu1 %v2663_v32  ;;  %1292 = vmatprep.subr.bf16.mxu0 %v2666_v33  ;;  %v2703_v32 = vld [vmem:[%s3600_s3 + $0x280] ss:$24 sps:$4 sm:$0xff]   ;;  %v2708_v33 = vld [vmem:[%s3600_s3 + $0x2b4] ss:$24 sps:$4 sm:$0xff]  }
  0xa2   : > { %v564_v48 = vpop.xlane.xlu0 %563 }
  0xa3   : > { %v568_v49 = vmul.f32 0.004115226, %v564_v48  ;;  %v602_v48 = vrot.slane %v551_v43, %v3186_v41 }
  0xa5   : > { %v3078_v50 = vsub.f32 %v2949_v3, %v568_v49  ;;  %v571_v51 = vsub.f32 %v2951_v4, %v568_v49 }
  0xa6   : > { %v567_v52 = vpop.xlane.xlu0 %566 }
  0xa7   : > { %v569_v53 = vmul.f32 0.004115226, %v567_v52  ;;  %v3083_v54 = vsel %vm557_vm0, %v571_v51, 0.0  ;;  %v578_v55 = vmul.f32 %v3078_v50, %v3078_v50  ;;  %v621_v51 = vrot.slane %v552_v45, %v3188_v42 }
  0xa8   : > { %v579_v56 = vmul.f32 %v3083_v54, %v3083_v54  ;;  %v617_v52 = vrot.slane %v552_v45, %v3186_v41 }
  0xa9   : > { %v3090_v57 = vsub.f32 %v2954_v5, %v569_v53  ;;  %v573_v58 = vsub.f32 %v2959_v7, %v569_v53 }
  0xaa   : > { %v582_v59 = vadd.f32 %v579_v56, %v578_v55 }
  0xab   : > { %v3095_v60 = vsel %vm557_vm0, %v573_v58, 0.0  ;;  %v580_v61 = vmul.f32 %v3090_v57, %v3090_v57 }
  0xac   : > { %583 = vadd.xlane.f32.xlu1 %v582_v59  ;;  %v581_v62 = vmul.f32 %v3095_v60, %v3095_v60 }
  0xae   : > { %v585_v63 = vadd.f32 %v581_v62, %v580_v61 }
  0xb0   : > { %586 = vadd.xlane.f32.xlu1 %v585_v63 }
 0x139   : > { %v584_v34 = vpop.xlane.xlu1 %583 }
 0x13a   : > { %v588_v35 = vmul.f32 0.004115226, %v584_v34  ;;  %v2706_v34 = vld [vmem:[%s3600_s3 + $0x2b0] ss:$24 sps:$4 sm:$0xff]  }
 0x13c   : > { %v590_v36 = vadd.f32 1e-05, %v588_v35  ;;  %v2711_v35 = vld [vmem:[%s3600_s3 + $0x2e4] ss:$24 sps:$4 sm:$0xff]  }
 0x13d   : > { %v587_v37 = vpop.xlane.xlu1 %586 }
 0x13e   : > { %2808 = vrsqrt.f32 %v590_v36  ;;  %v589_v38 = vmul.f32 0.004115226, %v587_v37  ;;  %v2709_v36 = vld [vmem:[%s3600_s3 + $0x2e0] ss:$24 sps:$4 sm:$0xff]  }
 0x140   : > { %v591_v39 = vadd.f32 1e-05, %v589_v38 }
 0x142   : > { %2810 = vrsqrt.f32 %v591_v39 }
 0x148   : > { %v2809_v44 = vpop.eup %2808 }
 0x149   : > { %v595_v46 = vmul.f32 %v2809_v44, %v3083_v54  ;;  %v594_v0 = vmul.f32 %v2809_v44, %v3078_v50 }
 0x14b   : > { %v610_v55 = vmul.f32 %v606_v47, %v595_v46  ;;  %v609_v58 = vmul.f32 %v602_v48, %v594_v0 }
 0x14c   : > { %v2811_v49 = vpop.eup %2810 }
 0x14d   : > { %v597_v53 = vmul.f32 %v2811_v49, %v3095_v60  ;;  %v596_v56 = vmul.f32 %v2811_v49, %v3090_v57  ;;  %v625_v54 = vadd.f32 %v621_v51, %v610_v55  ;;  %v624_v63 = vadd.f32 %v617_v52, %v609_v58  ;;  %v2669_v60 = vld [vmem:[%s3600_s3 + $0x44] ss:$24 sps:$4 sm:$0xff]   ;;  %v2667_v57 = vld [vmem:[%s3600_s3 + $0x40] ss:$24 sps:$4 sm:$0xff]  }
 0x14f   : > { %v612_v59 = vmul.f32 %v606_v47, %v597_v53  ;;  %v611_v61 = vmul.f32 %v602_v48, %v596_v56 }
 0x151   : > { %v627_v62 = vadd.f32 %v621_v51, %v612_v59  ;;  %v626_v1 = vadd.f32 %v617_v52, %v611_v61 }
 0x153   : > { %v629_v50 = vpack.c.bf16 %v627_v62, %v625_v54  ;;  %v3207_v8 = vpack.c.bf16 %v626_v1, %v624_v63 }
 0x155   : > { %1238 = vmatprep.mubr.bf16.mxu0 %v629_v50  ;;  %1281 = vmatprep.mubr.bf16.mxu1 %v629_v50 }
 0x156   : > { %1239 = vmatmul.mubr.bf16.vlgmr.msra.gmra.mrb[0].mxu0 %v3207_v8  ;;  %1282 = vmatmul.mubr.bf16.vlgmr.msra.gmra.mrb[0].mxu1 %v3207_v8 }
 0x157   : > { %1293 = vmatpush1.bf16.msra.mxu0 %v2664_v6  ;;  %1324 = vmatprep.mubr.bf16.mxu0 %v629_v50 }
 0x158   : > { %1294 = vmatprep.subr.bf16.mxu0 %v2669_v60 }
 0x15b   : > { %1295 = vmatpush1.bf16.msra.mxu0 %v2667_v57 }
 0x15c   : > { %1296 = vmatprep.subr.bf16.mxu0 %v2672_v9 }
 0x15f   : > { %1297 = vmatpush1.bf16.msra.mxu0 %v2670_v10 }
 0x160   : > { %1298 = vmatprep.subr.bf16.mxu0 %v2675_v11 }
 0x163   : > { %1299 = vmatpush1.bf16.msra.mxu0 %v2673_v12 }
 0x164   : > { %1300 = vmatprep.subr.bf16.mxu0 %v2678_v13 }
 0x167   : > { %1301 = vmatpush1.bf16.msra.mxu0 %v2676_v14  ;;  %v2864_v14 = vmov 0  }
 0x168   : > { %1302 = vmatprep.subr.bf16.mxu0 %v2681_v15 }
 0x16b   : > { %1303 = vmatpush1.bf16.msra.mxu0 %v2679_v16 }
 0x16c   : > { %1304 = vmatprep.subr.bf16.mxu0 %v2684_v17 }
 0x16f   : > { %1305 = vmatpush1.bf16.msra.mxu0 %v2682_v18 }
 0x170   : > { %1306 = vmatprep.subr.bf16.mxu0 %v2687_v19 }
 0x173   : > { %1307 = vmatpush1.bf16.msra.mxu0 %v2685_v20 }
 0x174   : > { %1308 = vmatprep.subr.bf16.mxu0 %v2690_v21 }
 0x177   : > { %1309 = vmatpush1.bf16.msra.mxu0 %v2688_v22 }
 0x178   : > { %1310 = vmatprep.subr.bf16.mxu0 %v2693_v23 }
 0x17b   : > { %1311 = vmatpush1.bf16.msra.mxu0 %v2691_v24 }
 0x17c   : > { %1312 = vmatprep.subr.bf16.mxu0 %v2696_v25 }
 0x17f   : > { %1313 = vmatpush1.bf16.msra.mxu0 %v2694_v26 }
 0x180   : > { %1314 = vmatprep.subr.bf16.mxu0 %v2699_v27 }
 0x183   : > { %1315 = vmatpush1.bf16.msra.mxu0 %v2697_v28 }
 0x184   : > { %1316 = vmatprep.subr.bf16.mxu0 %v2702_v29 }
 0x187   : > { %1317 = vmatpush1.bf16.msra.mxu0 %v2700_v30 }
 0x188   : > { %1318 = vmatprep.subr.bf16.mxu0 %v2705_v31 }
 0x18b   : > { %1319 = vmatpush1.bf16.msra.mxu0 %v2703_v32  ;;  %v2714_v32 = vld [vmem:[%s3603_s6 + $0x4] ss:$8 sps:$4 sm:$0xff]  }
 0x18c   : > { %1320 = vmatprep.subr.bf16.mxu0 %v2708_v33  ;;  %v2715_v33 = vld [vmem:[%s3603_s6 + $0x10] ss:$8 sps:$4 sm:$0xff]  }
 0x18f   : > { %1321 = vmatpush1.bf16.msra.mxu0 %v2706_v34  ;;  %v2720_v34 = vld [vmem:[%s3603_s6 + $0x24] ss:$8 sps:$4 sm:$0xff]  }
 0x190   : > { %1322 = vmatprep.subr.bf16.mxu0 %v2711_v35  ;;  %v2718_v35 = vld [vmem:[%s3603_s6 + $0x20] ss:$8 sps:$4 sm:$0xff]  }
 0x193   : > { %1323 = vmatpush1.bf16.msra.mxu0 %v2709_v36  ;;  %v2723_v36 = vld [vmem:[%s3603_s6 + $0x34] ss:$8 sps:$4 sm:$0xff]  }
 0x196   : > { %1325 = vmatmul.mubr.bf16.vlgmr.msra.gmra.mrb[4].mxu0 %v3207_v8 }
 0x229   : > { %v1240_v37 = vpop.f32.mrb[0].mxu0  ;;  %v1283_v38 = vpop.f32.mrb[0].mxu1 }
 0x22a   : > { %v1242_v39 = vpop.f32.mrb[1].mxu0  ;;  %v1285_v40 = vpop.f32.mrb[1].mxu1 }
 0x22b   : > { %v1244_v43 = vpop.f32.mrb[2].mxu0  ;;  %v1287_v44 = vpop.f32.mrb[2].mxu1 }
 0x22c   : > { %v1335_v45 = vpack.c.bf16 %v1244_v43, %v1240_v37  ;;  %v1337_v46 = vpack.c.bf16 %v1287_v44, %v1283_v38  ;;  %v1246_v47 = vpop.f32.mrb[3].mxu0  ;;  %v1289_v0 = vpop.f32.mrb[3].mxu1  ;;  %v2721_v37 = vld [vmem:[%s3603_s6 + $0x30] ss:$8 sps:$4 sm:$0xff]   ;;  %v2726_v38 = vld [vmem:[%s3603_s6 + $0x44] ss:$8 sps:$4 sm:$0xff]  }
 0x22d   : > { %v1336_v48 = vpack.c.bf16 %v1246_v47, %v1242_v39  ;;  %v1338_v49 = vpack.c.bf16 %v1289_v0, %v1285_v40  ;;  %v2724_v39 = vld [vmem:[%s3603_s6 + $0x40] ss:$8 sps:$4 sm:$0xff]   ;;  %v2729_v40 = vld [vmem:[%s3603_s6 + $0x54] ss:$8 sps:$4 sm:$0xff]   ;;  %v2727_v43 = vld [vmem:[%s3603_s6 + $0x50] ss:$8 sps:$4 sm:$0xff]  }
 0x22e   : > { %v2732_v44 = vld [vmem:[%s3603_s6 + $0x64] ss:$8 sps:$4 sm:$0xff]   ;;  %v2733_v47 = vld [vmem:[%s3603_s6 + $0x70] ss:$8 sps:$4 sm:$0xff]  }
 0x22f   : > { %1339 = vmatprep.subr.bf16.mxu1 %v1338_v49  ;;  %1371 = vmatprep.mubr.bf16.mxu1 %v1336_v48  ;;  %v2738_v0 = vld [vmem:[%s3603_s6 + $0x84] ss:$8 sps:$4 sm:$0xff]   ;;  %v2736_v48 = vld [vmem:[%s3603_s6 + $0x80] ss:$8 sps:$4 sm:$0xff]   ;;  %v2741_v49 = vld [vmem:[%s3603_s6 + $0x94] ss:$8 sps:$4 sm:$0xff]  }
 0x230   : > { %1340 = vmatpush1.bf16.xpose.msra.mxu1 %v1337_v46  ;;  %v2735_v46 = vld [vmem:[%s3603_s6 + $0x74] ss:$8 sps:$4 sm:$0xff]  }
 0x237   : > { %1372 = vmatmul.mubr.bf16.vlgmr.msra.gmra.mrb[4].mxu1 %v1335_v45  ;;  %v2730_v45 = vld [vmem:[%s3603_s6 + $0x60] ss:$8 sps:$4 sm:$0xff]  }
 0x238   : > { %1441 = vmatprep.mubr.bf16.mxu1 %v2864_v14  ;;  %v2753_v14 = vld [vmem:[%s3603_s6 + $0xd4] ss:$8 sps:$4 sm:$0xff]  }
 0x269   : > { %v1326_v51 = vpop.f32.mrb[4].mxu0 }
 0x26a   : > { %v1328_v52 = vpop.f32.mrb[5].mxu0 }
 0x26b   : > { %v1330_v53 = vpop.f32.mrb[6].mxu0 }
 0x26c   : > { %v1404_v55 = vpack.c.bf16 %v1330_v53, %v1326_v51  ;;  %v1332_v56 = vpop.f32.mrb[7].mxu0  ;;  %v2739_v51 = vld [vmem:[%s3603_s6 + $0x90] ss:$8 sps:$4 sm:$0xff]  }
 0x26d   : > { %v1405_v58 = vpack.c.bf16 %v1332_v56, %v1328_v52 }
 0x26f   : > { %1409 = vmatprep.subr.bf16.mxu1 %v1405_v58 }
 0x270   : > { %1410 = vmatpush1.bf16.msra.mxu1 %v1404_v55 }
 0x271   : > { %1734 = vmatprep.subr.bf16.mxu1 %v2714_v32  ;;  %v1457_v32 = vld [vmem:[%s3602_s5] sm:$0x3] }
 0x30a   : > { %v1373_v59 = vpop.f32.mrb[4].mxu1 }
 0x30b   : > { %v1375_v61 = vpop.f32.mrb[5].mxu1  ;;  %v1381_v54 = vsel %vm1380_vm1, %v1373_v59, -inf }
 0x30c   : > { %1382 = vmax.xlane.f32.xlu0 %v1381_v54  ;;  %v1376_v62 = vpop.f32.mrb[6].mxu1 }
 0x30d   : > { %v1378_v63 = vpop.f32.mrb[7].mxu1  ;;  %v1384_v1 = vsel %vm1380_vm1, %v1376_v62, -inf }
 0x30e   : > { %1385 = vmax.xlane.f32.xlu1 %v1384_v1 }
 0x399   : > { %v1383_v50 = vpop.xlane.xlu0 %1382 }
 0x39a   : > { %v1387_v6 = vsub.f32 %v1373_v59, %v1383_v50 }
 0x39b   : > { %v1386_v8 = vpop.xlane.xlu1 %1385 }
 0x39c   : > { %v1389_v60 = vmul.f32 1.442695, %v1387_v6  ;;  %v1388_v57 = vsub.f32 %v1376_v62, %v1386_v8 }
 0x39e   : > { %2812 = vpow2.f32 %v1389_v60  ;;  %v1391_v9 = vmul.f32 1.442695, %v1388_v57 }
 0x3a0   : > { %2814 = vpow2.f32 %v1391_v9  ;;  %v2744_v9 = vld [vmem:[%s3603_s6 + $0xa4] ss:$8 sps:$4 sm:$0xff]  }
 0x3a8   : > { %v2813_v10 = vpop.eup %2812 }
 0x3a9   : > { %v1393_v11 = vsel %vm1380_vm1, %v2813_v10, 0.0 }
 0x3aa   : > { %v2815_v12 = vpop.eup %2814  ;;  %1394 = vadd.xlane.f32.xlu0 %v1393_v11  ;;  %v2745_v11 = vld [vmem:[%s3603_s6 + $0xb0] ss:$8 sps:$4 sm:$0xff]  }
 0x3ab   : > { %v1396_v13 = vsel %vm1380_vm1, %v2815_v12, 0.0 }
 0x3ac   : > { %1397 = vadd.xlane.f32.xlu1 %v1396_v13  ;;  %v2748_v13 = vld [vmem:[%s3603_s6 + $0xc0] ss:$8 sps:$4 sm:$0xff]  }
 0x437   : > { %v1395_v15 = vpop.xlane.xlu0 %1394 }
 0x438   : > { %2816 = vrcp.f32 %v1395_v15  ;;  %v2751_v15 = vld [vmem:[%s3603_s6 + $0xd0] ss:$8 sps:$4 sm:$0xff]  }
 0x439   : > { %v1398_v16 = vpop.xlane.xlu1 %1397 }
 0x43a   : > { %2818 = vrcp.f32 %v1398_v16  ;;  %v2754_v16 = vld [vmem:[%s3603_s6 + $0xe0] ss:$8 sps:$4 sm:$0xff]  }
 0x442   : > { %v2817_v17 = vpop.eup %2816 }
 0x443   : > { %v1401_v19 = vmul.f32 %v2817_v17, %v2813_v10  ;;  %v2742_v10 = vld [vmem:[%s3603_s6 + $0xa0] ss:$8 sps:$4 sm:$0xff]   ;;  %v2756_v17 = vld [vmem:[%s3603_s6 + $0xe4] ss:$8 sps:$4 sm:$0xff]  }
 0x444   : > { %v2819_v18 = vpop.eup %2818 }
 0x445   : > { %v1402_v20 = vmul.f32 %v2819_v18, %v2815_v12  ;;  %v2750_v12 = vld [vmem:[%s3603_s6 + $0xc4] ss:$8 sps:$4 sm:$0xff]   ;;  %v2759_v18 = vld [vmem:[%s3603_s6 + $0xf4] ss:$8 sps:$4 sm:$0xff]  }
 0x447   : > { %v1403_v21 = vpack.c.bf16 %v1402_v20, %v1401_v19  ;;  %v2757_v19 = vld [vmem:[%s3603_s6 + $0xf0] ss:$8 sps:$4 sm:$0xff]   ;;  %v2760_v20 = vld [vmem:[%s3605_s8] ss:$8 sps:$4 sm:$0xff]  }
 0x449   : > { %2466 = vmatmul.mubr.msk.bf16.vlgmr.msra.gmra.mrb[8].mxu1 %vm1380_vm1, %v1403_v21  ;;  %v2762_v21 = vld [vmem:[%s3605_s8 + $0x4] ss:$8 sps:$4 sm:$0xff]  }
 0x44a   : > { %2091 = vmatprep.subr.bf16.mxu0 %v2762_v21  ;;  %v2805_v21 = vld [vmem:[%s3605_s8 + $0xf0] ss:$8 sps:$4 sm:$0xff]  }
 0x44b   : > { %2092 = vmatpush1.bf16.msra.mxu0 %v2760_v20  ;;  %v2807_v20 = vld [vmem:[%s3605_s8 + $0xf4] ss:$8 sps:$4 sm:$0xff]  }
 0x51c   : > { %v1443_v22 = vpop.f32.mrb[8].mxu1 }
 0x51d   : > { %v1445_v23 = vpop.f32.mrb[9].mxu1  ;;  %v3311_v26 = vadd.f32 %v1443_v22, %v2949_v3  ;;  %v2765_v22 = vld [vmem:[%s3605_s8 + $0x14] ss:$8 sps:$4 sm:$0xff]  }
 0x51e   : > { %v3308_v24 = vadd.f32 %v1445_v23, %v2951_v4  ;;  %v1447_v25 = vpop.f32.mrb[10].mxu1  ;;  %v2763_v23 = vld [vmem:[%s3605_s8 + $0x10] ss:$8 sps:$4 sm:$0xff]   ;;  %2093 = vmatprep.subr.bf16.mxu0 %v2765_v22  ;;  %v1562_v22 = vld [vmem:[%s3604_s7] sm:$0x3] }
 0x51f   : > { %v1449_v27 = vpop.f32.mrb[11].mxu1  ;;  %v3320_v30 = vadd.f32 %v1447_v25, %v2954_v5  ;;  %v2717_v5 = vld [vmem:[%s3603_s6 + $0x14] ss:$8 sps:$4 sm:$0xff]   ;;  %2094 = vmatpush1.bf16.msra.mxu0 %v2763_v23  ;;  %v1567_v23 = vrot.slane %v1562_v22, %v3186_v41 }
 0x520   : > { %v3314_v28 = vadd.f32 %v1449_v27, %v2959_v7  ;;  %v1459_v29 = vsel %vm557_vm0, %v3308_v24, 0.0  ;;  %v2712_v7 = vld [vmem:[%s3603_s6] ss:$8 sps:$4 sm:$0xff]  }
 0x521   : > { %v1462_v31 = vadd.f32 %v1459_v29, %v3311_v26  ;;  %1735 = vmatpush1.bf16.msra.mxu1 %v2712_v7  ;;  %v1456_v7 = vld [vmem:[%s3601_s4] sm:$0x3] }
 0x522   : > { %v1461_v4 = vsel %vm557_vm0, %v3314_v28, 0.0  ;;  %1736 = vmatprep.subr.bf16.mxu1 %v2717_v5  ;;  %v1502_v5 = vrot.slane %v1456_v7, %v3186_v41 }
 0x523   : > { %1463 = vadd.xlane.f32.xlu0 %v1462_v31  ;;  %v1465_v3 = vadd.f32 %v1461_v4, %v3320_v30 }
 0x525   : > { %1466 = vadd.xlane.f32.xlu1 %v1465_v3  ;;  %1737 = vmatpush1.bf16.msra.mxu1 %v2715_v33  ;;  %v1506_v33 = vrot.slane %v1456_v7, %v3188_v42 }
 0x526   : > { %1738 = vmatprep.subr.bf16.mxu1 %v2720_v34 }
 0x529   : > { %1739 = vmatpush1.bf16.msra.mxu1 %v2718_v35 }
 0x52a   : > { %1740 = vmatprep.subr.bf16.mxu1 %v2723_v36 }
 0x52d   : > { %1741 = vmatpush1.bf16.msra.mxu1 %v2721_v37 }
 0x52e   : > { %1742 = vmatprep.subr.bf16.mxu1 %v2726_v38  ;;  %v1517_v38 = vrot.slane %v1457_v32, %v3186_v41 }
 0x531   : > { %1743 = vmatpush1.bf16.msra.mxu1 %v2724_v39  ;;  %v1521_v39 = vrot.slane %v1457_v32, %v3188_v42 }
 0x532   : > { %1744 = vmatprep.subr.bf16.mxu1 %v2729_v40 }
 0x535   : > { %1745 = vmatpush1.bf16.msra.mxu1 %v2727_v43 }
 0x536   : > { %1746 = vmatprep.subr.bf16.mxu1 %v2732_v44 }
 0x539   : > { %1747 = vmatpush1.bf16.msra.mxu1 %v2730_v45 }
 0x53a   : > { %1748 = vmatprep.subr.bf16.mxu1 %v2735_v46 }
 0x53d   : > { %1749 = vmatpush1.bf16.msra.mxu1 %v2733_v47 }
 0x53e   : > { %1750 = vmatprep.subr.bf16.mxu1 %v2738_v0 }
 0x541   : > { %1751 = vmatpush1.bf16.msra.mxu1 %v2736_v48 }
 0x542   : > { %1752 = vmatprep.subr.bf16.mxu1 %v2741_v49 }
 0x545   : > { %1753 = vmatpush1.bf16.msra.mxu1 %v2739_v51 }
 0x546   : > { %1754 = vmatprep.subr.bf16.mxu1 %v2744_v9  ;;  %v2789_v9 = vld [vmem:[%s3605_s8 + $0x94] ss:$8 sps:$4 sm:$0xff]  }
 0x549   : > { %1755 = vmatpush1.bf16.msra.mxu1 %v2742_v10  ;;  %v2787_v10 = vld [vmem:[%s3605_s8 + $0x90] ss:$8 sps:$4 sm:$0xff]  }
 0x54a   : > { %1756 = vmatprep.subr.bf16.mxu1 %v2747_v2  ;;  %v2792_v2 = vld [vmem:[%s3605_s8 + $0xa4] ss:$8 sps:$4 sm:$0xff]  }
 0x54d   : > { %1757 = vmatpush1.bf16.msra.mxu1 %v2745_v11  ;;  %v2790_v11 = vld [vmem:[%s3605_s8 + $0xa0] ss:$8 sps:$4 sm:$0xff]  }
 0x54e   : > { %1758 = vmatprep.subr.bf16.mxu1 %v2750_v12  ;;  %v2795_v12 = vld [vmem:[%s3605_s8 + $0xb4] ss:$8 sps:$4 sm:$0xff]  }
 0x551   : > { %1759 = vmatpush1.bf16.msra.mxu1 %v2748_v13  ;;  %v2793_v13 = vld [vmem:[%s3605_s8 + $0xb0] ss:$8 sps:$4 sm:$0xff]  }
 0x552   : > { %1760 = vmatprep.subr.bf16.mxu1 %v2753_v14  ;;  %v2798_v14 = vld [vmem:[%s3605_s8 + $0xc4] ss:$8 sps:$4 sm:$0xff]  }
 0x555   : > { %1761 = vmatpush1.bf16.msra.mxu1 %v2751_v15  ;;  %v2796_v15 = vld [vmem:[%s3605_s8 + $0xc0] ss:$8 sps:$4 sm:$0xff]  }
 0x556   : > { %1762 = vmatprep.subr.bf16.mxu1 %v2756_v17  ;;  %v2799_v17 = vld [vmem:[%s3605_s8 + $0xd0] ss:$8 sps:$4 sm:$0xff]  }
 0x559   : > { %1763 = vmatpush1.bf16.msra.mxu1 %v2754_v16  ;;  %v2801_v16 = vld [vmem:[%s3605_s8 + $0xd4] ss:$8 sps:$4 sm:$0xff]  }
 0x55a   : > { %1764 = vmatprep.subr.bf16.mxu1 %v2759_v18  ;;  %v2804_v18 = vld [vmem:[%s3605_s8 + $0xe4] ss:$8 sps:$4 sm:$0xff]  }
 0x55d   : > { %1765 = vmatpush1.bf16.msra.mxu1 %v2757_v19  ;;  %v2802_v19 = vld [vmem:[%s3605_s8 + $0xe0] ss:$8 sps:$4 sm:$0xff]  }
 0x5b0   : > { %v1464_v52 = vpop.xlane.xlu0 %1463 }
 0x5b1   : > { %v1468_v53 = vmul.f32 0.004115226, %v1464_v52 }
 0x5b2   : > { %v1467_v55 = vpop.xlane.xlu1 %1466 }
 0x5b3   : > { %v1470_v56 = vsub.f32 %v3311_v26, %v1468_v53  ;;  %v1471_v58 = vsub.f32 %v3308_v24, %v1468_v53  ;;  %v1469_v59 = vmul.f32 0.004115226, %v1467_v55  ;;  %v2768_v55 = vld [vmem:[%s3605_s8 + $0x24] ss:$8 sps:$4 sm:$0xff]  }
 0x5b4   : > { %2095 = vmatprep.subr.bf16.mxu0 %v2768_v55 }
 0x5b5   : > { %v1472_v61 = vsub.f32 %v3320_v30, %v1469_v59  ;;  %v1473_v54 = vsub.f32 %v3314_v28, %v1469_v59  ;;  %v1475_v62 = vsel %vm557_vm0, %v1471_v58, 0.0  ;;  %v1478_v63 = vmul.f32 %v1470_v56, %v1470_v56  ;;  %v2771_v58 = vld [vmem:[%s3605_s8 + $0x34] ss:$8 sps:$4 sm:$0xff]   ;;  %v2769_v59 = vld [vmem:[%s3605_s8 + $0x30] ss:$8 sps:$4 sm:$0xff]  }
 0x5b6   : > { %v1479_v1 = vmul.f32 %v1475_v62, %v1475_v62 }
 0x5b7   : > { %v1477_v50 = vsel %vm557_vm0, %v1473_v54, 0.0  ;;  %v1480_v6 = vmul.f32 %v1472_v61, %v1472_v61  ;;  %v2772_v54 = vld [vmem:[%s3605_s8 + $0x40] ss:$8 sps:$4 sm:$0xff]  }
 0x5b8   : > { %v1482_v8 = vadd.f32 %v1479_v1, %v1478_v63  ;;  %v1481_v60 = vmul.f32 %v1477_v50, %v1477_v50  ;;  %v2775_v63 = vld [vmem:[%s3605_s8 + $0x50] ss:$8 sps:$4 sm:$0xff]   ;;  %v2780_v1 = vld [vmem:[%s3605_s8 + $0x64] ss:$8 sps:$4 sm:$0xff]  }
 0x5ba   : > { %1483 = vadd.xlane.f32.xlu0 %v1482_v8  ;;  %v1485_v57 = vadd.f32 %v1481_v60, %v1480_v6  ;;  %v2783_v6 = vld [vmem:[%s3605_s8 + $0x74] ss:$8 sps:$4 sm:$0xff]   ;;  %v2781_v8 = vld [vmem:[%s3605_s8 + $0x70] ss:$8 sps:$4 sm:$0xff]   ;;  %v2786_v60 = vld [vmem:[%s3605_s8 + $0x84] ss:$8 sps:$4 sm:$0xff]  }
 0x5bc   : > { %1486 = vadd.xlane.f32.xlu1 %v1485_v57  ;;  %v2784_v57 = vld [vmem:[%s3605_s8 + $0x80] ss:$8 sps:$4 sm:$0xff]  }
 0x647   : > { %v1484_v25 = vpop.xlane.xlu0 %1483 }
 0x648   : > { %v1488_v27 = vmul.f32 0.004115226, %v1484_v25  ;;  %v1571_v25 = vrot.slane %v1562_v22, %v3188_v42 }
 0x649   : > { %v1487_v29 = vpop.xlane.xlu1 %1486 }
 0x64a   : > { %v1490_v31 = vadd.f32 1e-05, %v1488_v27  ;;  %v1489_v4 = vmul.f32 0.004115226, %v1487_v29 }
 0x64c   : > { %2820 = vrsqrt.f32 %v1490_v31  ;;  %v1491_v3 = vadd.f32 1e-05, %v1489_v4 }
 0x64e   : > { %2822 = vrsqrt.f32 %v1491_v3 }
 0x656   : > { %v2821_v34 = vpop.eup %2820 }
 0x657   : > { %v1494_v35 = vmul.f32 %v2821_v34, %v1470_v56  ;;  %v1495_v36 = vmul.f32 %v2821_v34, %v1475_v62  ;;  %v2766_v56 = vld [vmem:[%s3605_s8 + $0x20] ss:$8 sps:$4 sm:$0xff]   ;;  %v2777_v62 = vld [vmem:[%s3605_s8 + $0x54] ss:$8 sps:$4 sm:$0xff]  }
 0x658   : > { %v2823_v37 = vpop.eup %2822  ;;  %2096 = vmatpush1.bf16.msra.mxu0 %v2766_v56 }
 0x659   : > { %v1496_v40 = vmul.f32 %v2823_v37, %v1472_v61  ;;  %v1497_v43 = vmul.f32 %v2823_v37, %v1477_v50  ;;  %v1510_v44 = vmul.f32 %v1506_v33, %v1495_v36  ;;  %v1509_v45 = vmul.f32 %v1502_v5, %v1494_v35  ;;  %2097 = vmatprep.subr.bf16.mxu0 %v2771_v58  ;;  %v2774_v61 = vld [vmem:[%s3605_s8 + $0x44] ss:$8 sps:$4 sm:$0xff]   ;;  %v2778_v50 = vld [vmem:[%s3605_s8 + $0x60] ss:$8 sps:$4 sm:$0xff]  }
 0x65b   : > { %v1512_v46 = vmul.f32 %v1506_v33, %v1497_v43  ;;  %v1511_v47 = vmul.f32 %v1502_v5, %v1496_v40  ;;  %v1525_v0 = vadd.f32 %v1521_v39, %v1510_v44  ;;  %v1524_v49 = vadd.f32 %v1517_v38, %v1509_v45 }
 0x65c   : > { %2098 = vmatpush1.bf16.msra.mxu0 %v2769_v59 }
 0x65d   : > { %v1527_v48 = vadd.f32 %v1521_v39, %v1512_v46  ;;  %v1526_v51 = vadd.f32 %v1517_v38, %v1511_v47  ;;  %2099 = vmatprep.subr.bf16.mxu0 %v2774_v61 }
 0x65f   : > { %v1529_v52 = vpack.c.bf16 %v1527_v48, %v1525_v0  ;;  %v1528_v53 = vpack.c.bf16 %v1526_v51, %v1524_v49 }
 0x660   : > { %2100 = vmatpush1.bf16.msra.mxu0 %v2772_v54 }
 0x661   : > { %1766 = vmatprep.mubr.bf16.mxu1 %v1529_v52  ;;  %2101 = vmatprep.subr.bf16.mxu0 %v2777_v62 }
 0x662   : > { %1767 = vmatmul.mubr.bf16.vlgmr.msra.gmra.mrb[12].mxu1 %v1528_v53 }
 0x664   : > { %2102 = vmatpush1.bf16.msra.mxu0 %v2775_v63 }
 0x665   : > { %2103 = vmatprep.subr.bf16.mxu0 %v2780_v1 }
 0x668   : > { %2104 = vmatpush1.bf16.msra.mxu0 %v2778_v50 }
 0x669   : > { %2105 = vmatprep.subr.bf16.mxu0 %v2783_v6 }
 0x66c   : > { %2106 = vmatpush1.bf16.msra.mxu0 %v2781_v8 }
 0x66d   : > { %2107 = vmatprep.subr.bf16.mxu0 %v2786_v60 }
 0x670   : > { %2108 = vmatpush1.bf16.msra.mxu0 %v2784_v57 }
 0x671   : > { %2109 = vmatprep.subr.bf16.mxu0 %v2789_v9 }
 0x674   : > { %2110 = vmatpush1.bf16.msra.mxu0 %v2787_v10 }
 0x675   : > { %2111 = vmatprep.subr.bf16.mxu0 %v2792_v2 }
 0x678   : > { %2112 = vmatpush1.bf16.msra.mxu0 %v2790_v11 }
 0x679   : > { %2113 = vmatprep.subr.bf16.mxu0 %v2795_v12 }
 0x67c   : > { %2114 = vmatpush1.bf16.msra.mxu0 %v2793_v13 }
 0x67d   : > { %2115 = vmatprep.subr.bf16.mxu0 %v2798_v14 }
 0x680   : > { %2116 = vmatpush1.bf16.msra.mxu0 %v2796_v15 }
 0x681   : > { %2117 = vmatprep.subr.bf16.mxu0 %v2801_v16 }
 0x684   : > { %2118 = vmatpush1.bf16.msra.mxu0 %v2799_v17 }
 0x685   : > { %2119 = vmatprep.subr.bf16.mxu0 %v2804_v18 }
 0x688   : > { %2120 = vmatpush1.bf16.msra.mxu0 %v2802_v19 }
 0x689   : > { %2121 = vmatprep.subr.bf16.mxu0 %v2807_v20 }
 0x68c   : > { %2122 = vmatpush1.bf16.msra.mxu0 %v2805_v21 }
 0x735   : > { %v1768_v27 = vpop.f32.mrb[12].mxu1 }
 0x736   : > { %v3542_v29 = vadd.f32 %v1768_v27, %v1567_v23  ;;  %v1770_v31 = vpop.f32.mrb[13].mxu1 }
 0x737   : > { %v3544_v4 = vadd.f32 %v1770_v31, %v1571_v25  ;;  %v1772_v3 = vpop.f32.mrb[14].mxu1 }
 0x738   : > { %v3547_v7 = vmul.f32 0.70710677, %v3542_v29  ;;  %v3549_v32 = vadd.f32 %v1772_v3, %v1567_v23  ;;  %v1774_v5 = vpop.f32.mrb[15].mxu1 }
 0x739   : > { %v3552_v33 = vmul.f32 0.70710677, %v3544_v4  ;;  %v3554_v34 = vadd.f32 %v1774_v5, %v1571_v25 }
 0x73a   : > { %v1785_v35 = vand.u32 2147483647, %v3547_v7  ;;  %v3558_v36 = vmul.f32 0.70710677, %v3549_v32  ;;  %vm1865_vm2 = vcmp.ge.f32.partialorder %v3547_v7, 0.0 }
 0x73b   : > { %v1786_v37 = vand.u32 2147483647, %v3552_v33  ;;  %v3562_v38 = vmul.f32 0.70710677, %v3554_v34  ;;  %vm1866_vm3 = vcmp.ge.f32.partialorder %v3552_v33, 0.0 }
 0x73c   : > { %v1789_v39 = vmul.f32 0.3275911, %v1785_v35  ;;  %v1787_v40 = vand.u32 2147483647, %v3558_v36  ;;  %v1841_v51 = vsub.f32 0.0, %v1785_v35  ;;  %vm1867_vm4 = vcmp.ge.f32.partialorder %v3558_v36, 0.0 }
 0x73d   : > { %v1790_v43 = vmul.f32 0.3275911, %v1786_v37  ;;  %v1788_v44 = vand.u32 2147483647, %v3562_v38  ;;  %v1842_v52 = vsub.f32 0.0, %v1786_v37  ;;  %vm1868_vm5 = vcmp.ge.f32.partialorder %v3562_v38, 0.0 }
 0x73e   : > { %v1793_v45 = vadd.f32 1.0, %v1789_v39  ;;  %v1791_v46 = vmul.f32 0.3275911, %v1787_v40  ;;  %v1845_v55 = vmul.f32 %v1841_v51, %v1785_v35  ;;  %v1843_v56 = vsub.f32 0.0, %v1787_v40 }
 0x73f   : > { %v1794_v47 = vadd.f32 1.0, %v1790_v43  ;;  %v1792_v0 = vmul.f32 0.3275911, %v1788_v44  ;;  %v1846_v61 = vmul.f32 %v1842_v52, %v1786_v37  ;;  %v1844_v62 = vsub.f32 0.0, %v1788_v44 }
 0x740   : > { %2824 = vrcp.f32 %v1793_v45  ;;  %v1795_v48 = vadd.f32 1.0, %v1791_v46  ;;  %v1849_v50 = vmul.f32 1.442695, %v1845_v55  ;;  %v1847_v8 = vmul.f32 %v1843_v56, %v1787_v40 }
 0x741   : > { %2826 = vrcp.f32 %v1794_v47  ;;  %v1796_v49 = vadd.f32 1.0, %v1792_v0  ;;  %v1851_v57 = vmul.f32 1.442695, %v1846_v61  ;;  %v1848_v11 = vmul.f32 %v1844_v62, %v1788_v44 }
 0x742   : > { %2828 = vrcp.f32 %v1795_v48  ;;  %v1853_v16 = vmul.f32 1.442695, %v1847_v8 }
 0x743   : > { %2830 = vrcp.f32 %v1796_v49  ;;  %v1855_v21 = vmul.f32 1.442695, %v1848_v11 }
 0x744   : > { %2832 = vpow2.f32 %v1849_v50 }
 0x745   : > { %2834 = vpow2.f32 %v1851_v57 }
 0x746   : > { %2836 = vpow2.f32 %v1853_v16  ;;  %v1778_v16 = vmul.f32 0.5, %v3544_v4 }
 0x747   : > { %2838 = vpow2.f32 %v1855_v21 }
 0x74a   : > { %v2825_v53 = vpop.eup %2824 }
 0x74b   : > { %v2827_v58 = vpop.eup %2826  ;;  %v1805_v59 = vmul.f32 1.0614054, %v2825_v53 }
 0x74c   : > { %v1806_v54 = vmul.f32 1.0614054, %v2827_v58  ;;  %v2829_v1 = vpop.eup %2828 }
 0x74d   : > { %v2499_v63 = vadd.f32 -1.4531521, %v1805_v59  ;;  %v1807_v9 = vmul.f32 1.0614054, %v2829_v1  ;;  %v2831_v10 = vpop.eup %2830 }
 0x74e   : > { %v2500_v6 = vadd.f32 -1.4531521, %v1806_v54  ;;  %v1808_v14 = vmul.f32 1.0614054, %v2831_v10  ;;  %v2833_v47 = vpop.eup %2832 }
 0x74f   : > { %v1813_v60 = vmul.f32 %v2825_v53, %v2499_v63  ;;  %v2501_v13 = vadd.f32 -1.4531521, %v1807_v9  ;;  %v2835_v48 = vpop.eup %2834 }
 0x750   : > { %v1814_v2 = vmul.f32 %v2827_v58, %v2500_v6  ;;  %v2502_v19 = vadd.f32 -1.4531521, %v1808_v14  ;;  %v2837_v54 = vpop.eup %2836 }
 0x751   : > { %v1817_v12 = vadd.f32 1.4214138, %v1813_v60  ;;  %v1815_v18 = vmul.f32 %v2829_v1, %v2501_v13  ;;  %v2839_v8 = vpop.eup %2838 }
 0x752   : > { %v1818_v15 = vadd.f32 1.4214138, %v1814_v2  ;;  %v1816_v25 = vmul.f32 %v2831_v10, %v2502_v19  ;;  %v1780_v19 = vmul.f32 0.5, %v3554_v34 }
 0x753   : > { %v1821_v17 = vmul.f32 %v2825_v53, %v1817_v12  ;;  %v1819_v23 = vadd.f32 1.4214138, %v1815_v18 }
 0x754   : > { %v1822_v20 = vmul.f32 %v2827_v58, %v1818_v15  ;;  %v1820_v5 = vadd.f32 1.4214138, %v1816_v25  ;;  %v1779_v15 = vmul.f32 0.5, %v3549_v32  ;;  %v1919_v32 = vld [vmem:[%s3606_s9] sm:$0x3] }
 0x755   : > { %v2503_v22 = vadd.f32 -0.28449672, %v1821_v17  ;;  %v1823_v3 = vmul.f32 %v2829_v1, %v1819_v23  ;;  %v1924_v38 = vrot.slane %v1919_v32, %v3186_v41  ;;  %v1928_v4 = vrot.slane %v1919_v32, %v3188_v42 }
 0x756   : > { %v2504_v27 = vadd.f32 -0.28449672, %v1822_v20  ;;  %v1824_v40 = vmul.f32 %v2831_v10, %v1820_v5 }
 0x757   : > { %v1829_v31 = vmul.f32 %v2825_v53, %v2503_v22  ;;  %v2505_v39 = vadd.f32 -0.28449672, %v1823_v3 }
 0x758   : > { %v1830_v35 = vmul.f32 %v2827_v58, %v2504_v27  ;;  %v2506_v46 = vadd.f32 -0.28449672, %v1824_v40 }
 0x759   : > { %v1833_v37 = vadd.f32 0.2548296, %v1829_v31  ;;  %v1831_v45 = vmul.f32 %v2829_v1, %v2505_v39 }
 0x75a   : > { %v1834_v43 = vadd.f32 0.2548296, %v1830_v35  ;;  %v1832_v52 = vmul.f32 %v2831_v10, %v2506_v46 }
 0x75b   : > { %v1837_v44 = vmul.f32 %v2825_v53, %v1833_v37  ;;  %v1835_v51 = vadd.f32 0.2548296, %v1831_v45 }
 0x75c   : > { %v1838_v0 = vmul.f32 %v2827_v58, %v1834_v43  ;;  %v1836_v61 = vadd.f32 0.2548296, %v1832_v52 }
 0x75d   : > { %v1857_v49 = vmul.f32 %v2833_v47, %v1837_v44  ;;  %v1839_v59 = vmul.f32 %v2829_v1, %v1835_v51  ;;  %v1777_v1 = vmul.f32 0.5, %v3542_v29 }
 0x75e   : > { %v1858_v55 = vmul.f32 %v2835_v48, %v1838_v0  ;;  %v1840_v6 = vmul.f32 %v2831_v10, %v1836_v61 }
 0x75f   : > { %v1861_v56 = vsub.f32 1.0, %v1857_v49  ;;  %v1859_v50 = vmul.f32 %v2837_v54, %v1839_v59 }
 0x760   : > { %v1862_v62 = vsub.f32 1.0, %v1858_v55  ;;  %v1860_v58 = vmul.f32 %v2839_v8, %v1840_v6 }
 0x761   : > { %v1869_v63 = vsub.f32 0.0, %v1861_v56  ;;  %v1863_v57 = vsub.f32 1.0, %v1859_v50 }
 0x762   : > { %v1870_v53 = vsub.f32 0.0, %v1862_v62  ;;  %v1864_v11 = vsub.f32 1.0, %v1860_v58 }
 0x763   : > { %v1873_v60 = vsel %vm1865_vm2, %v1861_v56, %v1869_v63  ;;  %v1871_v2 = vsub.f32 0.0, %v1863_v57 }
 0x764   : > { %v1874_v9 = vsel %vm1866_vm3, %v1862_v62, %v1870_v53  ;;  %v1877_v12 = vadd.f32 1.0, %v1873_v60  ;;  %v1872_v14 = vsub.f32 0.0, %v1864_v11 }
 0x765   : > { %v1875_v13 = vsel %vm1867_vm4, %v1863_v57, %v1871_v2  ;;  %v1878_v10 = vadd.f32 1.0, %v1874_v9 }
 0x766   : > { %v1879_v7 = vadd.f32 1.0, %v1875_v13  ;;  %v1876_v17 = vsel %vm1868_vm5, %v1864_v11, %v1872_v14  ;;  %v1881_v33 = vmul.f32 %v1877_v12, %v1777_v1 }
 0x767   : > { %v1880_v20 = vadd.f32 1.0, %v1876_v17  ;;  %v1882_v36 = vmul.f32 %v1878_v10, %v1778_v16 }
 0x768   : > { %v1883_v18 = vmul.f32 %v1879_v7, %v1779_v15 }
 0x769   : > { %v1884_v29 = vmul.f32 %v1880_v20, %v1780_v19 }
 0x76a   : > { %v1885_v21 = vpack.c.bf16 %v1883_v18, %v1881_v33 }
 0x76b   : > { %v1886_v22 = vpack.c.bf16 %v1884_v29, %v1882_v36 }
 0x76d   : > { %2123 = vmatprep.mubr.bf16.mxu0 %v1886_v22 }
 0x76e   : > { %2124 = vmatmul.mubr.bf16.vlgmr.msra.gmra.mrb[8].mxu0 %v1885_v21 }
 0x841   : > { %v2125_v23 = vpop.f32.mrb[8].mxu0 }
 0x842   : > { %v2126_v25 = vadd.f32 %v2125_v23, %v1924_v38  ;;  %v2127_v27 = vpop.f32.mrb[9].mxu0 }
 0x843   : > { %v2128_v34 = vadd.f32 %v2127_v27, %v1928_v4  ;;  %v2129_v31 = vpop.f32.mrb[10].mxu0 }
 0x844   : > { %v2134_v3 = vadd.f32 %v2126_v25, %v3311_v26  ;;  %v2130_v5 = vadd.f32 %v2129_v31, %v1924_v38  ;;  %v2131_v35 = vpop.f32.mrb[11].mxu0 }
 0x845   : > { %v2135_v37 = vadd.f32 %v2128_v34, %v3308_v24  ;;  %v2132_v39 = vadd.f32 %v2131_v35, %v1928_v4 }
 0x846   : > { %2149 = vst [vmem:[%s533_s25] sm:$0xff] %v2134_v3  ;;  %v2136_v41 = vadd.f32 %v2130_v5, %v3320_v30 }
 0x847   : > { %2150 = vst [vmem:[%s533_s25 + $0x8] sm:$0xff] %v2135_v37  ;;  %v2137_v42 = vadd.f32 %v2132_v39, %v3314_v28 }
 0x848   : > { %2151 = vst [vmem:[%s533_s25 + $0x10] sm:$0xff] %v2136_v41 }
 0x849   : > { %2152 = vst [vmem:[%s533_s25 + $0x18] sm:$0xff] %v2137_v42 }
 0x84a PF: > { %s20_s15 = sadd.s32 1, %s2862_s15   ;;  %s3608_s13 = smov %s2858_s14 }
 0x84b   : > { %p17_p5 = scmp.ge.s32.totalorder %s20_s15, 4   ;;  %s3609_s14 = smov %s3611_s16 }
 0x84d   :  { %19 = sbr.rel (!%p17_p5) target bundleno = 2 (0x2), region = 125 }

// kernel: fwd.9
= control target key start
LH: loop header
LB: loop body
LE: loop exit
PB: predicated region body
PF: predicated region fallthrough
CT: control target
= control target key end

     0   :  { %v25_v1 = vlaneseq  ;;  %vm29_vm0 = vcmask 1041408   ;;  %s347_s0 = inlined_call_operand.vmem [shape: f32[2,128], index: 0, kind: input, shape index: {}]   ;;  %s348_s1 = inlined_call_operand.vmem [shape: f32[1,128], index: 1, kind: input, shape index: {}]   ;;  %s349_s2 = inlined_call_operand.vmem [shape: f32[1,128], index: 2, kind: input, shape index: {}]   ;;  %s350_s3 = inlined_call_operand.vmem [shape: bf16[128,128], index: 3, kind: input, shape index: {}]   ;;  %s351_s4 = inlined_call_operand.vmem [shape: f32[1,128], index: 4, kind: input, shape index: {}]   ;;  %s352_s5 = inlined_call_operand.hbm [shape: f32[2,128], index: 5, kind: output, shape index: {}]  }
   0x1   :  { %v22_v0 = vld [vmem:[%s347_s0] sm:$0x3] }
   0x2   :  { %v26_v2 = vand.u32 127, %v25_v1 }
   0x4   :  { %vm27_vm1 = vcmp.lt.s32.totalorder %v26_v2, 32 }
   0x5   :  { %v28_v3 = vsel %vm27_vm1, %v22_v0, 0.0 }
   0x6   :  { %v30_v4 = vsel %vm29_vm0, %v28_v3, 0.0 }
   0x7   :  { %31 = vadd.xlane.f32.xlu0 %v30_v4 }
   0x8   :  { %10 = vsyncpa [#allocation3], 0  ;;  %v228_v5 = vld [vmem:[%s350_s3] sm:$0xff]   ;;  %v262_v6 = vmov 0.0   ;;  %v229_v7 = vld [vmem:[%s350_s3 + $0x8] sm:$0xff]   ;;  %vm263_vm2 = vmmov 0  }
   0x9   :  { %205 = vmatprep.subr.bf16.mxu0 %v262_v6  ;;  %v230_v14 = vld [vmem:[%s350_s3 + $0x10] sm:$0xff]   ;;  %v231_v15 = vld [vmem:[%s350_s3 + $0x18] sm:$0xff]   ;;  %v232_v16 = vld [vmem:[%s350_s3 + $0x20] sm:$0xff]   ;;  %221 = vmatprep.mubr.msk.bf16.mxu0 %vm263_vm2, %v262_v6  ;;  %s264_s15 = smov [#allocation2]  }
   0xa   :  { %206 = vmatpush3.bf16.msra.mxu0 %v228_v5  ;;  %v233_v17 = vld [vmem:[%s350_s3 + $0x28] sm:$0xff]   ;;  %v234_v18 = vld [vmem:[%s350_s3 + $0x30] sm:$0xff]   ;;  %v235_v19 = vld [vmem:[%s350_s3 + $0x38] sm:$0xff]   ;;  %s177_s16 = sshll.u32 %s264_s15, 4  ;;  %s178_s16 = int_to_ptr.vmem [resolvable:$true] %s177_s16 }
   0xb   :  { %207 = vmatprep.subr.bf16.mxu0 %v262_v6  ;;  %v185_v24 = vld [vmem:[%s348_s1] ss:$0 sm:$0xff]  ;;  %s238_s1 = scalar_lea.vmem %s178_s16, 32  ;;  %p243_p1 = scmp.lt.s32.totalorder %s178_s16, %s178_s16 }
   0xc   :  { %v186_v26 = vld [vmem:[%s349_s2] ss:$0 sm:$0xff]  ;;  %p239_p0 = scmp.ne.s32.totalorder %s178_s16, %s238_s1  ;;  %p244_p2 = scmp.lt.s32.totalorder %s238_s1, %s238_s1 }
   0xd   :  { %v187_v30 = vld [vmem:[%s351_s4] ss:$0 sm:$0xff] }
   0xe   :  { %208 = vmatpush3.bf16.msra.mxu0 %v229_v7  ;;  %p245_p3 = por %p244_p2, %p243_p1 }
   0xf   :  { %209 = vmatprep.subr.bf16.mxu0 %v262_v6 }
  0x10   :  { %p246_p4 = pnand %p245_p3, %p239_p0 }
  0x12   :  { %210 = vmatpush3.bf16.msra.mxu0 %v230_v14 }
  0x13   :  { %211 = vmatprep.subr.bf16.mxu0 %v262_v6 }
  0x16   :  { %212 = vmatpush3.bf16.msra.mxu0 %v231_v15 }
  0x17   :  { %213 = vmatprep.subr.bf16.mxu0 %v262_v6 }
  0x1a   :  { %214 = vmatpush3.bf16.msra.mxu0 %v232_v16 }
  0x1b   :  { %215 = vmatprep.subr.bf16.mxu0 %v262_v6 }
  0x1e   :  { %216 = vmatpush3.bf16.msra.mxu0 %v233_v17 }
  0x1f   :  { %217 = vmatprep.subr.bf16.mxu0 %v262_v6 }
  0x22   :  { %218 = vmatpush3.bf16.msra.mxu0 %v234_v18 }
  0x23   :  { %219 = vmatprep.subr.bf16.mxu0 %v262_v6 }
  0x26   :  { %220 = vmatpush3.bf16.msra.mxu0 %v235_v19 }
  0x94   :  { %v32_v8 = vpop.xlane.xlu0 %31 }
  0x95   :  { %v33_v9 = vmul.f32 0.03125, %v32_v8 }
  0x97   :  { %v34_v10 = vsub.f32 %v22_v0, %v33_v9 }
  0x99   :  { %v35_v11 = vsel %vm27_vm1, %v34_v10, 0.0 }
  0x9a   :  { %v36_v12 = vmul.f32 %v35_v11, %v35_v11 }
  0x9c   :  { %v37_v13 = vsel %vm29_vm0, %v36_v12, 0.0 }
  0x9d   :  { %38 = vadd.xlane.f32.xlu0 %v37_v13 }
 0x12a   :  { %v39_v20 = vpop.xlane.xlu0 %38 }
 0x12b   :  { %v40_v21 = vmul.f32 0.03125, %v39_v20 }
 0x12d   :  { %v41_v22 = vadd.f32 1e-05, %v40_v21 }
 0x12f   :  { %236 = vrsqrt.f32 %v41_v22 }
 0x139   :  { %v237_v23 = vpop.eup %236 }
 0x13a   :  { %v43_v25 = vmul.f32 %v237_v23, %v35_v11 }
 0x13c   :  { %v50_v27 = vmul.f32 %v185_v24, %v43_v25 }
 0x13e   :  { %v57_v28 = vadd.f32 %v186_v26, %v50_v27 }
 0x140   :  { %v58_v29 = vpack.c.bf16 %v57_v28, %v57_v28 }
 0x142   :  { %222 = vmatmul.mubr.bf16.vlgmr.msra.gmra.mrb[0].mxu0 %v58_v29 }
 0x215   :  { %v164_v31 = vpop.f32.mrb[0].mxu0 }
 0x216   :  { %v165_v32 = vadd.f32 %v187_v30, %v164_v31  ;;  %v223_v33 = vpop.f32.mrb[1].mxu0 }
 0x217   :  { %v167_v34 = vpop.f32.mrb[2].mxu0 }
 0x218   :  { %170 = vst [vmem:[#allocation2] sm:$0x3] %v165_v32  ;;  %v224_v35 = vpop.f32.mrb[3].mxu0 }
 0x219   :  { %249 = shalt.err (!%p246_p4)
}
 0x21a   :  { %s250_s4 = scalar_lea.hbm %s352_s5, 32 }
 0x21b   :  { %p251_p5 = scmp.ne.s32.totalorder %s352_s5, %s250_s4  ;;  %p254_p6 = scmp.lt.u32.totalorder %s250_s4, %s352_s5 }
 0x21d   :  { %p256_p7 = pnand %p254_p6, %p251_p5 }
 0x21f   :  { %259 = shalt.err (!%p256_p7)
}
 0x220   :  { %180 = dma.vmem_to_hbm [thread:$0]  %s178_s16, 32, %s352_s5, [#allocation3]  }
 0x221   :  { %260 = dma.done.wait [#allocation3], 32  }
 0x222   :  { %261 = vsyncadd [#allocation3], 4294967264 }
 0x223   :  { %184 = vsyncpa [#allocation3], 1 }

// kernel: fwd.8
= control target key start
LH: loop header
LB: loop body
LE: loop exit
PB: predicated region body
PF: predicated region fallthrough
CT: control target
= control target key end

     0   :  { %s2449_s21 = smov 0   ;;  %s2451_s22 = smov 0   ;;  %s2801_s0 = inlined_call_operand.vmem [shape: f32[2,17,128], index: 0, kind: input, shape index: {}]   ;;  %s2802_s1 = inlined_call_operand.vmem [shape: f32[2,1,128], index: 1, kind: input, shape index: {}, may-alias: {1,6}]   ;;  %s2803_s2 = inlined_call_operand.vmem [shape: f32[2,1,128], index: 2, kind: input, shape index: {}, may-alias: {2,7,11}]   ;;  %s2804_s3 = inlined_call_operand.vmem [shape: bf16[2,128,384], index: 3, kind: input, shape index: {}]   ;;  %s2805_s4 = inlined_call_operand.vmem [shape: bf16[2,32,128], index: 4, kind: input, shape index: {}]   ;;  %s2806_s5 = inlined_call_operand.vmem [shape: f32[2,1,128], index: 5, kind: input, shape index: {}]   ;;  %s2807_s6 = inlined_call_operand.vmem [shape: f32[2,1,128], index: 6, kind: input, shape index: {}, may-alias: {1,6}]   ;;  %s2808_s7 = inlined_call_operand.vmem [shape: f32[2,1,128], index: 7, kind: input, shape index: {}, may-alias: {2,7,11}]   ;;  %s2809_s8 = inlined_call_operand.vmem [shape: bf16[2,128,128], index: 8, kind: input, shape index: {}]   ;;  %s2810_s9 = inlined_call_operand.vmem [shape: f32[2,1,128], index: 9, kind: input, shape index: {}]   ;;  %s2811_s10 = inlined_call_operand.vmem [shape: bf16[2,128,128], index: 10, kind: input, shape index: {}]   ;;  %s2812_s11 = inlined_call_operand.vmem [shape: f32[2,1,128], index: 11, kind: input, shape index: {}, may-alias: {2,7,11}]   ;;  %s2813_s12 = inlined_call_operand.vmem [shape: f32[2,17,128], index: 12, kind: output, shape index: {}]  }
   0x1   :  { %2818 = sst [smem:[#allocation9_spill]] %s2801_s0  ;;  %s2453_s23 = smov 0  }
   0x2   :  { %2819 = sst [smem:[#allocation10_spill]] %s2804_s3  ;;  %s2455_s24 = smov 0  }
   0x3   :  { %2820 = sst [smem:[#allocation11_spill]] %s2805_s4  ;;  %s2457_s25 = smov 0  }
   0x4   :  { %2821 = sst [smem:[#allocation12_spill]] %s2813_s12 }
   0x5 LB: > { %2822 = sst [smem:[#allocation3_spill]] %s2363_s21  ;;  %s31_s26 = sadd.s32 1, %s2371_s23  ;;  %s2379_s25 = sphi %s2457_s25, %s22_s25   ;;  %s2375_s24 = sphi %s2455_s24, %s2843_s24   ;;  %s2371_s23 = sphi %s2453_s23, %s2842_s23   ;;  %s2367_s22 = sphi %s2451_s22, %s2841_s22   ;;  %s2363_s21 = sphi %s2449_s21, %s2840_s21  }
   0x6   : > { %2823 = sst [smem:[#allocation4_spill]] %s2371_s23  ;;  %s34_s27 = sadd.s32 1, %s2375_s24 }
   0x7   : > { %2824 = sst [smem:[#allocation5_spill]] %s2375_s24  ;;  %p32_p0 = scmp.ge.s32.totalorder %s31_s26, 2 }
   0x8   : > { %2825 = sst [smem:[#allocation6_spill]] %s2379_s25  ;;  %p1957_p1 = scmp.ge.s32.totalorder %s2379_s25, 1 }
   0x9   : > { %p470_p2 = scmp.lt.s32.totalorder %s2379_s25, 5  ;;  %s2845_s26 = smov (%p32_p0, %s31_s26), 0 }
   0xa   : > { %2826 = sst [smem:[#allocation7_spill]] %s2845_s26  ;;  %s2847_s27 = smov (!%p32_p0, %s34_s27), %s2375_s24 }
   0xb   : > { %p471_p3 = pnand %p1957_p1, %p470_p2  ;;  %p36_p4 = scmp.ge.s32.totalorder %s2847_s27, 2 }
   0xc   : > { %p553_p5 = scmp.lt.s32.totalorder (!%p471_p3), %s2367_s22, 1  ;;  %p558_p6 = scmp.lt.s32.totalorder (!%p471_p3), %s2363_s21, 1 }
   0xd   : > { %s2849_s27 = smov (%p36_p4, %s2847_s27), 0  ;;  %474 = sbr.rel (%p471_p3) target bundleno = 3048 (0xbe8), region = 68 }
   0xe   : > { %2827 = sst [smem:[#allocation8_spill]] %s2849_s27  ;;  %s2828_s0 = sld [smem:[#allocation9_spill]] (!%p471_p3) }
   0xf   : > { %s2829_s3 = sld [smem:[#allocation10_spill]] (!%p471_p3)  ;;  %s2830_s4 = sld [smem:[#allocation11_spill]] (!%p471_p3) }
  0x10   : > { %s2831_s18 = sld [smem:[#allocation12_spill]] (!%p471_p3)  ;;  %s2832_s25 = sld [smem:[#allocation3_spill]] (!%p471_p3) }
  0x14   : > { %s2851_s22 = smov (!%p553_p5, %s2367_s22), 1 }
  0x15   : > { %s2483_s28 = scalar_select %p558_p6, %s2363_s21, 1 }
  0x16   : > { %s2193_s29 = smul.u32 24, %s2851_s22  ;;  %p1967_p7 = scmp.ne.s32.totalorder %s2832_s25, 0 }
  0x17   : > { %s2194_s27 = smul.u32 192, %s2483_s28  ;;  %s2036_s26 = sshll.u32 %s2483_s28, 4 }
  0x18   : > { %s557_s20 = scalar_lea.vmem %s2828_s0, %s2193_s29  ;;  %s2510_s15 = scalar_lea.vmem %s2830_s4, %s2036_s26 }
  0x19   : > { %s2505_s12 = scalar_lea.vmem %s2829_s3, %s2194_s27  ;;  %s2037_s23 = sshll.u32 %s2483_s28, 6  ;;  %v609_v0 = vld [vmem:[%s557_s20] sm:$0xff] (!%p1967_p7)  ;;  %v610_v1 = vld [vmem:[%s557_s20 + $0x8] sm:$0xff] (!%p1967_p7)  ;;  %v611_v2 = vld [vmem:[%s557_s20 + $0x10] sm:$0x1] (!%p1967_p7) }
  0x1a   : > { %s590_s21 = scalar_lea.vmem %s2810_s9, %s2483_s28  ;;  %s2528_s3 = scalar_lea.vmem %s2809_s8, %s2037_s23  ;;  %612 = vst [vmem:[#allocation2] sm:$0xff] (!%p1967_p7), %v609_v0  ;;  %613 = vst [vmem:[#allocation2 + $0x8] sm:$0xff] (!%p1967_p7), %v610_v1 }
  0x1b   : > { %s2533_s13 = scalar_lea.vmem %s2811_s10, %s2037_s23  ;;  %s598_s14 = scalar_lea.vmem %s2812_s11, %s2483_s28  ;;  %614 = vst [vmem:[#allocation2 + $0x10] sm:$0x1] (!%p1967_p7), %v611_v2 }
  0x1c   : > { %s2542_s4 = scalar_lea.vmem %s2831_s18, %s2193_s29  ;;  %608 = sbr.rel (%p1967_p7) target bundleno = 35 (0x23), region = 72 }
  0x23 PF: > { %v2545_v3 = vld [vmem:[#allocation2] sm:$0xff]  ;;  %v620_v4 = vlaneseq  ;;  %v2547_v5 = vld [vmem:[#allocation2 + $0x10] sm:$0x1]  ;;  %v2551_v7 = vld [vmem:[#allocation2 + $0x8] sm:$0xff]  ;;  %vm630_vm0 = vcmask 1040384   ;;  %v2381_v48 = vmov 0   ;;  %s2833_s29 = scalar_lea.vmem %s2802_s1, %s2483_s28  ;;  %s2834_s23 = scalar_lea.vmem %s2803_s2, %s2483_s28 }
  0x24   : > { %v2243_v12 = vld [vmem:[%s2505_s12 + $0x4] ss:$12 sps:$4 sm:$0xff]   ;;  %v2245_v13 = vld [vmem:[%s2505_s12] ss:$12 sps:$4 sm:$0xff]   ;;  %v2246_v14 = vld [vmem:[%s2505_s12 + $0x8] ss:$12 sps:$4 sm:$0xff]   ;;  %877 = vmatprep.mubr.bf16.mxu0 %v2381_v48  ;;  %s2835_s26 = scalar_lea.vmem %s2806_s5, %s2483_s28  ;;  %s2836_s17 = scalar_lea.vmem %s2807_s6, %s2483_s28 }
  0x25   : > { %v2549_v6 = vand.u32 127, %v620_v4  ;;  %v2247_v15 = vld [vmem:[%s2505_s12 + $0x1c] ss:$12 sps:$4 sm:$0xff]   ;;  %845 = vmatprep.subr.bf16.mxu0 %v2243_v12  ;;  %2089 = vmatprep.subr.bf16.mxu1 %v2246_v14  ;;  %v2249_v32 = vld [vmem:[%s2505_s12 + $0x18] ss:$12 sps:$4 sm:$0xff]   ;;  %vm948_vm2 = vcmask 130048   ;;  %s2837_s25 = scalar_lea.vmem %s2808_s7, %s2483_s28 }
  0x26   : > { %846 = vmatpush1.bf16.msra.mxu0 %v2245_v13  ;;  %2090 = vmatpush3.bf16.msra.mxu1 %v2246_v14  ;;  %v2250_v33 = vld [vmem:[%s2505_s12 + $0x20] ss:$12 sps:$4 sm:$0xff]   ;;  %v2253_v35 = vld [vmem:[%s2505_s12 + $0x30] ss:$12 sps:$4 sm:$0xff]   ;;  %v2254_v36 = vld [vmem:[%s2505_s12 + $0x38] ss:$12 sps:$4 sm:$0xff]  }
  0x27   : > { %vm622_vm1 = vcmp.lt.s32.totalorder %v2549_v6, 32  ;;  %847 = vmatprep.subr.bf16.mxu0 %v2247_v15  ;;  %2091 = vmatprep.subr.bf16.mxu1 %v2250_v33  ;;  %v2251_v34 = vld [vmem:[%s2505_s12 + $0x34] ss:$12 sps:$4 sm:$0xff]   ;;  %v2255_v37 = vld [vmem:[%s2505_s12 + $0x4c] ss:$12 sps:$4 sm:$0xff]   ;;  %vm1009_vm3 = vcmask 138240  }
  0x28   : > { %v623_v8 = vsel %vm622_vm1, %v2545_v3, 0.0  ;;  %v625_v9 = vsel %vm622_vm1, %v2547_v5, 0.0  ;;  %v624_v11 = vsel %vm622_vm1, %v2551_v7, 0.0  ;;  %v2257_v38 = vld [vmem:[%s2505_s12 + $0x48] ss:$12 sps:$4 sm:$0xff]   ;;  %vm1016_vm4 = vcmask 131072  }
  0x29   : > { %626 = vadd.xlane.f32.xlu0 %v623_v8  ;;  %v631_v10 = vsel %vm630_vm0, %v625_v9, 0.0  ;;  %v2258_v39 = vld [vmem:[%s2505_s12 + $0x50] ss:$12 sps:$4 sm:$0xff]   ;;  %v2261_v41 = vld [vmem:[%s2505_s12 + $0x60] ss:$12 sps:$4 sm:$0xff]   ;;  %s2382_s24 = smov 112  }
  0x2a   : > { %632 = vadd.xlane.f32.xlu1 %v631_v10  ;;  %848 = vmatpush1.bf16.msra.mxu0 %v2249_v32  ;;  %v2259_v40 = vld [vmem:[%s2505_s12 + $0x64] ss:$12 sps:$4 sm:$0xff]   ;;  %v2262_v42 = vld [vmem:[%s2505_s12 + $0x68] ss:$12 sps:$4 sm:$0xff]   ;;  %v2266_v44 = vld [vmem:[%s2505_s12 + $0x80] ss:$12 sps:$4 sm:$0xff]  }
  0x2b   : > { %2092 = vmatpush3.bf16.msra.mxu1 %v2250_v33  ;;  %849 = vmatprep.subr.bf16.mxu0 %v2251_v34  ;;  %v2263_v43 = vld [vmem:[%s2505_s12 + $0x7c] ss:$12 sps:$4 sm:$0xff]   ;;  %v2265_v45 = vld [vmem:[%s2505_s12 + $0x78] ss:$12 sps:$4 sm:$0xff]   ;;  %v2267_v46 = vld [vmem:[%s2505_s12 + $0x94] ss:$12 sps:$4 sm:$0xff]  }
  0x2c   : > { %2093 = vmatprep.subr.bf16.mxu1 %v2254_v36  ;;  %v2270_v47 = vld [vmem:[%s2505_s12 + $0x98] ss:$12 sps:$4 sm:$0xff]   ;;  %v2269_v49 = vld [vmem:[%s2505_s12 + $0x90] ss:$12 sps:$4 sm:$0xff]   ;;  %v2273_v52 = vld [vmem:[%s2505_s12 + $0xa8] ss:$12 sps:$4 sm:$0xff]  }
  0x2d   : > { %628 = vadd.xlane.f32.xlu0 %v624_v11  ;;  %v2271_v50 = vld [vmem:[%s2505_s12 + $0xac] ss:$12 sps:$4 sm:$0xff]   ;;  %v2274_v51 = vld [vmem:[%s2505_s12 + $0xb0] ss:$12 sps:$4 sm:$0xff]   ;;  %v1968_v0 = vld [vmem:[%s2833_s29] ss:$0 sm:$0xff] }
  0x2e   : > { %850 = vmatpush1.bf16.msra.mxu0 %v2253_v35  ;;  %v1969_v10 = vld [vmem:[%s2834_s23] ss:$0 sm:$0xff]  ;;  %s2383_s27 = smov 16   ;;  %vm1318_vm5 = vcmask 261120   ;;  %s2838_s29 = sld [smem:[#allocation3_spill]] }
  0x2f   : > { %2094 = vmatpush3.bf16.msra.mxu1 %v2254_v36  ;;  %851 = vmatprep.subr.bf16.mxu0 %v2255_v37  ;;  %v2281_v6 = vld [vmem:[%s2528_s3 + $0x20] sm:$0xff]  }
  0x30   : > { %2095 = vmatprep.subr.bf16.mxu1 %v2258_v39 }
  0x32   : > { %852 = vmatpush1.bf16.msra.mxu0 %v2257_v38 }
  0x33   : > { %2096 = vmatpush3.bf16.msra.mxu1 %v2258_v39  ;;  %853 = vmatprep.subr.bf16.mxu0 %v2259_v40 }
  0x34   : > { %2097 = vmatprep.subr.bf16.mxu1 %v2262_v42  ;;  %p2033_p8 = scmp.ne.s32.totalorder %s2838_s29, 1 }
  0x36   : > { %854 = vmatpush1.bf16.msra.mxu0 %v2261_v41 }
  0x37   : > { %2098 = vmatpush3.bf16.msra.mxu1 %v2262_v42  ;;  %855 = vmatprep.subr.bf16.mxu0 %v2263_v43 }
  0x38   : > { %2099 = vmatprep.subr.bf16.mxu1 %v2266_v44 }
  0x3a   : > { %856 = vmatpush1.bf16.msra.mxu0 %v2265_v45 }
  0x3b   : > { %2100 = vmatpush3.bf16.msra.mxu1 %v2266_v44  ;;  %857 = vmatprep.subr.bf16.mxu0 %v2267_v46 }
  0x3c   : > { %2101 = vmatprep.subr.bf16.mxu1 %v2270_v47 }
  0x3e   : > { %858 = vmatpush1.bf16.msra.mxu0 %v2269_v49 }
  0x3f   : > { %2102 = vmatpush3.bf16.msra.mxu1 %v2270_v47  ;;  %859 = vmatprep.subr.bf16.mxu0 %v2271_v50 }
  0x40   : > { %2103 = vmatprep.subr.bf16.mxu1 %v2274_v51 }
  0x42   : > { %860 = vmatpush1.bf16.msra.mxu0 %v2273_v52 }
  0x43   : > { %2104 = vmatpush3.bf16.msra.mxu1 %v2274_v51 }
  0xb6   : > { %v627_v16 = vpop.xlane.xlu0 %626 }
  0xb7   : > { %v634_v17 = vmul.f32 0.03125, %v627_v16  ;;  %v633_v18 = vpop.xlane.xlu1 %632 }
  0xb8   : > { %v636_v19 = vmul.f32 0.03125, %v633_v18 }
  0xb9   : > { %v637_v20 = vsub.f32 %v2545_v3, %v634_v17 }
  0xba   : > { %v639_v21 = vsub.f32 %v2547_v5, %v636_v19  ;;  %v629_v22 = vpop.xlane.xlu0 %628 }
  0xbb   : > { %v635_v23 = vmul.f32 0.03125, %v629_v22  ;;  %v2572_v24 = vsel %vm622_vm1, %v637_v20, 0.0 }
  0xbc   : > { %v643_v25 = vmul.f32 %v2572_v24, %v2572_v24  ;;  %v2578_v26 = vsel %vm622_vm1, %v639_v21, 0.0 }
  0xbd   : > { %v638_v27 = vsub.f32 %v2551_v7, %v635_v23  ;;  %v645_v28 = vmul.f32 %v2578_v26, %v2578_v26 }
  0xbe   : > { %646 = vadd.xlane.f32.xlu1 %v643_v25 }
  0xbf   : > { %v650_v29 = vsel %vm630_vm0, %v645_v28, 0.0  ;;  %v2586_v30 = vsel %vm622_vm1, %v638_v27, 0.0  ;;  %v2626_v27 = vsel %vm630_vm0, 65535, %v2381_v48 }
  0xc0   : > { %v644_v31 = vmul.f32 %v2586_v30, %v2586_v30 }
  0xc2   : > { %651 = vadd.xlane.f32.xlu1 %v650_v29  ;;  %648 = vadd.xlane.f32.xlu0 %v644_v31 }
 0x14b   : > { %v647_v53 = vpop.xlane.xlu1 %646 }
 0x14c   : > { %v653_v54 = vmul.f32 0.03125, %v647_v53 }
 0x14e   : > { %v656_v55 = vadd.f32 1e-05, %v653_v54 }
 0x14f   : > { %v652_v56 = vpop.xlane.xlu1 %651  ;;  %v649_v57 = vpop.xlane.xlu0 %648 }
 0x150   : > { %2293 = vrsqrt.f32 %v656_v55  ;;  %v655_v58 = vmul.f32 0.03125, %v652_v56  ;;  %v654_v59 = vmul.f32 0.03125, %v649_v57 }
 0x152   : > { %v658_v60 = vadd.f32 1e-05, %v655_v58  ;;  %v657_v61 = vadd.f32 1e-05, %v654_v59 }
 0x154   : > { %2295 = vrsqrt.f32 %v658_v60 }
 0x155   : > { %2297 = vrsqrt.f32 %v657_v61 }
 0x15a   : > { %v2294_v62 = vpop.eup %2293 }
 0x15b   : > { %v662_v63 = vmul.f32 %v2294_v62, %v2572_v24 }
 0x15d   : > { %v671_v9 = vmul.f32 %v1968_v0, %v662_v63 }
 0x15e   : > { %v2296_v1 = vpop.eup %2295 }
 0x15f   : > { %v2298_v2 = vpop.eup %2297  ;;  %v664_v4 = vmul.f32 %v2296_v1, %v2578_v26  ;;  %v680_v14 = vadd.f32 %v1969_v10, %v671_v9 }
 0x160   : > { %v663_v8 = vmul.f32 %v2298_v2, %v2586_v30 }
 0x161   : > { %v673_v11 = vmul.f32 %v1968_v0, %v664_v4 }
 0x162   : > { %v672_v12 = vmul.f32 %v1968_v0, %v663_v8 }
 0x163   : > { %v682_v13 = vadd.f32 %v1969_v10, %v673_v11 }
 0x164   : > { %v681_v15 = vadd.f32 %v1969_v10, %v672_v12 }
 0x165   : > { %v684_v16 = vpack.c.bf16 %v682_v13, %v682_v13 }
 0x166   : > { %v683_v17 = vpack.c.bf16 %v681_v15, %v680_v14 }
 0x168   : > { %878 = vmatmul.mubr.bf16.vlgmr.msra.gmra.mrb[0].mxu0 %v683_v17  ;;  %2105 = vmatprep.mubr.bf16.mxu1 %v683_v17 }
 0x169   : > { %2106 = vmatmul.mubr.bf16.vlgmr.msra.gmra.mrb[0].mxu1 %v684_v16  ;;  %887 = vmatprep.mubr.bf16.mxu0 %v2381_v48 }
 0x170   : > { %888 = vmatmul.mubr.bf16.gmra.mrb[4].mxu0 %v684_v16 }
 0x23b   : > { %v879_v18 = vpop.f32.mrb[0].mxu0 }
 0x23c   : > { %v881_v19 = vpop.f32.mrb[1].mxu0  ;;  %v2107_v20 = vpop.f32.mrb[0].mxu1 }
 0x23d   : > { %v883_v21 = vpop.f32.mrb[2].mxu0  ;;  %v930_v22 = vpop.f32.mrb[1].mxu1  ;;  %v2623_v23 = vpack.c.bf16 %v2107_v20, %v2107_v20 }
 0x23e   : > { %v944_v24 = vpack.c.bf16 %v883_v21, %v879_v18  ;;  %v885_v25 = vpop.f32.mrb[3].mxu0  ;;  %v2108_v26 = vpop.f32.mrb[2].mxu1 }
 0x23f   : > { %v946_v28 = vpack.c.bf16 %v885_v25, %v881_v19  ;;  %v933_v29 = vpop.f32.mrb[3].mxu1  ;;  %v1057_v32 = vand.u32 %v2626_v27, %v2623_v23 }
 0x240   : > { %v2628_v30 = vpack.c.bf16 %v933_v29, %v930_v22  ;;  %2113 = vmatprep.mubr.msk.bf16.mxu0 %vm948_vm2, %v944_v24 }
 0x241   : > { %2189 = vmatprep.subr.msk.bf16.mxu0 %vm948_vm2, %v946_v28  ;;  %v956_v31 = vsel %vm948_vm2, %v946_v28, 0 }
 0x242   : > { %2110 = vmatpush3.bf16.xpose.msra.mxu0 %v956_v31  ;;  %2117 = vmatprep.subr.bf16.mxu1 %v2628_v30 }
 0x243   : > { %v889_v33 = vpop.f32.mrb[4].mxu0  ;;  %2118 = vmatpush3.bf16.msra.mxu1 %v2628_v30 }
 0x244   : > { %v891_v34 = vpop.f32.mrb[5].mxu0  ;;  %2119 = vmatprep.subr.bf16.mxu1 %v1057_v32  ;;  %v945_v39 = vpack.c.bf16 %v889_v33, %v889_v33 }
 0x245   : > { %v947_v35 = vpack.c.bf16 %v891_v34, %v891_v34  ;;  %v893_v36 = vpop.f32.mrb[6].mxu0 }
 0x246   : > { %v894_v37 = vpop.f32.mrb[7].mxu0 }
 0x247   : > { %2190 = vmatprep.subr.msk.bf16.mxu0 %vm948_vm2, %v947_v35  ;;  %2120 = vmatpush3.bf16.msra.mxu1 %v1057_v32  ;;  %v959_v38 = vsel %vm948_vm2, %v947_v35, 0 }
 0x24a   : > { %2112 = vmatpush3.bf16.xpose.msra.mxu0 %v959_v38 }
 0x251   : > { %2114 = vmatmul.mubr.msk.bf16.vlgmr.msra.gmra.mrb[8].mxu0 %vm948_vm2, %v945_v39 }
 0x324   : > { %v2115_v40 = vpop.f32.mrb[8].mxu0 }
 0x325   : > { %v995_v41 = vpop.f32.mrb[9].mxu0  ;;  %v1017_v46 = vsel %vm1016_vm4, %v2115_v40, -inf }
 0x326   : > { %v2116_v42 = vpop.f32.mrb[10].mxu0  ;;  %v1010_v43 = vsel %vm1009_vm3, %v995_v41, -inf }
 0x327   : > { %1011 = vmax.xlane.f32.xlu0 %v1010_v43  ;;  %v998_v44 = vpop.f32.mrb[11].mxu0 }
 0x328   : > { %v1013_v45 = vsel %vm1009_vm3, %v998_v44, -inf }
 0x329   : > { %1014 = vmax.xlane.f32.xlu1 %v1013_v45 }
 0x32b   : > { %1018 = vmax.xlane.f32.xlu0 %v1017_v46 }
 0x3b4   : > { %v1012_v47 = vpop.xlane.xlu0 %1011 }
 0x3b5   : > { %v1020_v48 = vsub.f32 %v995_v41, %v1012_v47 }
 0x3b6   : > { %v1015_v49 = vpop.xlane.xlu1 %1014 }
 0x3b7   : > { %v1023_v50 = vmul.f32 1.442695, %v1020_v48  ;;  %v1021_v51 = vsub.f32 %v998_v44, %v1015_v49 }
 0x3b8   : > { %v1019_v52 = vpop.xlane.xlu0 %1018 }
 0x3b9   : > { %2299 = vpow2.f32 %v1023_v50  ;;  %v1025_v53 = vmul.f32 1.442695, %v1021_v51  ;;  %v1022_v54 = vsub.f32 %v2115_v40, %v1019_v52 }
 0x3bb   : > { %2301 = vpow2.f32 %v1025_v53  ;;  %v1027_v55 = vmul.f32 1.442695, %v1022_v54 }
 0x3bd   : > { %2303 = vpow2.f32 %v1027_v55 }
 0x3c3   : > { %v2300_v56 = vpop.eup %2299 }
 0x3c4   : > { %v1029_v57 = vsel %vm1009_vm3, %v2300_v56, 0.0 }
 0x3c5   : > { %v2302_v58 = vpop.eup %2301  ;;  %1030 = vadd.xlane.f32.xlu1 %v1029_v57 }
 0x3c6   : > { %v1032_v59 = vsel %vm1009_vm3, %v2302_v58, 0.0 }
 0x3c7   : > { %v2304_v60 = vpop.eup %2303  ;;  %1033 = vadd.xlane.f32.xlu0 %v1032_v59 }
 0x3c8   : > { %v1035_v61 = vsel %vm1016_vm4, %v2304_v60, 0.0 }
 0x3c9   : > { %1036 = vadd.xlane.f32.xlu1 %v1035_v61 }
 0x3da   : > { %1117 = vrot.lane.b32.xlu1 %v947_v35, %s2382_s24 }
 0x3dd   : > { %1115 = vrot.lane.b32.xlu0 %v946_v28, %s2382_s24 }
 0x3de   : > { %1109 = vrot.lane.b32.xlu1 %v944_v24, %s2382_s24 }
 0x3e2   : > { %1111 = vrot.lane.b32.xlu1 %v945_v39, %s2382_s24 }
 0x452   : > { %v1031_v62 = vpop.xlane.xlu1 %1030 }
 0x453   : > { %2305 = vrcp.f32 %v1031_v62 }
 0x454   : > { %v1034_v63 = vpop.xlane.xlu0 %1033 }
 0x455   : > { %2307 = vrcp.f32 %v1034_v63 }
 0x456   : > { %v1037_v0 = vpop.xlane.xlu1 %1036 }
 0x457   : > { %2309 = vrcp.f32 %v1037_v0 }
 0x458   : > { %v1116_v1 = vpop.permute.xlu0 %1115 }
 0x459   : > { %2191 = vmatprep.subr.msk.bf16.mxu1 %vm948_vm2, %v1116_v1  ;;  %v1126_v15 = vsel %vm948_vm2, %v1116_v1, 0 }
 0x45a   : > { %v1118_v8 = vpop.permute.xlu1 %1117 }
 0x45b   : > { %v1129_v17 = vsel %vm948_vm2, %v1118_v8, 0 }
 0x45d   : > { %v2306_v2 = vpop.eup %2305 }
 0x45e   : > { %v1041_v9 = vmul.f32 %v2306_v2, %v2300_v56  ;;  %v1110_v16 = vpop.permute.xlu1 %1109 }
 0x45f   : > { %v2308_v4 = vpop.eup %2307 }
 0x460   : > { %v1042_v10 = vmul.f32 %v2308_v4, %v2302_v58 }
 0x461   : > { %v2310_v11 = vpop.eup %2309 }
 0x462   : > { %v1043_v12 = vmul.f32 %v2310_v11, %v2304_v60  ;;  %v1044_v13 = vpack.c.bf16 %v1042_v10, %v1041_v9  ;;  %v1112_v18 = vpop.permute.xlu1 %1111  ;;  %v2275_v60 = vld [vmem:[%s2510_s15] sm:$0xff]  }
 0x464   : > { %2121 = vmatprep.mubr.msk.bf16.mxu1 %vm1009_vm3, %v1044_v13  ;;  %v1045_v14 = vpack.c.bf16 %v1043_v12, %v1043_v12 }
 0x466   : > { %2122 = vmatmul.mubr.msk.bf16.vlgmr.msra.gmra.mrb[4].mxu1 %vm1009_vm3, %v1045_v14 }
 0x467   : > { %2126 = vmatpush3.bf16.xpose.msra.mxu1 %v1126_v15  ;;  %2129 = vmatprep.mubr.msk.bf16.mxu1 %vm948_vm2, %v1110_v16  ;;  %v2002_v15 = vld [vmem:[%s2835_s26] ss:$0 sm:$0xff] }
 0x468   : > { %2192 = vmatprep.subr.msk.bf16.mxu1 %vm948_vm2, %v1118_v8 }
 0x46f   : > { %2128 = vmatpush3.bf16.xpose.msra.mxu1 %v1129_v17 }
 0x476   : > { %2130 = vmatmul.mubr.msk.bf16.vlgmr.msra.gmra.mrb[8].mxu1 %vm948_vm2, %v1112_v18 }
 0x539   : > { %v2658_v19 = vpop.f32.mrb[4].mxu1 }
 0x53a   : > { %v2660_v20 = vpop.f32.mrb[5].mxu1 }
 0x53b   : > { %v2124_v21 = vpop.f32.mrb[6].mxu1 }
 0x53c   : > { %v2662_v22 = vpop.f32.mrb[7].mxu1 }
 0x549   : > { %v2131_v24 = vpop.f32.mrb[8].mxu1 }
 0x54a   : > { %v1165_v25 = vpop.f32.mrb[9].mxu1  ;;  %v1185_v32 = vsel %vm1016_vm4, %v2131_v24, -inf }
 0x54b   : > { %v2132_v26 = vpop.f32.mrb[10].mxu1  ;;  %v1179_v28 = vsel %vm1009_vm3, %v1165_v25, -inf }
 0x54c   : > { %1180 = vmax.xlane.f32.xlu0 %v1179_v28  ;;  %v1168_v29 = vpop.f32.mrb[11].mxu1 }
 0x54d   : > { %v1182_v31 = vsel %vm1009_vm3, %v1168_v29, -inf }
 0x54e   : > { %1183 = vmax.xlane.f32.xlu1 %v1182_v31  ;;  %v2277_v31 = vld [vmem:[%s2528_s3] sm:$0xff]  }
 0x54f   : > { %2149 = vmatprep.subr.bf16.mxu1 %v2277_v31 }
 0x550   : > { %1186 = vmax.xlane.f32.xlu0 %v1185_v32  ;;  %2150 = vmatpush3.bf16.msra.mxu1 %v2277_v31 }
 0x5d9   : > { %v1181_v33 = vpop.xlane.xlu0 %1180 }
 0x5da   : > { %v1188_v34 = vsub.f32 %v1165_v25, %v1181_v33 }
 0x5db   : > { %v1184_v35 = vpop.xlane.xlu1 %1183 }
 0x5dc   : > { %v1191_v36 = vmul.f32 1.442695, %v1188_v34  ;;  %v1189_v37 = vsub.f32 %v1168_v29, %v1184_v35 }
 0x5dd   : > { %v1187_v38 = vpop.xlane.xlu0 %1186 }
 0x5de   : > { %2311 = vpow2.f32 %v1191_v36  ;;  %v1193_v39 = vmul.f32 1.442695, %v1189_v37  ;;  %v1190_v40 = vsub.f32 %v2131_v24, %v1187_v38 }
 0x5e0   : > { %2313 = vpow2.f32 %v1193_v39  ;;  %v1195_v41 = vmul.f32 1.442695, %v1190_v40 }
 0x5e2   : > { %2315 = vpow2.f32 %v1195_v41 }
 0x5e8   : > { %v2312_v42 = vpop.eup %2311 }
 0x5e9   : > { %v1197_v43 = vsel %vm1009_vm3, %v2312_v42, 0.0 }
 0x5ea   : > { %v2314_v44 = vpop.eup %2313  ;;  %1198 = vadd.xlane.f32.xlu0 %v1197_v43 }
 0x5eb   : > { %v1200_v47 = vsel %vm1009_vm3, %v2314_v44, 0.0 }
 0x5ec   : > { %v2316_v45 = vpop.eup %2315 }
 0x5ed   : > { %v1203_v46 = vsel %vm1016_vm4, %v2316_v45, 0.0 }
 0x5ee   : > { %1204 = vadd.xlane.f32.xlu1 %v1203_v46  ;;  %1201 = vadd.xlane.f32.xlu0 %v1200_v47  ;;  %v2278_v47 = vld [vmem:[%s2528_s3 + $0x8] sm:$0xff]  }
 0x5ef   : > { %2151 = vmatprep.subr.bf16.mxu1 %v2278_v47 }
 0x5f0   : > { %2152 = vmatpush3.bf16.msra.mxu1 %v2278_v47 }
 0x5ff   : > { %1218 = vrot.lane.b32.xlu1 %v2623_v23, %s2382_s24 }
 0x604   : > { %1216 = vrot.lane.b32.xlu0 %v2628_v30, %s2382_s24 }
 0x677   : > { %v1199_v48 = vpop.xlane.xlu0 %1198 }
 0x678   : > { %2317 = vrcp.f32 %v1199_v48  ;;  %v2279_v48 = vld [vmem:[%s2528_s3 + $0x10] sm:$0xff]  }
 0x679   : > { %2153 = vmatprep.subr.bf16.mxu1 %v2279_v48 }
 0x67a   : > { %2154 = vmatpush3.bf16.msra.mxu1 %v2279_v48 }
 0x67b   : > { %v1202_v49 = vpop.xlane.xlu0 %1201  ;;  %v1205_v50 = vpop.xlane.xlu1 %1204 }
 0x67c   : > { %2319 = vrcp.f32 %v1202_v49  ;;  %v2280_v49 = vld [vmem:[%s2528_s3 + $0x18] sm:$0xff]  }
 0x67d   : > { %2321 = vrcp.f32 %v1205_v50  ;;  %2155 = vmatprep.subr.bf16.mxu1 %v2280_v49  ;;  %v2282_v50 = vld [vmem:[%s2528_s3 + $0x28] sm:$0xff]  }
 0x67e   : > { %2156 = vmatpush3.bf16.msra.mxu1 %v2280_v49 }
 0x67f   : > { %v1217_v51 = vpop.permute.xlu0 %1216  ;;  %v1219_v52 = vpop.permute.xlu1 %1218  ;;  %2157 = vmatprep.subr.bf16.mxu1 %v2281_v6 }
 0x680   : > { %v1228_v53 = vand.u32 %v1219_v52, %v2626_v27  ;;  %2133 = vmatprep.subr.bf16.mxu0 %v1217_v51  ;;  %v2276_v27 = vld [vmem:[%s2510_s15 + $0x8] sm:$0xff]   ;;  %v2284_v52 = vld [vmem:[%s2528_s3 + $0x38] sm:$0xff]  }
 0x681   : > { %2134 = vmatpush3.bf16.msra.mxu0 %v1217_v51  ;;  %v2283_v51 = vld [vmem:[%s2528_s3 + $0x30] sm:$0xff]  }
 0x682   : > { %2135 = vmatprep.subr.bf16.mxu0 %v1228_v53  ;;  %v2318_v54 = vpop.eup %2317  ;;  %2158 = vmatpush3.bf16.msra.mxu1 %v2281_v6 }
 0x683   : > { %v1209_v30 = vmul.f32 %v2318_v54, %v2312_v42  ;;  %2159 = vmatprep.subr.bf16.mxu1 %v2282_v50 }
 0x685   : > { %2136 = vmatpush3.bf16.msra.mxu0 %v1228_v53 }
 0x686   : > { %v2320_v23 = vpop.eup %2319  ;;  %2141 = vmatprep.subr.bf16.mxu0 %v2275_v60  ;;  %2160 = vmatpush3.bf16.msra.mxu1 %v2282_v50 }
 0x687   : > { %v2322_v55 = vpop.eup %2321  ;;  %v1210_v56 = vmul.f32 %v2320_v23, %v2314_v44  ;;  %2161 = vmatprep.subr.bf16.mxu1 %v2283_v51 }
 0x688   : > { %v1211_v57 = vmul.f32 %v2322_v55, %v2316_v45 }
 0x689   : > { %v1212_v58 = vpack.c.bf16 %v1210_v56, %v1209_v30 }
 0x68a   : > { %v1213_v59 = vpack.c.bf16 %v1211_v57, %v1211_v57  ;;  %2162 = vmatpush3.bf16.msra.mxu1 %v2283_v51 }
 0x68b   : > { %2137 = vmatprep.mubr.msk.bf16.mxu0 %vm1009_vm3, %v1212_v58  ;;  %2163 = vmatprep.subr.bf16.mxu1 %v2284_v52 }
 0x68c   : > { %2138 = vmatmul.mubr.msk.bf16.vlgmr.msra.gmra.mrb[12].mxu0 %vm1009_vm3, %v1213_v59 }
 0x68d   : > { %2142 = vmatpush3.bf16.msra.mxu0 %v2275_v60 }
 0x68e   : > { %2143 = vmatprep.subr.bf16.mxu0 %v2276_v27  ;;  %2164 = vmatpush3.bf16.msra.mxu1 %v2284_v52 }
 0x691   : > { %2144 = vmatpush3.bf16.msra.mxu0 %v2276_v27 }
 0x75f   : > { %v2139_v61 = vpop.f32.mrb[12].mxu0 }
 0x760   : > { %v1264_v62 = vpop.f32.mrb[13].mxu0 }
 0x761   : > { %v2140_v63 = vpop.f32.mrb[14].mxu0 }
 0x762   : > { %v1267_v0 = vpop.f32.mrb[15].mxu0 }
 0x763   : > { %v2238_v1 = vpack.i.bf16 %v1267_v0, %v1264_v62 }
 0x765   : > { %2239 = vrot.lane.b32.xlu1 %v2238_v1, %s2383_s27 }
 0x769   : > { %1285 = vrot.lane.b32.xlu1 %v2139_v61, %s2383_s27  ;;  %v2007_v61 = vld [vmem:[%s2836_s17] ss:$0 sm:$0xff] }
 0x7d7   : > { %v2240_v2 = vpop.permute.xlu1 %2239 }
 0x7d8   : > { %v2242_v4 = vunpack.i.h.bf16 %v2240_v2  ;;  %v2241_v8 = vunpack.i.l.bf16 %v2240_v2 }
 0x7da   : > { %v1291_v9 = vsel %vm948_vm2, %v2662_v22, %v2242_v4  ;;  %v1290_v10 = vsel %vm948_vm2, %v2660_v20, %v2241_v8  ;;  %v2008_v4 = vld [vmem:[%s2837_s25] ss:$0 sm:$0xff] }
 0x7db   : > { %v1297_v11 = vpack.c.bf16 %v1291_v9, %v1290_v10  ;;  %v1286_v12 = vpop.permute.xlu1 %1285 }
 0x7dc   : > { %v1292_v13 = vsel %vm948_vm2, %v2658_v19, %v1286_v12 }
 0x7dd   : > { %v1298_v14 = vpack.c.bf16 %v1292_v13, %v1292_v13  ;;  %2145 = vmatprep.mubr.msk.bf16.mxu0 %vm1318_vm5, %v1297_v11 }
 0x7df   : > { %2146 = vmatmul.mubr.msk.bf16.vlgmr.msra.gmra.mrb[16].mxu0 %vm1318_vm5, %v1298_v14 }
 0x8b2   : > { %v2147_v16 = vpop.f32.mrb[16].mxu0 }
 0x8b3   : > { %v1368_v17 = vadd.f32 %v2147_v16, %v2002_v15  ;;  %v1359_v18 = vpop.f32.mrb[17].mxu0  ;;  %v2286_v16 = vld [vmem:[%s2533_s13 + $0x8] sm:$0xff]  }
 0x8b4   : > { %v1360_v21 = vadd.f32 %v2002_v15, %v1359_v18  ;;  %v2148_v20 = vpop.f32.mrb[18].mxu0  ;;  %v2288_v18 = vld [vmem:[%s2533_s13 + $0x18] sm:$0xff]  }
 0x8b5   : > { %v2691_v22 = vadd.f32 %v1368_v17, %v2547_v5  ;;  %v1362_v24 = vpop.f32.mrb[19].mxu0  ;;  %v2287_v17 = vld [vmem:[%s2533_s13 + $0x10] sm:$0xff]   ;;  %v2290_v20 = vld [vmem:[%s2533_s13 + $0x28] sm:$0xff]  }
 0x8b6   : > { %v2694_v19 = vadd.f32 %v1360_v21, %v2545_v3  ;;  %v1363_v25 = vadd.f32 %v2002_v15, %v1362_v24  ;;  %v2285_v15 = vld [vmem:[%s2533_s13] sm:$0xff]   ;;  %v2291_v24 = vld [vmem:[%s2533_s13 + $0x30] sm:$0xff]  }
 0x8b7   : > { %v1380_v29 = vsel %vm622_vm1, %v2691_v22, 0.0  ;;  %2169 = vmatprep.subr.bf16.mxu0 %v2285_v15  ;;  %v2289_v21 = vld [vmem:[%s2533_s13 + $0x20] sm:$0xff]  }
 0x8b8   : > { %v2697_v26 = vadd.f32 %v1363_v25, %v2551_v7  ;;  %v1378_v28 = vsel %vm622_vm1, %v2694_v19, 0.0  ;;  %v1385_v3 = vsel %vm630_vm0, %v1380_v29, 0.0  ;;  %2170 = vmatpush3.bf16.msra.mxu0 %v2285_v15  ;;  %v2292_v25 = vld [vmem:[%s2533_s13 + $0x38] sm:$0xff]  }
 0x8b9   : > { %1381 = vadd.xlane.f32.xlu0 %v1378_v28  ;;  %2171 = vmatprep.subr.bf16.mxu0 %v2286_v16  ;;  %v2009_v28 = vld [vmem:[%s590_s21] ss:$0 sm:$0xff] }
 0x8ba   : > { %v1379_v5 = vsel %vm622_vm1, %v2697_v26, 0.0 }
 0x8bb   : > { %1383 = vadd.xlane.f32.xlu1 %v1379_v5 }
 0x8bc   : > { %2172 = vmatpush3.bf16.msra.mxu0 %v2286_v16 }
 0x8bd   : > { %1386 = vadd.xlane.f32.xlu0 %v1385_v3  ;;  %2173 = vmatprep.subr.bf16.mxu0 %v2287_v17 }
 0x8c0   : > { %2174 = vmatpush3.bf16.msra.mxu0 %v2287_v17 }
 0x8c1   : > { %2175 = vmatprep.subr.bf16.mxu0 %v2288_v18 }
 0x8c4   : > { %2176 = vmatpush3.bf16.msra.mxu0 %v2288_v18 }
 0x8c5   : > { %2177 = vmatprep.subr.bf16.mxu0 %v2289_v21 }
 0x8c8   : > { %2178 = vmatpush3.bf16.msra.mxu0 %v2289_v21 }
 0x8c9   : > { %2179 = vmatprep.subr.bf16.mxu0 %v2290_v20 }
 0x8cc   : > { %2180 = vmatpush3.bf16.msra.mxu0 %v2290_v20 }
 0x8cd   : > { %2181 = vmatprep.subr.bf16.mxu0 %v2291_v24 }
 0x8d0   : > { %2182 = vmatpush3.bf16.msra.mxu0 %v2291_v24 }
 0x8d1   : > { %2183 = vmatprep.subr.bf16.mxu0 %v2292_v25 }
 0x8d4   : > { %2184 = vmatpush3.bf16.msra.mxu0 %v2292_v25 }
 0x946   : > { %v1382_v7 = vpop.xlane.xlu0 %1381 }
 0x947   : > { %v1388_v32 = vmul.f32 0.03125, %v1382_v7 }
 0x948   : > { %v1384_v33 = vpop.xlane.xlu1 %1383 }
 0x949   : > { %v1391_v34 = vsub.f32 %v2694_v19, %v1388_v32  ;;  %v1389_v35 = vmul.f32 0.03125, %v1384_v33 }
 0x94a   : > { %v1387_v36 = vpop.xlane.xlu0 %1386 }
 0x94b   : > { %v1392_v37 = vsub.f32 %v2697_v26, %v1389_v35  ;;  %v1390_v38 = vmul.f32 0.03125, %v1387_v36  ;;  %v1394_v39 = vsel %vm622_vm1, %v1391_v34, 0.0 }
 0x94c   : > { %v1397_v40 = vmul.f32 %v1394_v39, %v1394_v39 }
 0x94d   : > { %v1393_v41 = vsub.f32 %v2691_v22, %v1390_v38  ;;  %v1395_v42 = vsel %vm622_vm1, %v1392_v37, 0.0 }
 0x94e   : > { %1400 = vadd.xlane.f32.xlu0 %v1397_v40  ;;  %v1398_v44 = vmul.f32 %v1395_v42, %v1395_v42 }
 0x94f   : > { %v1396_v43 = vsel %vm622_vm1, %v1393_v41, 0.0 }
 0x950   : > { %v1399_v45 = vmul.f32 %v1396_v43, %v1396_v43 }
 0x952   : > { %1402 = vadd.xlane.f32.xlu0 %v1398_v44  ;;  %v1404_v46 = vsel %vm630_vm0, %v1399_v45, 0.0 }
 0x953   : > { %1405 = vadd.xlane.f32.xlu1 %v1404_v46 }
 0x9db   : > { %v1401_v53 = vpop.xlane.xlu0 %1400 }
 0x9dc   : > { %v1407_v54 = vmul.f32 0.03125, %v1401_v53 }
 0x9de   : > { %v1410_v23 = vadd.f32 1e-05, %v1407_v54 }
 0x9df   : > { %v1403_v55 = vpop.xlane.xlu0 %1402 }
 0x9e0   : > { %2323 = vrsqrt.f32 %v1410_v23  ;;  %v1408_v30 = vmul.f32 0.03125, %v1403_v55  ;;  %v1406_v56 = vpop.xlane.xlu1 %1405 }
 0x9e1   : > { %v1409_v57 = vmul.f32 0.03125, %v1406_v56 }
 0x9e2   : > { %v1411_v58 = vadd.f32 1e-05, %v1408_v30 }
 0x9e3   : > { %v1412_v59 = vadd.f32 1e-05, %v1409_v57 }
 0x9e4   : > { %2325 = vrsqrt.f32 %v1411_v58 }
 0x9e5   : > { %2327 = vrsqrt.f32 %v1412_v59 }
 0x9ea   : > { %v2324_v60 = vpop.eup %2323 }
 0x9eb   : > { %v1416_v27 = vmul.f32 %v2324_v60, %v1394_v39 }
 0x9ed   : > { %v1425_v1 = vmul.f32 %v2007_v61, %v1416_v27 }
 0x9ee   : > { %v2326_v62 = vpop.eup %2325 }
 0x9ef   : > { %v2328_v63 = vpop.eup %2327  ;;  %v1417_v0 = vmul.f32 %v2326_v62, %v1395_v42  ;;  %v1434_v10 = vadd.f32 %v2008_v4, %v1425_v1 }
 0x9f0   : > { %v1418_v2 = vmul.f32 %v2328_v63, %v1396_v43 }
 0x9f1   : > { %v1426_v8 = vmul.f32 %v2007_v61, %v1417_v0 }
 0x9f2   : > { %v1427_v9 = vmul.f32 %v2007_v61, %v1418_v2 }
 0x9f3   : > { %v1435_v11 = vadd.f32 %v2008_v4, %v1426_v8 }
 0x9f4   : > { %v1436_v12 = vadd.f32 %v2008_v4, %v1427_v9 }
 0x9f5   : > { %v1437_v13 = vpack.c.bf16 %v1435_v11, %v1434_v10 }
 0x9f6   : > { %v1438_v14 = vpack.c.bf16 %v1436_v12, %v1436_v12 }
 0x9f7   : > { %2165 = vmatprep.mubr.bf16.mxu1 %v1437_v13 }
 0x9f8   : > { %2166 = vmatmul.mubr.bf16.vlgmr.msra.gmra.mrb[12].mxu1 %v1438_v14 }
 0xacb   : > { %v2167_v29 = vpop.f32.mrb[12].mxu1 }
 0xacc   : > { %v2750_v5 = vadd.f32 %v2167_v29, %v2009_v28  ;;  %v1544_v3 = vpop.f32.mrb[13].mxu1 }
 0xacd   : > { %v2752_v31 = vadd.f32 %v2009_v28, %v1544_v3  ;;  %v2168_v7 = vpop.f32.mrb[14].mxu1 }
 0xace   : > { %v2755_v32 = vmul.f32 0.70710677, %v2750_v5  ;;  %v1547_v33 = vpop.f32.mrb[15].mxu1 }
 0xacf   : > { %v2758_v34 = vmul.f32 0.70710677, %v2752_v31  ;;  %v2760_v35 = vadd.f32 %v2009_v28, %v1547_v33 }
 0xad0   : > { %v1566_v36 = vand.u32 2147483647, %v2755_v32  ;;  %vm1626_vm6 = vcmp.ge.f32.partialorder %v2755_v32, 0.0 }
 0xad1   : > { %v1564_v37 = vand.u32 2147483647, %v2758_v34  ;;  %v2765_v38 = vmul.f32 0.70710677, %v2760_v35  ;;  %vm1624_vm7 = vcmp.ge.f32.partialorder %v2758_v34, 0.0 }
 0xad2   : > { %v1569_v39 = vmul.f32 0.3275911, %v1566_v36  ;;  %v1608_v46 = vsub.f32 0.0, %v1566_v36 }
 0xad3   : > { %v1567_v40 = vmul.f32 0.3275911, %v1564_v37  ;;  %v1565_v41 = vand.u32 2147483647, %v2765_v38  ;;  %v1606_v47 = vsub.f32 0.0, %v1564_v37  ;;  %vm1625_vm8 = vcmp.ge.f32.partialorder %v2765_v38, 0.0 }
 0xad4   : > { %v1572_v42 = vadd.f32 1.0, %v1569_v39  ;;  %v1611_v49 = vmul.f32 %v1608_v46, %v1566_v36  ;;  %v1560_v46 = vmul.f32 0.5, %v2750_v5  ;;  %v2024_v38 = vld [vmem:[%s598_s14] ss:$0 sm:$0xff] }
 0xad5   : > { %v1570_v43 = vadd.f32 1.0, %v1567_v40  ;;  %v1568_v44 = vmul.f32 0.3275911, %v1565_v41  ;;  %v1607_v6 = vsub.f32 0.0, %v1565_v41  ;;  %v1609_v52 = vmul.f32 %v1606_v47, %v1564_v37 }
 0xad6   : > { %2329 = vrcp.f32 %v1572_v42  ;;  %v1616_v55 = vmul.f32 1.442695, %v1611_v49  ;;  %v1559_v49 = vmul.f32 0.5, %v2760_v35 }
 0xad7   : > { %2331 = vrcp.f32 %v1570_v43  ;;  %v1571_v45 = vadd.f32 1.0, %v1568_v44  ;;  %v1610_v56 = vmul.f32 %v1607_v6, %v1565_v41  ;;  %v1612_v58 = vmul.f32 1.442695, %v1609_v52 }
 0xad9   : > { %2333 = vrcp.f32 %v1571_v45  ;;  %v1614_v63 = vmul.f32 1.442695, %v1610_v56 }
 0xada   : > { %2335 = vpow2.f32 %v1616_v55 }
 0xadb   : > { %2337 = vpow2.f32 %v1612_v58 }
 0xadc   : > { %2339 = vpow2.f32 %v1614_v63 }
 0xae0   : > { %v2330_v48 = vpop.eup %2329 }
 0xae1   : > { %v2332_v50 = vpop.eup %2331  ;;  %v1581_v51 = vmul.f32 1.0614054, %v2330_v48 }
 0xae2   : > { %v1579_v53 = vmul.f32 1.0614054, %v2332_v50 }
 0xae3   : > { %v2020_v54 = vadd.f32 -1.4531521, %v1581_v51  ;;  %v2334_v23 = vpop.eup %2333 }
 0xae4   : > { %v2018_v30 = vadd.f32 -1.4531521, %v1579_v53  ;;  %v1580_v59 = vmul.f32 1.0614054, %v2334_v23  ;;  %v2336_v18 = vpop.eup %2335 }
 0xae5   : > { %v1587_v57 = vmul.f32 %v2330_v48, %v2020_v54  ;;  %v2338_v20 = vpop.eup %2337 }
 0xae6   : > { %v1585_v60 = vmul.f32 %v2332_v50, %v2018_v30  ;;  %v2019_v61 = vadd.f32 -1.4531521, %v1580_v59  ;;  %v2340_v7 = vpop.eup %2339 }
 0xae7   : > { %v1590_v27 = vadd.f32 1.4214138, %v1587_v57 }
 0xae8   : > { %v1588_v62 = vadd.f32 1.4214138, %v1585_v60  ;;  %v1586_v1 = vmul.f32 %v2334_v23, %v2019_v61 }
 0xae9   : > { %v1593_v0 = vmul.f32 %v2330_v48, %v1590_v27 }
 0xaea   : > { %v1591_v2 = vmul.f32 %v2332_v50, %v1588_v62  ;;  %v1589_v8 = vadd.f32 1.4214138, %v1586_v1 }
 0xaeb   : > { %v2023_v4 = vadd.f32 -0.28449672, %v1593_v0 }
 0xaec   : > { %v2021_v9 = vadd.f32 -0.28449672, %v1591_v2  ;;  %v1592_v11 = vmul.f32 %v2334_v23, %v1589_v8 }
 0xaed   : > { %v1599_v10 = vmul.f32 %v2330_v48, %v2023_v4 }
 0xaee   : > { %v1597_v12 = vmul.f32 %v2332_v50, %v2021_v9  ;;  %v2022_v14 = vadd.f32 -0.28449672, %v1592_v11 }
 0xaef   : > { %v1602_v13 = vadd.f32 0.2548296, %v1599_v10 }
 0xaf0   : > { %v1600_v15 = vadd.f32 0.2548296, %v1597_v12  ;;  %v1598_v17 = vmul.f32 %v2334_v23, %v2022_v14 }
 0xaf1   : > { %v1605_v16 = vmul.f32 %v2330_v48, %v1602_v13  ;;  %v1558_v48 = vmul.f32 0.5, %v2752_v31 }
 0xaf2   : > { %v1603_v21 = vmul.f32 %v2332_v50, %v1600_v15  ;;  %v1601_v25 = vadd.f32 0.2548296, %v1598_v17 }
 0xaf3   : > { %v1620_v24 = vmul.f32 %v2336_v18, %v1605_v16 }
 0xaf4   : > { %v1618_v28 = vmul.f32 %v2338_v20, %v1603_v21  ;;  %v1604_v3 = vmul.f32 %v2334_v23, %v1601_v25 }
 0xaf5   : > { %v1623_v29 = vsub.f32 1.0, %v1620_v24 }
 0xaf6   : > { %v1621_v33 = vsub.f32 1.0, %v1618_v28  ;;  %v1619_v37 = vmul.f32 %v2340_v7, %v1604_v3 }
 0xaf7   : > { %v1629_v36 = vsub.f32 0.0, %v1623_v29 }
 0xaf8   : > { %v1627_v39 = vsub.f32 0.0, %v1621_v33  ;;  %v1622_v41 = vsub.f32 1.0, %v1619_v37 }
 0xaf9   : > { %v1632_v40 = vsel %vm1626_vm6, %v1623_v29, %v1629_v36 }
 0xafa   : > { %v1630_v42 = vsel %vm1624_vm7, %v1621_v33, %v1627_v39  ;;  %v1635_v43 = vadd.f32 1.0, %v1632_v40  ;;  %v1628_v44 = vsub.f32 0.0, %v1622_v41 }
 0xafb   : > { %v1633_v45 = vadd.f32 1.0, %v1630_v42 }
 0xafc   : > { %v1631_v47 = vsel %vm1625_vm8, %v1622_v41, %v1628_v44  ;;  %v1638_v6 = vmul.f32 %v1635_v43, %v1560_v46 }
 0xafd   : > { %v1634_v32 = vadd.f32 1.0, %v1631_v47  ;;  %v1636_v50 = vmul.f32 %v1633_v45, %v1558_v48 }
 0xafe   : > { %v1640_v52 = vpack.c.bf16 %v1638_v6, %v1638_v6 }
 0xaff   : > { %v1637_v51 = vmul.f32 %v1634_v32, %v1559_v49 }
 0xb01   : > { %v1639_v34 = vpack.c.bf16 %v1637_v51, %v1636_v50 }
 0xb03   : > { %2185 = vmatprep.mubr.bf16.mxu0 %v1639_v34 }
 0xb04   : > { %2186 = vmatmul.mubr.bf16.vlgmr.msra.gmra.mrb[20].mxu0 %v1640_v52 }
 0xbd7   : > { %v2187_v53 = vpop.f32.mrb[20].mxu0 }
 0xbd8   : > { %v1755_v5 = vadd.f32 %v2187_v53, %v2024_v38  ;;  %v1746_v54 = vpop.f32.mrb[21].mxu0 }
 0xbd9   : > { %v1747_v23 = vadd.f32 %v2024_v38, %v1746_v54  ;;  %v2188_v31 = vpop.f32.mrb[22].mxu0  ;;  %1769 = sbr.rel (%p2033_p8) target bundleno = 3048 (0xbe8), region = 76 }
 0xbda   : > { %v1762_v35 = vadd.f32 %v1755_v5, %v2691_v22  ;;  %v1749_v55 = vpop.f32.mrb[23].mxu0 }
 0xbdb   : > { %v1760_v30 = vadd.f32 %v1747_v23, %v2694_v19  ;;  %v1750_v56 = vadd.f32 %v2024_v38, %v1749_v55 }
 0xbdc   : > { %1765 = vst [vmem:[#allocation2 + $0x10] sm:$0x1] %v1762_v35 }
 0xbdd   : > { %1763 = vst [vmem:[#allocation2] sm:$0xff] %v1760_v30  ;;  %v1761_v57 = vadd.f32 %v1750_v56, %v2697_v26 }
 0xbdf   : > { %1764 = vst [vmem:[#allocation2 + $0x8] sm:$0xff] %v1761_v57 }
 0xbe3   : > { %v1772_v60 = vld [vmem:[#allocation2 + $0x10] sm:$0x1] }
 0xbe4   : > { %v1770_v58 = vld [vmem:[#allocation2] sm:$0xff]  ;;  %1775 = vst [vmem:[%s2542_s4 + $0x10] sm:$0x1] %v1772_v60 }
 0xbe5   : > { %1773 = vst [vmem:[%s2542_s4] sm:$0xff] %v1770_v58 }
 0xbe6   : > { %v1771_v59 = vld [vmem:[#allocation2 + $0x8] sm:$0xff] }
 0xbe7   : > { %1774 = vst [vmem:[%s2542_s4 + $0x8] sm:$0xff] %v1771_v59 }
 0xbe8 PF: > { %s2839_s28 = sld [smem:[#allocation6_spill]]  ;;  %s2840_s21 = sld [smem:[#allocation4_spill]] }
 0xbe9   : > { %s2841_s22 = sld [smem:[#allocation5_spill]]  ;;  %s2842_s23 = sld [smem:[#allocation7_spill]] }
 0xbea   : > { %s2843_s24 = sld [smem:[#allocation8_spill]] }
 0xbee   : > { %s22_s25 = sadd.s32 1, %s2839_s28  }
 0xbef   : > { %p19_p9 = scmp.ge.s32.totalorder %s22_s25, 6  }
 0xbf1   :  { %21 = sbr.rel (!%p19_p9) target bundleno = 5 (0x5), region = 139 }

</bundles_post_ra>
